<compile_context>
chip_gen: v7x
topology: tpu7x:2x2x1
jax: 0.10.0
libtpu: 0.0.40
codegen_flags: <defaults>
</compile_context>

<pallas_src>
import jax
import jax.numpy as jnp
from jax.experimental import pallas as pl
from jax.experimental.pallas import tpu as pltpu


# ----------------------------- model dimensions ------------------------------
B = 2            # batch
CIN = 3          # image channels (RGB)
CIN_PAD = 8      # sublane-padded contraction dim for the stem matmul (row 3 = bias)
H = W = 16       # small spatial size
HW = H * W
FEAT = 1536      # efficientnet-b3 classifier.in_features
N_META = 8       # n_meta_features
META_H1 = 512
META_H2 = 128
OUT_DIM = 9
OUT_PAD = 128    # lane-dense padded output width; sliced back to OUT_DIM in the wrapper

FC = 512         # FEAT chunk per grid step  -> grid = (FEAT // FC,) = (3,)
SUB = 128        # lanes per in-kernel sub-chunk (4 per grid step)


def _swish(v):
    # Swish.forward: i * sigmoid(i); sigmoid(i) = 0.5*(1+tanh(i/2))
    # -> a single EUP transcendental per element instead of exp + reciprocal.
    return v * (0.5 * jnp.tanh(0.5 * v) + 0.5)


# ------------------------------ fused kernel ---------------------------------
# Per grid step k (k over FEAT chunks of FC):
#   x:       [B*HW, CIN_PAD]   image, flat rows, ones column at CIN (bias fusion)   (resident)
#   meta:    [B, N_META]                                                            (resident)
#   w_stem:  [CIN_PAD, FC]     stem weight chunk (row CIN holds the stem bias)      (streamed)
#   w1,b1:   [N_META,512],[1,512]   meta Linear 1 (BN pre-folded)                   (resident)
#   w2,b2:   [512,128],[1,128]      meta Linear 2 (BN pre-folded)                   (resident)
#   wf_feat: [FC, OUT_PAD]     myfc rows for this FEAT chunk (1/HW pre-folded)      (streamed)
#   wf_meta: [128, OUT_PAD], bf: [1, OUT_PAD]                                       (resident)
#   out:     [B, OUT_PAD]      resident output block doubling as the accumulator
def enetv2_kernel(x_ref, meta_ref,
                  w_stem_ref,
                  w1_ref, b1_ref, w2_ref, b2_ref,
                  wf_feat_ref, wf_meta_ref, bf_ref,
                  o_ref):
    k = pl.program_id(0)

    # ---- meta branch (Linear -> folded BN -> Swish, twice) + final bias:
    #      computed once, seeds the output accumulator. Dropouts = identity. ----
    @pl.when(k == 0)
    def _():
        h1 = _swish(jnp.dot(meta_ref[...], w1_ref[...],
                            preferred_element_type=jnp.float32) + b1_ref[...])
        h2 = _swish(jnp.dot(h1, w2_ref[...],
                            preferred_element_type=jnp.float32) + b2_ref[...])
        o_ref[...] = (jnp.dot(h2, wf_meta_ref[...],
                              preferred_element_type=jnp.float32) + bf_ref[...])

    # ---- backbone stand-in stem for this FEAT chunk:
    #      MXU matmul (bias fused via the ones column) -> Swish -> global-avg-pool
    #      (sum; 1/HW folded into wf_feat) -> project into the padded 9-wide output.
    #      Done per 128-lane sub-chunk so the [B*HW, FEAT] intermediate is never
    #      materialized; only the [B, OUT_PAD] accumulator is carried. ----
    x = x_ref[...]                                                  # [B*HW, CIN_PAD]
    partial = jnp.zeros((B, OUT_PAD), jnp.float32)
    for j in range(FC // SUB):                                      # static unroll (4)
        lo = j * SUB
        s = jnp.dot(x, w_stem_ref[:, lo:lo + SUB],
                    preferred_element_type=jnp.float32)             # [B*HW, SUB]
        s = _swish(s)
        pooled = jnp.sum(s.reshape(B, HW, SUB), axis=1)             # [B, SUB]
        partial = partial + jnp.dot(pooled, wf_feat_ref[lo:lo + SUB, :],
                                    preferred_element_type=jnp.float32)
    o_ref[...] += partial


def _resident(shape):
    """Full-array block whose index never changes -> stays VMEM-resident across steps."""
    nd = len(shape)
    return pl.BlockSpec(shape, lambda k, _nd=nd: (0,) * _nd)


def enetv2_fused_call(x_pad, x_meta, kp):
    args = (
        x_pad, x_meta,
        kp["w_stem"],
        kp["w1"], kp["b1"], kp["w2"], kp["b2"],
        kp["wf_feat"], kp["wf_meta"], kp["bf"],
    )
    in_specs = [
        _resident(x_pad.shape),                               # x      [B*HW, CIN_PAD]
        _resident(x_meta.shape),                              # meta   [B, N_META]
        pl.BlockSpec((CIN_PAD, FC), lambda k: (0, k)),        # w_stem streamed over FEAT
        _resident(kp["w1"].shape), _resident(kp["b1"].shape),
        _resident(kp["w2"].shape), _resident(kp["b2"].shape),
        pl.BlockSpec((FC, OUT_PAD), lambda k: (k, 0)),        # wf_feat streamed over its K dim
        _resident(kp["wf_meta"].shape), _resident(kp["bf"].shape),
    ]
    return pl.pallas_call(
        enetv2_kernel,
        out_shape=jax.ShapeDtypeStruct((B, OUT_PAD), jnp.float32),
        grid=(FEAT // FC,),
        in_specs=in_specs,
        out_specs=pl.BlockSpec((B, OUT_PAD), lambda k: (0, 0)),
        compiler_params=pltpu.CompilerParams(
            dimension_semantics=("arbitrary",)),              # FEAT axis is a reduction
    )(*args)


def enetv2_forward(x_nchw, x_meta, kp):
    # NCHW -> NHWC -> [B*HW, CIN_PAD]; column CIN is 1.0 so the stem bias
    # (stored as row CIN of w_stem) is fused into the MXU matmul.
    x = jnp.transpose(x_nchw, (0, 2, 3, 1)).reshape(B * HW, CIN).astype(jnp.float32)
    ones = jnp.ones((B * HW, 1), jnp.float32)
    zeros = jnp.zeros((B * HW, CIN_PAD - CIN - 1), jnp.float32)
    x_pad = jnp.concatenate([x, ones, zeros], axis=1)
    out = enetv2_fused_call(x_pad, x_meta.astype(jnp.float32), kp)
    return out[:, :OUT_DIM]       # drop the lane padding


# ------------------------------ parameter setup ------------------------------
def init_raw_params(key):
    ks = jax.random.split(key, 8)
    eps = 1e-5
    # BatchNorm1d in eval with default running stats: mean=0, var=1, gamma=1, beta=0.
    bn_scale = lambda n: jnp.full((1, n), 1.0 / jnp.sqrt(1.0 + eps), jnp.float32)
    bn_shift = lambda n: jnp.zeros((1, n), jnp.float32)
    return {
        # backbone stand-in stem
        "w_stem": 0.05 * jax.random.normal(ks[0], (CIN, FEAT), jnp.float32),
        "b_stem": 0.01 * jax.random.normal(ks[1], (1, FEAT), jnp.float32),
        # meta[0]: Linear(N_META, 512) + BN(512)
        "w1": 0.05 * jax.random.normal(ks[2], (N_META, META_H1), jnp.float32),
        "b1": 0.01 * jax.random.normal(ks[3], (1, META_H1), jnp.float32),
        "s1": bn_scale(META_H1), "t1": bn_shift(META_H1),
        # meta[4]: Linear(512, 128) + BN(128)
        "w2": 0.05 * jax.random.normal(ks[4], (META_H1, META_H2), jnp.float32),
        "b2": 0.01 * jax.random.normal(ks[5], (1, META_H2), jnp.float32),
        "s2": bn_scale(META_H2), "t2": bn_shift(META_H2),
        # myfc: Linear(FEAT + 128, 9)
        "wf": 0.05 * jax.random.normal(ks[6], (FEAT + META_H2, OUT_DIM), jnp.float32),
        "bf": 0.01 * jax.random.normal(ks[7], (1, OUT_DIM), jnp.float32),
    }


def prepare_kernel_params(raw):
    """Trace-time folding: BN into Linear weights; stem bias into a padded weight row;
    1/HW pooling factor into wf_feat; split + lane-pad the final Linear."""
    pad = OUT_PAD - OUT_DIM
    # stem weight padded to 8 sublanes; row CIN carries the stem bias (x has a ones column there)
    w_stem_pad = jnp.zeros((CIN_PAD, FEAT), jnp.float32)
    w_stem_pad = w_stem_pad.at[:CIN].set(raw["w_stem"])
    w_stem_pad = w_stem_pad.at[CIN].set(raw["b_stem"][0])
    return {
        "w_stem": w_stem_pad,
        "w1": raw["w1"] * raw["s1"],
        "b1": raw["b1"] * raw["s1"] + raw["t1"],
        "w2": raw["w2"] * raw["s2"],
        "b2": raw["b2"] * raw["s2"] + raw["t2"],
        "wf_feat": jnp.pad(raw["wf"][:FEAT], ((0, 0), (0, pad))) * (1.0 / HW),
        "wf_meta": jnp.pad(raw["wf"][FEAT:], ((0, 0), (0, pad))),
        "bf": jnp.pad(raw["bf"], ((0, 0), (0, pad))),
    }


# ----------------------- pure-JAX reference (unfolded) ------------------------
def reference_forward(x_nchw, x_meta, raw):
    x = jnp.transpose(x_nchw, (0, 2, 3, 1)).reshape(B, HW, CIN).astype(jnp.float32)
    sw = lambda v: v * (1.0 / (1.0 + jnp.exp(-v)))
    h = sw(jnp.einsum("bhc,cf->bhf", x, raw["w_stem"]) + raw["b_stem"])
    feat = jnp.mean(h, axis=1)
    h1 = sw((x_meta @ raw["w1"] + raw["b1"]) * raw["s1"] + raw["t1"])
    h2 = sw((h1 @ raw["w2"] + raw["b2"]) * raw["s2"] + raw["t2"])
    cat = jnp.concatenate([feat, h2], axis=1)
    return cat @ raw["wf"] + raw["bf"]


if __name__ == "__main__":
    key = jax.random.PRNGKey(0)
    k_x, k_m, k_p = jax.random.split(key, 3)
    x = jax.random.normal(k_x, (B, CIN, H, W), jnp.float32)      # NCHW, like PyTorch
    x_meta = jax.random.normal(k_m, (B, N_META), jnp.float32)

    raw = init_raw_params(k_p)
    kp = prepare_kernel_params(raw)

    out = jax.block_until_ready(enetv2_forward(x, x_meta, kp))
    ref = jax.block_until_ready(reference_forward(x, x_meta, raw))

    assert out.shape == (B, OUT_DIM)
    assert jnp.allclose(out, ref, atol=1e-3, rtol=1e-3), "mismatch vs JAX reference"
    print("KERNEL_OK")
</pallas_src>

<mosaic_0001>
module attributes {stable_mosaic.version = 11 : i64} {
  func.func @enetv2_kernel(%arg0: i32, %arg1: memref<512x8xf32, #tpu.memory_space<vmem>>, %arg2: memref<2x8xf32, #tpu.memory_space<vmem>>, %arg3: memref<8x512xf32, #tpu.memory_space<vmem>>, %arg4: memref<8x512xf32, #tpu.memory_space<vmem>>, %arg5: memref<1x512xf32, #tpu.memory_space<vmem>>, %arg6: memref<512x128xf32, #tpu.memory_space<vmem>>, %arg7: memref<1x128xf32, #tpu.memory_space<vmem>>, %arg8: memref<512x128xf32, #tpu.memory_space<vmem>>, %arg9: memref<128x128xf32, #tpu.memory_space<vmem>>, %arg10: memref<1x128xf32, #tpu.memory_space<vmem>>, %arg11: memref<2x128xf32, #tpu.memory_space<vmem>>) attributes {dimension_semantics = [#tpu.dimension_semantics<arbitrary>], iteration_bounds = array<i64: 3>, scalar_prefetch = 0 : i64, scratch_operands = 0 : i64, tpu.core_type = #tpu.core_type<tc>, window_params = [{pipeline_mode = #tpu.pipeline_mode<synchronous>, transform_indices = @transform_0, window_bounds = array<i64: 512, 8>}, {pipeline_mode = #tpu.pipeline_mode<synchronous>, transform_indices = @transform_1, window_bounds = array<i64: 2, 8>}, {transform_indices = @transform_2, window_bounds = array<i64: 8, 512>}, {pipeline_mode = #tpu.pipeline_mode<synchronous>, transform_indices = @transform_3, window_bounds = array<i64: 8, 512>}, {pipeline_mode = #tpu.pipeline_mode<synchronous>, transform_indices = @transform_4, window_bounds = array<i64: 1, 512>}, {pipeline_mode = #tpu.pipeline_mode<synchronous>, transform_indices = @transform_5, window_bounds = array<i64: 512, 128>}, {pipeline_mode = #tpu.pipeline_mode<synchronous>, transform_indices = @transform_6, window_bounds = array<i64: 1, 128>}, {transform_indices = @transform_7, window_bounds = array<i64: 512, 128>}, {pipeline_mode = #tpu.pipeline_mode<synchronous>, transform_indices = @transform_8, window_bounds = array<i64: 128, 128>}, {pipeline_mode = #tpu.pipeline_mode<synchronous>, transform_indices = @transform_9, window_bounds = array<i64: 1, 128>}, {pipeline_mode = #tpu.pipeline_mode<synchronous>, transform_indices = @transform_10, window_bounds = array<i64: 2, 128>}]} {
    %c0_i32 = arith.constant 0 : i32
    %0 = arith.cmpi eq, %arg0, %c0_i32 : i32
    %1 = arith.extui %0 : i1 to i32
    %c0_i32_0 = arith.constant 0 : i32
    %2 = arith.cmpi ne, %1, %c0_i32_0 : i32
    scf.if %2 {
      %c0_43 = arith.constant 0 : index
      %c0_44 = arith.constant 0 : index
      %68 = vector.load %arg2[%c0_43, %c0_44] : memref<2x8xf32, #tpu.memory_space<vmem>>, vector<2x8xf32>
      %c0_45 = arith.constant 0 : index
      %c0_46 = arith.constant 0 : index
      %69 = vector.load %arg4[%c0_45, %c0_46] : memref<8x512xf32, #tpu.memory_space<vmem>>, vector<8x512xf32>
      %cst_47 = arith.constant dense<0.000000e+00> : vector<2x512xf32>
      %70 = tpu.matmul %68, %69, %cst_47 {dimension_numbers = #tpu.dot_dimension_numbers<[1], [0], [0], [1], [0, 0, 1, 1], [], []>} : vector<2x8xf32>, vector<8x512xf32>, vector<2x512xf32> -> vector<2x512xf32>
      %c0_48 = arith.constant 0 : index
      %c0_49 = arith.constant 0 : index
      %71 = vector.load %arg5[%c0_48, %c0_49] : memref<1x512xf32, #tpu.memory_space<vmem>>, vector<1x512xf32>
      %72 = vector.broadcast %71 : vector<1x512xf32> to vector<2x512xf32>
      %73 = arith.addf %70, %72 : vector<2x512xf32>
      %cst_50 = arith.constant 5.000000e-01 : f32
      %74 = vector.broadcast %cst_50 : f32 to vector<2x512xf32>
      %75 = arith.mulf %74, %73 : vector<2x512xf32>
      %76 = math.tanh %75 : vector<2x512xf32>
      %cst_51 = arith.constant 5.000000e-01 : f32
      %77 = vector.broadcast %cst_51 : f32 to vector<2x512xf32>
      %78 = arith.mulf %77, %76 : vector<2x512xf32>
      %cst_52 = arith.constant 5.000000e-01 : f32
      %79 = vector.broadcast %cst_52 : f32 to vector<2x512xf32>
      %80 = arith.addf %78, %79 : vector<2x512xf32>
      %81 = arith.mulf %73, %80 : vector<2x512xf32>
      %c0_53 = arith.constant 0 : index
      %c0_54 = arith.constant 0 : index
      %82 = vector.load %arg6[%c0_53, %c0_54] : memref<512x128xf32, #tpu.memory_space<vmem>>, vector<512x128xf32>
      %cst_55 = arith.constant dense<0.000000e+00> : vector<2x128xf32>
      %83 = tpu.matmul %81, %82, %cst_55 {dimension_numbers = #tpu.dot_dimension_numbers<[1], [0], [0], [1], [0, 0, 1, 1], [], []>} : vector<2x512xf32>, vector<512x128xf32>, vector<2x128xf32> -> vector<2x128xf32>
      %c0_56 = arith.constant 0 : index
      %c0_57 = arith.constant 0 : index
      %84 = vector.load %arg7[%c0_56, %c0_57] : memref<1x128xf32, #tpu.memory_space<vmem>>, vector<1x128xf32>
      %85 = vector.broadcast %84 : vector<1x128xf32> to vector<2x128xf32>
      %86 = arith.addf %83, %85 : vector<2x128xf32>
      %cst_58 = arith.constant 5.000000e-01 : f32
      %87 = vector.broadcast %cst_58 : f32 to vector<2x128xf32>
      %88 = arith.mulf %87, %86 : vector<2x128xf32>
      %89 = math.tanh %88 : vector<2x128xf32>
      %cst_59 = arith.constant 5.000000e-01 : f32
      %90 = vector.broadcast %cst_59 : f32 to vector<2x128xf32>
      %91 = arith.mulf %90, %89 : vector<2x128xf32>
      %cst_60 = arith.constant 5.000000e-01 : f32
      %92 = vector.broadcast %cst_60 : f32 to vector<2x128xf32>
      %93 = arith.addf %91, %92 : vector<2x128xf32>
      %94 = arith.mulf %86, %93 : vector<2x128xf32>
      %c0_61 = arith.constant 0 : index
      %c0_62 = arith.constant 0 : index
      %95 = vector.load %arg9[%c0_61, %c0_62] : memref<128x128xf32, #tpu.memory_space<vmem>>, vector<128x128xf32>
      %cst_63 = arith.constant dense<0.000000e+00> : vector<2x128xf32>
      %96 = tpu.matmul %94, %95, %cst_63 {dimension_numbers = #tpu.dot_dimension_numbers<[1], [0], [0], [1], [0, 0, 1, 1], [], []>} : vector<2x128xf32>, vector<128x128xf32>, vector<2x128xf32> -> vector<2x128xf32>
      %c0_64 = arith.constant 0 : index
      %c0_65 = arith.constant 0 : index
      %97 = vector.load %arg10[%c0_64, %c0_65] : memref<1x128xf32, #tpu.memory_space<vmem>>, vector<1x128xf32>
      %98 = vector.broadcast %97 : vector<1x128xf32> to vector<2x128xf32>
      %99 = arith.addf %96, %98 : vector<2x128xf32>
      %c0_66 = arith.constant 0 : index
      %c0_67 = arith.constant 0 : index
      %100 = vector.load %arg11[%c0_66, %c0_67] : memref<2x128xf32, #tpu.memory_space<vmem>>, vector<2x128xf32>
      tpu.vector_store %arg11[%c0_66, %c0_67], %99 {strides = array<i32>} : memref<2x128xf32, #tpu.memory_space<vmem>>, vector<2x128xf32>,
    } else {
    }
    %c0 = arith.constant 0 : index
    %c0_1 = arith.constant 0 : index
    %3 = vector.load %arg1[%c0, %c0_1] : memref<512x8xf32, #tpu.memory_space<vmem>>, vector<512x8xf32>
    %cst = arith.constant 0.000000e+00 : f32
    %4 = vector.broadcast %cst : f32 to vector<2x128xf32>
    %c0_2 = arith.constant 0 : index
    %c0_3 = arith.constant 0 : index
    %5 = vector.load %arg3[%c0_2, %c0_3] : memref<8x512xf32, #tpu.memory_space<vmem>>, vector<8x128xf32>
    %cst_4 = arith.constant dense<0.000000e+00> : vector<512x128xf32>
    %6 = tpu.matmul %3, %5, %cst_4 {dimension_numbers = #tpu.dot_dimension_numbers<[1], [0], [0], [1], [0, 0, 1, 1], [], []>} : vector<512x8xf32>, vector<8x128xf32>, vector<512x128xf32> -> vector<512x128xf32>
    %cst_5 = arith.constant 5.000000e-01 : f32
    %7 = vector.broadcast %cst_5 : f32 to vector<512x128xf32>
    %8 = arith.mulf %7, %6 : vector<512x128xf32>
    %9 = math.tanh %8 : vector<512x128xf32>
    %cst_6 = arith.constant 5.000000e-01 : f32
    %10 = vector.broadcast %cst_6 : f32 to vector<512x128xf32>
    %11 = arith.mulf %10, %9 : vector<512x128xf32>
    %cst_7 = arith.constant 5.000000e-01 : f32
    %12 = vector.broadcast %cst_7 : f32 to vector<512x128xf32>
    %13 = arith.addf %11, %12 : vector<512x128xf32>
    %14 = arith.mulf %6, %13 : vector<512x128xf32>
    %15 = vector.shape_cast %14 : vector<512x128xf32> to vector<2x256x128xf32>
    %cst_8 = arith.constant dense<0.000000e+00> : vector<2x128xf32>
    %16 = vector.multi_reduction <add>, %15, %cst_8 [1] : vector<2x256x128xf32> to vector<2x128xf32>
    %c0_9 = arith.constant 0 : index
    %c0_10 = arith.constant 0 : index
    %17 = vector.load %arg8[%c0_9, %c0_10] : memref<512x128xf32, #tpu.memory_space<vmem>>, vector<128x128xf32>
    %cst_11 = arith.constant dense<0.000000e+00> : vector<2x128xf32>
    %18 = tpu.matmul %16, %17, %cst_11 {dimension_numbers = #tpu.dot_dimension_numbers<[1], [0], [0], [1], [0, 0, 1, 1], [], []>} : vector<2x128xf32>, vector<128x128xf32>, vector<2x128xf32> -> vector<2x128xf32>
    %19 = arith.addf %4, %18 : vector<2x128xf32>
    %c0_12 = arith.constant 0 : index
    %c128 = arith.constant 128 : index
    %20 = vector.load %arg3[%c0_12, %c128] : memref<8x512xf32, #tpu.memory_space<vmem>>, vector<8x128xf32>
    %cst_13 = arith.constant dense<0.000000e+00> : vector<512x128xf32>
    %21 = tpu.matmul %3, %20, %cst_13 {dimension_numbers = #tpu.dot_dimension_numbers<[1], [0], [0], [1], [0, 0, 1, 1], [], []>} : vector<512x8xf32>, vector<8x128xf32>, vector<512x128xf32> -> vector<512x128xf32>
    %cst_14 = arith.constant 5.000000e-01 : f32
    %22 = vector.broadcast %cst_14 : f32 to vector<512x128xf32>
    %23 = arith.mulf %22, %21 : vector<512x128xf32>
    %24 = math.tanh %23 : vector<512x128xf32>
    %cst_15 = arith.constant 5.000000e-01 : f32
    %25 = vector.broadcast %cst_15 : f32 to vector<512x128xf32>
    %26 = arith.mulf %25, %24 : vector<512x128xf32>
    %cst_16 = arith.constant 5.000000e-01 : f32
    %27 = vector.broadcast %cst_16 : f32 to vector<512x128xf32>
    %28 = arith.addf %26, %27 : vector<512x128xf32>
    %29 = arith.mulf %21, %28 : vector<512x128xf32>
    %30 = vector.shape_cast %29 : vector<512x128xf32> to vector<2x256x128xf32>
    %cst_17 = arith.constant dense<0.000000e+00> : vector<2x128xf32>
    %31 = vector.multi_reduction <add>, %30, %cst_17 [1] : vector<2x256x128xf32> to vector<2x128xf32>
    %c128_18 = arith.constant 128 : index
    %c0_19 = arith.constant 0 : index
    %32 = vector.load %arg8[%c128_18, %c0_19] : memref<512x128xf32, #tpu.memory_space<vmem>>, vector<128x128xf32>
    %cst_20 = arith.constant dense<0.000000e+00> : vector<2x128xf32>
    %33 = tpu.matmul %31, %32, %cst_20 {dimension_numbers = #tpu.dot_dimension_numbers<[1], [0], [0], [1], [0, 0, 1, 1], [], []>} : vector<2x128xf32>, vector<128x128xf32>, vector<2x128xf32> -> vector<2x128xf32>
    %34 = arith.addf %19, %33 : vector<2x128xf32>
    %c0_21 = arith.constant 0 : index
    %c256 = arith.constant 256 : index
    %35 = vector.load %arg3[%c0_21, %c256] : memref<8x512xf32, #tpu.memory_space<vmem>>, vector<8x128xf32>
    %cst_22 = arith.constant dense<0.000000e+00> : vector<512x128xf32>
    %36 = tpu.matmul %3, %35, %cst_22 {dimension_numbers = #tpu.dot_dimension_numbers<[1], [0], [0], [1], [0, 0, 1, 1], [], []>} : vector<512x8xf32>, vector<8x128xf32>, vector<512x128xf32> -> vector<512x128xf32>
    %cst_23 = arith.constant 5.000000e-01 : f32
    %37 = vector.broadcast %cst_23 : f32 to vector<512x128xf32>
    %38 = arith.mulf %37, %36 : vector<512x128xf32>
    %39 = math.tanh %38 : vector<512x128xf32>
    %cst_24 = arith.constant 5.000000e-01 : f32
    %40 = vector.broadcast %cst_24 : f32 to vector<512x128xf32>
    %41 = arith.mulf %40, %39 : vector<512x128xf32>
    %cst_25 = arith.constant 5.000000e-01 : f32
    %42 = vector.broadcast %cst_25 : f32 to vector<512x128xf32>
    %43 = arith.addf %41, %42 : vector<512x128xf32>
    %44 = arith.mulf %36, %43 : vector<512x128xf32>
    %45 = vector.shape_cast %44 : vector<512x128xf32> to vector<2x256x128xf32>
    %cst_26 = arith.constant dense<0.000000e+00> : vector<2x128xf32>
    %46 = vector.multi_reduction <add>, %45, %cst_26 [1] : vector<2x256x128xf32> to vector<2x128xf32>
    %c256_27 = arith.constant 256 : index
    %c0_28 = arith.constant 0 : index
    %47 = vector.load %arg8[%c256_27, %c0_28] : memref<512x128xf32, #tpu.memory_space<vmem>>, vector<128x128xf32>
    %cst_29 = arith.constant dense<0.000000e+00> : vector<2x128xf32>
    %48 = tpu.matmul %46, %47, %cst_29 {dimension_numbers = #tpu.dot_dimension_numbers<[1], [0], [0], [1], [0, 0, 1, 1], [], []>} : vector<2x128xf32>, vector<128x128xf32>, vector<2x128xf32> -> vector<2x128xf32>
    %49 = arith.addf %34, %48 : vector<2x128xf32>
    %c0_30 = arith.constant 0 : index
    %c384 = arith.constant 384 : index
    %50 = vector.load %arg3[%c0_30, %c384] : memref<8x512xf32, #tpu.memory_space<vmem>>, vector<8x128xf32>
    %cst_31 = arith.constant dense<0.000000e+00> : vector<512x128xf32>
    %51 = tpu.matmul %3, %50, %cst_31 {dimension_numbers = #tpu.dot_dimension_numbers<[1], [0], [0], [1], [0, 0, 1, 1], [], []>} : vector<512x8xf32>, vector<8x128xf32>, vector<512x128xf32> -> vector<512x128xf32>
    %cst_32 = arith.constant 5.000000e-01 : f32
    %52 = vector.broadcast %cst_32 : f32 to vector<512x128xf32>
    %53 = arith.mulf %52, %51 : vector<512x128xf32>
    %54 = math.tanh %53 : vector<512x128xf32>
    %cst_33 = arith.constant 5.000000e-01 : f32
    %55 = vector.broadcast %cst_33 : f32 to vector<512x128xf32>
    %56 = arith.mulf %55, %54 : vector<512x128xf32>
    %cst_34 = arith.constant 5.000000e-01 : f32
    %57 = vector.broadcast %cst_34 : f32 to vector<512x128xf32>
    %58 = arith.addf %56, %57 : vector<512x128xf32>
    %59 = arith.mulf %51, %58 : vector<512x128xf32>
    %60 = vector.shape_cast %59 : vector<512x128xf32> to vector<2x256x128xf32>
    %cst_35 = arith.constant dense<0.000000e+00> : vector<2x128xf32>
    %61 = vector.multi_reduction <add>, %60, %cst_35 [1] : vector<2x256x128xf32> to vector<2x128xf32>
    %c384_36 = arith.constant 384 : index
    %c0_37 = arith.constant 0 : index
    %62 = vector.load %arg8[%c384_36, %c0_37] : memref<512x128xf32, #tpu.memory_space<vmem>>, vector<128x128xf32>
    %cst_38 = arith.constant dense<0.000000e+00> : vector<2x128xf32>
    %63 = tpu.matmul %61, %62, %cst_38 {dimension_numbers = #tpu.dot_dimension_numbers<[1], [0], [0], [1], [0, 0, 1, 1], [], []>} : vector<2x128xf32>, vector<128x128xf32>, vector<2x128xf32> -> vector<2x128xf32>
    %64 = arith.addf %49, %63 : vector<2x128xf32>
    %c0_39 = arith.constant 0 : index
    %c0_40 = arith.constant 0 : index
    %65 = vector.load %arg11[%c0_39, %c0_40] : memref<2x128xf32, #tpu.memory_space<vmem>>, vector<2x128xf32>
    %66 = arith.addf %65, %64 : vector<2x128xf32>
    %c0_41 = arith.constant 0 : index
    %c0_42 = arith.constant 0 : index
    %67 = vector.load %arg11[%c0_41, %c0_42] : memref<2x128xf32, #tpu.memory_space<vmem>>, vector<2x128xf32>
    tpu.vector_store %arg11[%c0_41, %c0_42], %66 {strides = array<i32>} : memref<2x128xf32, #tpu.memory_space<vmem>>, vector<2x128xf32>,
    return
  }
  func.func @transform_0(%arg0: i32) -> (i32, i32) {
    %c0_i32 = arith.constant 0 : i32
    %c0_i32_0 = arith.constant 0 : i32
    %c0_i32_1 = arith.constant 0 : i32
    return %c0_i32, %c0_i32_0 : i32, i32
  }
  func.func @transform_1(%arg0: i32) -> (i32, i32) {
    %c0_i32 = arith.constant 0 : i32
    %c0_i32_0 = arith.constant 0 : i32
    %c0_i32_1 = arith.constant 0 : i32
    return %c0_i32, %c0_i32_0 : i32, i32
  }
  func.func @transform_2(%arg0: i32) -> (i32, i32) {
    %c0_i32 = arith.constant 0 : i32
    %c0_i32_0 = arith.constant 0 : i32
    return %c0_i32, %arg0 : i32, i32
  }
  func.func @transform_3(%arg0: i32) -> (i32, i32) {
    %c0_i32 = arith.constant 0 : i32
    %c0_i32_0 = arith.constant 0 : i32
    %c0_i32_1 = arith.constant 0 : i32
    return %c0_i32, %c0_i32_0 : i32, i32
  }
  func.func @transform_4(%arg0: i32) -> (i32, i32) {
    %c0_i32 = arith.constant 0 : i32
    %c0_i32_0 = arith.constant 0 : i32
    %c0_i32_1 = arith.constant 0 : i32
    return %c0_i32, %c0_i32_0 : i32, i32
  }
  func.func @transform_5(%arg0: i32) -> (i32, i32) {
    %c0_i32 = arith.constant 0 : i32
    %c0_i32_0 = arith.constant 0 : i32
    %c0_i32_1 = arith.constant 0 : i32
    return %c0_i32, %c0_i32_0 : i32, i32
  }
  func.func @transform_6(%arg0: i32) -> (i32, i32) {
    %c0_i32 = arith.constant 0 : i32
    %c0_i32_0 = arith.constant 0 : i32
    %c0_i32_1 = arith.constant 0 : i32
    return %c0_i32, %c0_i32_0 : i32, i32
  }
  func.func @transform_7(%arg0: i32) -> (i32, i32) {
    %c0_i32 = arith.constant 0 : i32
    %c0_i32_0 = arith.constant 0 : i32
    return %arg0, %c0_i32 : i32, i32
  }
  func.func @transform_8(%arg0: i32) -> (i32, i32) {
    %c0_i32 = arith.constant 0 : i32
    %c0_i32_0 = arith.constant 0 : i32
    %c0_i32_1 = arith.constant 0 : i32
    return %c0_i32, %c0_i32_0 : i32, i32
  }
  func.func @transform_9(%arg0: i32) -> (i32, i32) {
    %c0_i32 = arith.constant 0 : i32
    %c0_i32_0 = arith.constant 0 : i32
    %c0_i32_1 = arith.constant 0 : i32
    return %c0_i32, %c0_i32_0 : i32, i32
  }
  func.func @transform_10(%arg0: i32) -> (i32, i32) {
    %c0_i32 = arith.constant 0 : i32
    %c0_i32_0 = arith.constant 0 : i32
    %c0_i32_1 = arith.constant 0 : i32
    return %c0_i32, %c0_i32_0 : i32, i32
  }
}

</mosaic_0001>

<bundles_post_ra>
// kernel: tpu_custom_call.1
= control target key start
LH: loop header
LB: loop body
LE: loop exit
PB: predicated region body
PF: predicated region fallthrough
CT: control target
= control target key end

     0   :  { %s9575_s0 = inlined_call_operand.vmem [shape: f32[512,8], index: 0, kind: input, shape index: {}]   ;;  %s9576_s1 = inlined_call_operand.vmem [shape: f32[2,8], index: 1, kind: input, shape index: {}]   ;;  %s9577_s2 = inlined_call_operand.hbm [shape: f32[8,1536], index: 2, kind: input, shape index: {}]   ;;  %s9578_s3 = inlined_call_operand.vmem [shape: f32[8,512], index: 3, kind: input, shape index: {}]   ;;  %s9579_s4 = inlined_call_operand.vmem [shape: f32[1,512], index: 4, kind: input, shape index: {}]   ;;  %s9580_s5 = inlined_call_operand.vmem [shape: f32[512,128], index: 5, kind: input, shape index: {}]   ;;  %s9581_s6 = inlined_call_operand.vmem [shape: f32[1,128], index: 6, kind: input, shape index: {}]   ;;  %s9582_s7 = inlined_call_operand.hbm [shape: f32[1536,128], index: 7, kind: input, shape index: {}]   ;;  %s9583_s8 = inlined_call_operand.hbm [shape: f32[128,128], index: 8, kind: input, shape index: {}]   ;;  %s9584_s9 = inlined_call_operand.vmem [shape: f32[1,128], index: 9, kind: input, shape index: {}]   ;;  %s9585_s10 = inlined_call_operand.hbm [shape: f32[2,128], index: 10, kind: output, shape index: {}]  }
   0x1   :  { %9632 = sst [smem:[#allocation44_spill]] %s9577_s2 }
   0x2   :  { %9633 = sst [smem:[#allocation45_spill]] %s9583_s8 }
   0x3   :  { %15 = vsyncpa [#allocation3], 0 }
   0x4   :  { %17 = vsyncpa [#allocation3 + $0x1], 0 }
   0x5   :  { %18 = vsyncpa [#allocation6], 0 }
   0x6   :  { %20 = vsyncpa [#allocation6 + $0x1], 0 }
   0x7   :  { %21 = vsyncpa [#allocation4], 0  ;;  %s7155_s13 = smov 0   ;;  %s7157_s14 = smov 0  }
   0x8   :  { %s7159_s15 = smov 0   ;;  %s7161_s16 = smov 0  }
   0x9 LB: > { %s7174_s17 = sadd.s32 4294967295, %s7086_s16   ;;  %p89_p0 = scmp.ne.s32.totalorder %s7078_s14, %s7074_s13  ;;  %s7086_s16 = sphi %s7161_s16, %s9732_s16   ;;  %s7082_s15 = sphi %s7159_s15, %s9731_s15   ;;  %s7078_s14 = sphi %s7157_s14, %s9730_s14   ;;  %s7074_s13 = sphi %s7155_s13, %s9729_s13  }
   0xa   : > { %p9586_p1 = scmp.eq.s32.totalorder %s7174_s17, 0  ;;  %p4760_p2 = scmp.ge.s32.totalorder %s7086_s16, 1 }
   0xb   : > { %p273_p3 = scmp.lt.s32.totalorder %s7086_s16, 4  ;;  %s7088_s20 = smov [#allocation7]  }
   0xc   : > { %p7183_p5 = por %p9586_p1, %p89_p0  ;;  %s303_s21 = sshll.u32 %s7088_s20, 4  ;;  %s304_s21 = int_to_ptr.vmem [resolvable:$true] %s303_s21 }
   0xd   : > { %p7187_p6 = pnand %p4760_p2, %p273_p3  ;;  %s7200_s23 = sadd.s32 1, %s7086_s16  }
   0xe   : > { %s9634_s18 = scalar_select %p7183_p5, 1, 0 }
   0xf   : > { %s9635_s19 = scalar_select %p7187_p6, 1, 0 }
  0x10   : > { %p6218_p7 = pneg %p7187_p6  ;;  %s76_s24 = sadd.s32 1, %s7082_s15 }
  0x11   : > { %s73_s25 = ssub.s32 %s7086_s16, %s7200_s23  ;;  %s9637_s8 = sld [smem:[#allocation45_spill]] }
  0x12   : > { %p7195_p8 = pnand %p6218_p7, %p9586_p1 }
  0x14   : > { %p6928_p10 = pneg %p7195_p8 }
  0x17   : > { %s6926_s28 = scalar_lea.hbm %s9637_s8, 2048 }
  0x18   : > { %p6927_p9 = scmp.ne.s32.totalorder %s9637_s8, %s6926_s28  ;;  %p6933_p13 = scmp.lt.u32.totalorder %s6926_s28, %s9637_s8 }
  0x1a   : > { %p6929_p11 = pnand %p6928_p10, %p6927_p9 }
  0x1c   : > { %p6930_p12 = pneg %p6929_p11 }
  0x1e   : > { %p6935_p0 = pnand %p6933_p13, %p6930_p12 }
  0x20   : > { %6938 = shalt.err (!%p6935_p0)
}
  0x21   : > { %s6939_s13 = scalar_lea.vmem %s304_s21, 2048  ;;  %p6947_p4 = scmp.lt.s32.totalorder %s304_s21, %s304_s21 }
  0x22   : > { %p6940_p2 = scmp.ne.s32.totalorder %s304_s21, %s6939_s13  ;;  %p6948_p1 = scmp.lt.s32.totalorder %s6939_s13, %s6939_s13 }
  0x24   : > { %p6942_p3 = pnand %p6940_p2, %p6928_p10  ;;  %p6949_p5 = por %p6948_p1, %p6947_p4 }
  0x26   : > { %p6943_p7 = pneg %p6942_p3 }
  0x28   : > { %p6950_p6 = pnand %p6949_p5, %p6943_p7 }
  0x2a   : > { %6953 = shalt.err (!%p6950_p6)
}
  0x2b   : > { %s9589_s20 = smov 128   ;;  %s9590_s26 = smov 8  }
  0x2c   : > { %6221 = dma.hbm_to_vmem [thread:$0]  (!%p7195_p8), %s9637_s8, 2048, %s304_s21, [#allocation6], %s9589_s20, %s9589_s20, %s9590_s26  }
  0x2d   : > { %p74_p1 = scmp.eq.s32.totalorder %s73_s25, 0  ;;  %p83_p4 = scmp.ne.s32.totalorder %s7082_s15, %s7078_s14 }
  0x2e   : > { %p84_p5 = scmp.eq.s32.totalorder %s7086_s16, 0  ;;  %p6230_p6 = scmp.lt.s32.totalorder %s7086_s16, 3 }
  0x2f   : > { %s7229_s29 = scalar_select %p74_p1, %s7082_s15, %s76_s24  }
  0x30   : > { %p85_p9 = por %p84_p5, %p83_p4  ;;  %s7232_s30 = sand.u32 1, %s7082_s15  }
  0x31   : > { %9638 = sst [smem:[#allocation13_spill]] %s7229_s29  ;;  %s4763_s22 = sshll.u32 %s7232_s30, 5 }
  0x32   : > { %s5038_s11 = sshll.u32 %s7086_s16, 9  ;;  %s9639_s2 = sld [smem:[#allocation44_spill]] }
  0x33   : > { %s324_s21 = scalar_lea.vmem [#allocation2], %s4763_s22  ;;  %p7243_p8 = pnand %p6230_p6, %p85_p9 }
  0x34   : > { %s332_s24 = sshll.u32 %s324_s21, 4  ;;  %s4766_s28 = sshll.u32 %s7232_s30, 9  ;;  %s7241_s24 = int_to_ptr.vmem [resolvable:$true] %s332_s24 }
  0x35   : > { %s321_s26 = scalar_lea.sflag [#allocation3], %s7232_s30  ;;  %p6956_p11 = pneg %p7243_p8 }
  0x38   : > { %s7239_s27 = scalar_lea.hbm %s9639_s2, %s5038_s11  ;;  %s6959_s13 = scalar_lea.hbm %s9639_s2, 1536 }
  0x39   : > { %s6954_s12 = scalar_lea.hbm %s7239_s27, 512  ;;  %p6960_p0 = scmp.lt.u32.totalorder %s7239_s27, %s9639_s2 }
  0x3a   : > { %p6955_p10 = scmp.ne.s32.totalorder %s7239_s27, %s6954_s12  ;;  %p6961_p2 = scmp.lt.u32.totalorder %s6959_s13, %s6954_s12 }
  0x3b   : > { %p6963_p7 = scmp.lt.u32.totalorder %s6954_s12, %s7239_s27 }
  0x3c   : > { %p6957_p12 = pnand %p6956_p11, %p6955_p10  ;;  %p6962_p3 = por %p6961_p2, %p6960_p0 }
  0x3e   : > { %p6958_p13 = pneg %p6957_p12  ;;  %p6964_p1 = por %p6963_p7, %p6962_p3 }
  0x40   : > { %p6965_p4 = pnand %p6964_p1, %p6958_p13 }
  0x42   : > { %6968 = shalt.err (!%p6965_p4)
}
  0x43   : > { %s6969_s20 = scalar_lea.vmem %s7241_s24, 512  ;;  %s7091_s22 = smov [#allocation2]  }
  0x44   : > { %p6970_p5 = scmp.ne.s32.totalorder %s7241_s24, %s6969_s20  ;;  %s6974_s11 = sshll.u32 %s7091_s22, 4  ;;  %s6975_s11 = int_to_ptr.vmem [resolvable:$false] %s6974_s11 }
  0x45   : > { %s6976_s8 = scalar_lea.vmem %s6975_s11, 1024  ;;  %p6977_p10 = scmp.lt.s32.totalorder %s7241_s24, %s6975_s11 }
  0x46   : > { %p6972_p6 = pnand %p6970_p5, %p6956_p11  ;;  %p6978_p12 = scmp.lt.s32.totalorder %s6976_s8, %s6969_s20 }
  0x48   : > { %p6973_p9 = pneg %p6972_p6  ;;  %p6979_p0 = por %p6978_p12, %p6977_p10 }
  0x4a   : > { %p6980_p2 = pnand %p6979_p0, %p6973_p9 }
  0x4c   : > { %6983 = shalt.err (!%p6980_p2)
}
  0x4d   : > { %6225 = dma.hbm_to_vmem [thread:$0]  (!%p7243_p8), %s7239_s27, 512, %s7241_s24, %s321_s26  }
  0x4e   : > { %s343_s12 = scalar_lea.vmem [#allocation5], %s4766_s28  ;;  %s5039_s21 = sshll.u32 %s7086_s16, 13 }
  0x4f   : > { %s350_s13 = sshll.u32 %s343_s12, 4  ;;  %s7283_s11 = scalar_lea.hbm %s9582_s7, %s5039_s21  ;;  %s7277_s13 = int_to_ptr.vmem [resolvable:$true] %s350_s13 }
  0x50   : > { %s9641_s8 = sand.u32 1, %s7086_s16   ;;  %s6984_s29 = scalar_lea.hbm %s7283_s11, 8192 }
  0x51   : > { %s7287_s2 = scalar_lea.sflag [#allocation6], %s9641_s8  ;;  %p6985_p13 = scmp.ne.s32.totalorder %s7283_s11, %s6984_s29 }
  0x52   : > { %s6989_s27 = scalar_lea.hbm %s9582_s7, 24576  ;;  %p6990_p1 = scmp.lt.u32.totalorder %s7283_s11, %s9582_s7 }
  0x53   : > { %p6987_p3 = pnand %p6985_p13, %p6956_p11  ;;  %p6991_p4 = scmp.lt.u32.totalorder %s6989_s27, %s6984_s29 }
  0x54   : > { %p6993_p6 = scmp.lt.u32.totalorder %s6984_s29, %s7283_s11 }
  0x55   : > { %p6988_p7 = pneg %p6987_p3  ;;  %p6992_p5 = por %p6991_p4, %p6990_p1 }
  0x57   : > { %p6994_p9 = por %p6993_p6, %p6992_p5 }
  0x59   : > { %p6995_p10 = pnand %p6994_p9, %p6988_p7 }
  0x5b   : > { %6998 = shalt.err (!%p6995_p10)
}
  0x5c   : > { %s6999_s16 = scalar_lea.vmem %s7277_s13, 8192  ;;  %s7092_s12 = smov [#allocation5]  }
  0x5d   : > { %p7000_p12 = scmp.ne.s32.totalorder %s7277_s13, %s6999_s16  ;;  %s7004_s21 = sshll.u32 %s7092_s12, 4  ;;  %s7005_s21 = int_to_ptr.vmem [resolvable:$false] %s7004_s21 }
  0x5e   : > { %s7006_s22 = scalar_lea.vmem %s7005_s21, 16384  ;;  %p7007_p13 = scmp.lt.s32.totalorder %s7277_s13, %s7005_s21 }
  0x5f   : > { %p7002_p0 = pnand %p7000_p12, %p6956_p11  ;;  %p7008_p3 = scmp.lt.s32.totalorder %s7006_s22, %s6999_s16 }
  0x61   : > { %p7003_p2 = pneg %p7002_p0  ;;  %p7009_p1 = por %p7008_p3, %p7007_p13 }
  0x63   : > { %p7010_p4 = pnand %p7009_p1, %p7003_p2 }
  0x65   : > { %7013 = shalt.err (!%p7010_p4)
}
  0x66   : > { %s9642_s29 = smov 8   ;;  %s9643_s20 = smov 128  }
  0x67   : > { %6228 = dma.hbm_to_vmem [thread:$0]  (!%p7243_p8), %s7283_s11, 8192, %s7277_s13, %s7287_s2, %s9643_s20, %s9643_s20, %s9642_s29  }
  0x68   : > { %p9644_p11 = scmp.ne.s32.totalorder %s9635_s19, 0 }
  0x6a   : > { %362 = sbr.rel (%p9644_p11) target bundleno = 2242 (0x8c2), region = 60 }
  0x71   : > { %s364_s8 = sand.u32 1, %s7078_s14   ;;  %p9645_p7 = scmp.ne.s32.totalorder %s9634_s18, 0 }
  0x72   : > { %s4770_s26 = sshll.u32 %s364_s8, 5  ;;  %s365_s30 = scalar_lea.sflag [#allocation3], %s364_s8 }
  0x73   : > { %s7319_s27 = scalar_lea.vmem [#allocation2], %s4770_s26 }
  0x74   : > { %7057 = dma.done.wait (%p9645_p7), %s365_s30, 512  }
  0x75   : > { %7059 = vsyncadd (%p9645_p7), %s365_s30, 4294966784  ;;  %s373_s25 = sand.u32 1, %s7174_s17   ;;  %s4771_s24 = sshll.u32 %s364_s8, 9 }
  0x76   : > { %s374_s2 = scalar_lea.sflag [#allocation6], %s373_s25  ;;  %s7326_s13 = scalar_lea.vmem [#allocation5], %s4771_s24 }
  0x77   : > { %7061 = dma.done.wait (%p9645_p7), %s374_s2, 8192  }
  0x78   : > { %7063 = vsyncadd (%p9645_p7), %s374_s2, 4294959104  ;;  %p9646_p8 = scmp.eq.s32.totalorder %s7174_s17, 0 }
  0x7a   : > { %7065 = dma.done.wait (%p9646_p8), [#allocation6], 2048   ;;  %p9647_p5 = pmov %p9646_p8 }
  0x7b   : > { %p9648_p6 = scmp.ne.s32.totalorder %s7174_s17, 0 }
  0x7c   : > { %7067 = vsyncadd (%p9647_p5), [#allocation6], 4294965248  ;;  %v426_v0 = vld [vmem:[%s9578_s3 + $0x8] sm:$0xff] (!%p9648_p6)  ;;  %v425_v1 = vld [vmem:[%s9578_s3] sm:$0xff] (!%p9648_p6)  ;;  %vm451_vm0 = vcmask (!%p9648_p6), 64512   ;;  %v7093_v3 = vmov (!%p9648_p6), 0.0  }
  0x7d   : > { %423 = sbr.rel (%p9648_p6) target bundleno = 817 (0x331), region = 76  ;;  %v424_v2 = vld [vmem:[%s9576_s1] sm:$0x3] (!%p9648_p6)  ;;  %455 = vmatprep.subr.mxu1 (!%p9648_p6), %v426_v0  ;;  %519 = vmatprep.mubr.f32.mxu1 (!%p9648_p6), %v7093_v3  ;;  %v428_v4 = vld [vmem:[%s9578_s3 + $0x18] sm:$0xff] (!%p9648_p6)  ;;  %v427_v5 = vld [vmem:[%s9578_s3 + $0x10] sm:$0xff] (!%p9648_p6)  ;;  %vm7095_vm1 = vmmov (!%p9648_p6), 0  }
  0x7e   : > { %v633_v6 = vld [vmem:[%s9580_s5 + $0x80] sm:$0xff] (!%p9648_p6)  ;;  %456 = vmatpush1.msra.mxu1 (!%p9648_p6), %v425_v1  ;;  %v634_v7 = vld [vmem:[%s9580_s5 + $0x88] sm:$0xff] (!%p9648_p6)  ;;  %v635_v12 = vld [vmem:[%s9580_s5 + $0x90] sm:$0xff] (!%p9648_p6) }
  0x7f   : > { %v617_v8 = vld [vmem:[%s9580_s5] sm:$0xff] (!%p9648_p6)  ;;  %v618_v9 = vld [vmem:[%s9580_s5 + $0x8] sm:$0xff] (!%p9648_p6)  ;;  %4774 = vmatmul.mubr.msk.f32.vlgmr.msra.gmra.mrb[0].mxu1 (!%p9648_p6), %vm451_vm0, %v424_v2  ;;  %526 = vmatprep.subr.mxu1 (!%p9648_p6), %v428_v4  ;;  %v6022_v10 = vpack.c.bf16 (!%p9648_p6), %v634_v7, %v633_v6  ;;  %v636_v13 = vld [vmem:[%s9580_s5 + $0x98] sm:$0xff] (!%p9648_p6) }
  0x80   : > { %v6024_v11 = vpack.c.bf16 (!%p9648_p6), %v618_v9, %v617_v8  ;;  %v665_v14 = vld [vmem:[%s9580_s5 + $0x180] sm:$0xff] (!%p9648_p6)  ;;  %527 = vmatpush1.msra.mxu1 (!%p9648_p6), %v427_v5  ;;  %590 = vmatprep.mubr.f32.mxu1 (!%p9648_p6), %v7093_v3  ;;  %v6026_v15 = vpack.c.bf16 (!%p9648_p6), %v636_v13, %v635_v12  ;;  %v666_v16 = vld [vmem:[%s9580_s5 + $0x188] sm:$0xff] (!%p9648_p6)  ;;  %v619_v17 = vld [vmem:[%s9580_s5 + $0x10] sm:$0xff] (!%p9648_p6) }
  0x81   : > { %v620_v18 = vld [vmem:[%s9580_s5 + $0x18] sm:$0xff] (!%p9648_p6)  ;;  %6023 = vmatprep.subr.bf16.mxu0 (!%p9648_p6), %v6022_v10  ;;  %v6054_v19 = vpack.c.bf16 (!%p9648_p6), %v666_v16, %v665_v14  ;;  %v649_v20 = vld [vmem:[%s9580_s5 + $0x100] sm:$0xff] (!%p9648_p6)  ;;  %v650_v21 = vld [vmem:[%s9580_s5 + $0x108] sm:$0xff] (!%p9648_p6) }
  0x82   : > { %6025 = vmatpush3.bf16.msra.mxu0 (!%p9648_p6), %v6024_v11  ;;  %v6028_v22 = vpack.c.bf16 (!%p9648_p6), %v620_v18, %v619_v17  ;;  %v6056_v23 = vpack.c.bf16 (!%p9648_p6), %v650_v21, %v649_v20  ;;  %v637_v24 = vld [vmem:[%s9580_s5 + $0xa0] sm:$0xff] (!%p9648_p6)  ;;  %v638_v25 = vld [vmem:[%s9580_s5 + $0xa8] sm:$0xff] (!%p9648_p6)  ;;  %v667_v26 = vld [vmem:[%s9580_s5 + $0x190] sm:$0xff] (!%p9648_p6) }
  0x83   : > { %4775 = vmatmul.mubr.msk.f32.vlgmr.msra.gmra.mrb[2].mxu1 (!%p9648_p6), %vm451_vm0, %v424_v2  ;;  %6027 = vmatprep.subr.bf16.mxu0 (!%p9648_p6), %v6026_v15  ;;  %v6030_v27 = vpack.c.bf16 (!%p9648_p6), %v638_v25, %v637_v24  ;;  %v668_v28 = vld [vmem:[%s9580_s5 + $0x198] sm:$0xff] (!%p9648_p6)  ;;  %v621_v29 = vld [vmem:[%s9580_s5 + $0x20] sm:$0xff] (!%p9648_p6)  ;;  %v622_v30 = vld [vmem:[%s9580_s5 + $0x28] sm:$0xff] (!%p9648_p6) }
  0x84   : > { %6055 = vmatprep.subr.bf16.mxu1 %v6054_v19  ;;  %v6058_v31 = vpack.c.bf16 %v668_v28, %v667_v26  ;;  %v6032_v32 = vpack.c.bf16 %v622_v30, %v621_v29  ;;  %v651_v33 = vld [vmem:[%s9580_s5 + $0x110] sm:$0xff]  ;;  %v652_v34 = vld [vmem:[%s9580_s5 + $0x118] sm:$0xff]  ;;  %v669_v38 = vld [vmem:[%s9580_s5 + $0x1a0] sm:$0xff] }
  0x85   : > { %6057 = vmatpush3.bf16.msra.mxu1 %v6056_v23  ;;  %v6060_v35 = vpack.c.bf16 %v652_v34, %v651_v33  ;;  %v639_v36 = vld [vmem:[%s9580_s5 + $0xb0] sm:$0xff]  ;;  %v640_v37 = vld [vmem:[%s9580_s5 + $0xb8] sm:$0xff]  ;;  %v670_v40 = vld [vmem:[%s9580_s5 + $0x1a8] sm:$0xff] }
  0x86   : > { %6029 = vmatpush3.bf16.msra.mxu0 %v6028_v22  ;;  %6059 = vmatprep.subr.bf16.mxu1 %v6058_v31  ;;  %v6034_v39 = vpack.c.bf16 %v640_v37, %v639_v36  ;;  %v623_v41 = vld [vmem:[%s9580_s5 + $0x30] sm:$0xff]  ;;  %v624_v42 = vld [vmem:[%s9580_s5 + $0x38] sm:$0xff]  ;;  %v6062_v43 = vpack.c.bf16 %v670_v40, %v669_v38  ;;  %v653_v45 = vld [vmem:[%s9580_s5 + $0x120] sm:$0xff]  ;;  %v431_v40 = vlaneseq }
  0x87   : > { %6031 = vmatprep.subr.bf16.mxu0 %v6030_v27  ;;  %v6036_v44 = vpack.c.bf16 %v624_v42, %v623_v41  ;;  %v654_v46 = vld [vmem:[%s9580_s5 + $0x128] sm:$0xff]  ;;  %v641_v48 = vld [vmem:[%s9580_s5 + $0xc0] sm:$0xff]  ;;  %v671_v50 = vld [vmem:[%s9580_s5 + $0x1b0] sm:$0xff] }
  0x88   : > { %v6064_v47 = vpack.c.bf16 %v654_v46, %v653_v45  ;;  %v642_v49 = vld [vmem:[%s9580_s5 + $0xc8] sm:$0xff]  ;;  %v672_v52 = vld [vmem:[%s9580_s5 + $0x1b8] sm:$0xff]  ;;  %v625_v53 = vld [vmem:[%s9580_s5 + $0x40] sm:$0xff]  ;;  %v432_v41 = vshrl.u32 %v431_v40, 7 }
  0x89   : > { %6061 = vmatpush3.bf16.msra.mxu1 %v6060_v35  ;;  %v6038_v51 = vpack.c.bf16 %v642_v49, %v641_v48  ;;  %v626_v54 = vld [vmem:[%s9580_s5 + $0x48] sm:$0xff]  ;;  %v6066_v55 = vpack.c.bf16 %v672_v52, %v671_v50  ;;  %v655_v57 = vld [vmem:[%s9580_s5 + $0x130] sm:$0xff]  ;;  %v656_v58 = vld [vmem:[%s9580_s5 + $0x138] sm:$0xff] }
  0x8a   : > { %6033 = vmatpush3.bf16.msra.mxu0 %v6032_v32  ;;  %6063 = vmatprep.subr.bf16.mxu1 %v6062_v43  ;;  %v6040_v56 = vpack.c.bf16 %v626_v54, %v625_v53  ;;  %v6068_v59 = vpack.c.bf16 %v656_v58, %v655_v57  ;;  %v643_v60 = vld [vmem:[%s9580_s5 + $0xd0] sm:$0xff]  ;;  %v644_v61 = vld [vmem:[%s9580_s5 + $0xd8] sm:$0xff]  ;;  %v673_v62 = vld [vmem:[%s9580_s5 + $0x1c0] sm:$0xff]  ;;  %v433_v42 = vsub.s32 0, %v432_v41  ;;  %v441_v46 = vsub.s32 2, %v432_v41 }
  0x8b   : > { %6035 = vmatprep.subr.bf16.mxu0 %v6034_v39  ;;  %v6042_v63 = vpack.c.bf16 %v644_v61, %v643_v60  ;;  %v674_v0 = vld [vmem:[%s9580_s5 + $0x1c8] sm:$0xff]  ;;  %v627_v1 = vld [vmem:[%s9580_s5 + $0x50] sm:$0xff]  ;;  %v628_v2 = vld [vmem:[%s9580_s5 + $0x58] sm:$0xff]  ;;  %v7094_v39 = vmov 0.0|0.0   ;;  %v445_v48 = vsub.s32 3, %v432_v41 }
  0x8c   : > { %v6070_v4 = vpack.c.bf16 %v674_v0, %v673_v62  ;;  %v6044_v5 = vpack.c.bf16 %v628_v2, %v627_v1  ;;  %v657_v6 = vld [vmem:[%s9580_s5 + $0x140] sm:$0xff]  ;;  %v658_v7 = vld [vmem:[%s9580_s5 + $0x148] sm:$0xff]  ;;  %v675_v11 = vld [vmem:[%s9580_s5 + $0x1d0] sm:$0xff] }
  0x8d   : > { %6065 = vmatpush3.bf16.msra.mxu1 %v6064_v47  ;;  %v6072_v8 = vpack.c.bf16 %v658_v7, %v657_v6  ;;  %v645_v9 = vld [vmem:[%s9580_s5 + $0xe0] sm:$0xff]  ;;  %v646_v10 = vld [vmem:[%s9580_s5 + $0xe8] sm:$0xff]  ;;  %v676_v13 = vld [vmem:[%s9580_s5 + $0x1d8] sm:$0xff] }
  0x8e   : > { %6037 = vmatpush3.bf16.msra.mxu0 %v6036_v44  ;;  %6067 = vmatprep.subr.bf16.mxu1 %v6066_v55  ;;  %v6046_v12 = vpack.c.bf16 %v646_v10, %v645_v9  ;;  %v629_v14 = vld [vmem:[%s9580_s5 + $0x60] sm:$0xff]  ;;  %v630_v15 = vld [vmem:[%s9580_s5 + $0x68] sm:$0xff]  ;;  %v6074_v16 = vpack.c.bf16 %v676_v13, %v675_v11  ;;  %v659_v18 = vld [vmem:[%s9580_s5 + $0x150] sm:$0xff]  ;;  %v437_v44 = vsub.s32 1, %v432_v41 }
  0x8f   : > { %6039 = vmatprep.subr.bf16.mxu0 %v6038_v51  ;;  %v6048_v17 = vpack.c.bf16 %v630_v15, %v629_v14  ;;  %v660_v19 = vld [vmem:[%s9580_s5 + $0x158] sm:$0xff]  ;;  %v647_v21 = vld [vmem:[%s9580_s5 + $0xf0] sm:$0xff]  ;;  %v677_v23 = vld [vmem:[%s9580_s5 + $0x1e0] sm:$0xff] }
  0x90   : > { %v6076_v20 = vpack.c.bf16 %v660_v19, %v659_v18  ;;  %v648_v22 = vld [vmem:[%s9580_s5 + $0xf8] sm:$0xff]  ;;  %v678_v25 = vld [vmem:[%s9580_s5 + $0x1e8] sm:$0xff]  ;;  %v631_v26 = vld [vmem:[%s9580_s5 + $0x70] sm:$0xff] }
  0x91   : > { %6069 = vmatpush3.bf16.msra.mxu1 %v6068_v59  ;;  %v6050_v24 = vpack.c.bf16 %v648_v22, %v647_v21  ;;  %v632_v27 = vld [vmem:[%s9580_s5 + $0x78] sm:$0xff]  ;;  %v6078_v28 = vpack.c.bf16 %v678_v25, %v677_v23  ;;  %v661_v30 = vld [vmem:[%s9580_s5 + $0x160] sm:$0xff]  ;;  %v662_v31 = vld [vmem:[%s9580_s5 + $0x168] sm:$0xff] }
  0x92   : > { %6041 = vmatpush3.bf16.msra.mxu0 %v6040_v56  ;;  %6071 = vmatprep.subr.bf16.mxu1 %v6070_v4  ;;  %v6052_v29 = vpack.c.bf16 %v632_v27, %v631_v26  ;;  %v6080_v32 = vpack.c.bf16 %v662_v31, %v661_v30  ;;  %v679_v33 = vld [vmem:[%s9580_s5 + $0x1f0] sm:$0xff]  ;;  %v680_v34 = vld [vmem:[%s9580_s5 + $0x1f8] sm:$0xff]  ;;  %v429_v43 = vld [vmem:[%s9579_s4] sm:$0xf] }
  0x93   : > { %6043 = vmatprep.subr.bf16.mxu0 %v6042_v63  ;;  %v6082_v35 = vpack.c.bf16 %v680_v34, %v679_v33  ;;  %v663_v36 = vld [vmem:[%s9580_s5 + $0x170] sm:$0xff]  ;;  %v664_v37 = vld [vmem:[%s9580_s5 + $0x178] sm:$0xff]  ;;  %v434_v45 = vrot.slane %v429_v43, %v433_v42  ;;  %v438_v47 = vrot.slane %v429_v43, %v437_v44  ;;  %v442_v52 = vrot.slane %v429_v43, %v441_v46  ;;  %v834_v6 = vld [vmem:[#allocation7 + $0x8] sm:$0xff] }
  0x94   : > { %v6084_v38 = vpack.c.bf16 %v664_v37, %v663_v36  ;;  %v446_v54 = vrot.slane %v429_v43, %v445_v48  ;;  %v835_v19 = vld [vmem:[#allocation7 + $0x10] sm:$0xff]  ;;  %v837_v22 = vld [vmem:[#allocation7 + $0x20] sm:$0xff]  ;;  %v838_v23 = vld [vmem:[#allocation7 + $0x28] sm:$0xff] }
  0x95   : > { %6073 = vmatpush3.bf16.msra.mxu1 %v6072_v8  ;;  %v839_v25 = vld [vmem:[#allocation7 + $0x30] sm:$0xff]  ;;  %v840_v26 = vld [vmem:[#allocation7 + $0x38] sm:$0xff]  ;;  %v845_v34 = vld [vmem:[#allocation7 + $0x60] sm:$0xff] }
  0x96   : > { %6045 = vmatpush3.bf16.msra.mxu0 %v6044_v5  ;;  %6075 = vmatprep.subr.bf16.mxu1 %v6074_v16  ;;  %v833_v5 = vld [vmem:[#allocation7] sm:$0xff]  ;;  %v6096_v27 = vpack.c.bf16 %v840_v26, %v839_v25  ;;  %v843_v31 = vld [vmem:[#allocation7 + $0x50] sm:$0xff] }
  0x97   : > { %6047 = vmatprep.subr.bf16.mxu0 %v6046_v12  ;;  %v6087_v13 = vpack.c.bf16 %v834_v6, %v833_v5  ;;  %v847_v37 = vld [vmem:[#allocation7 + $0x70] sm:$0xff]  ;;  %v4776_v44 = vld [vmem:[%s9581_s6] ss:$0 sm:$0xff] }
  0x99   : > { %6077 = vmatpush3.bf16.msra.mxu1 %v6076_v20  ;;  %v836_v20 = vld [vmem:[#allocation7 + $0x18] sm:$0xff] }
  0x9a   : > { %6049 = vmatpush3.bf16.msra.mxu0 %v6048_v17  ;;  %6079 = vmatprep.subr.bf16.mxu1 %v6078_v28  ;;  %v6090_v21 = vpack.c.bf16 %v836_v20, %v835_v19  ;;  %v841_v28 = vld [vmem:[#allocation7 + $0x40] sm:$0xff] }
  0x9b   : > { %6051 = vmatprep.subr.bf16.mxu0 %v6050_v24  ;;  %v6093_v24 = vpack.c.bf16 %v838_v23, %v837_v22 }
  0x9d   : > { %6081 = vmatpush3.bf16.msra.mxu1 %v6080_v32  ;;  %v844_v32 = vld [vmem:[#allocation7 + $0x58] sm:$0xff] }
  0x9e   : > { %6053 = vmatpush3.bf16.msra.mxu0 %v6052_v29  ;;  %6083 = vmatprep.subr.bf16.mxu1 %v6082_v35  ;;  %v842_v29 = vld [vmem:[#allocation7 + $0x48] sm:$0xff]  ;;  %v6102_v33 = vpack.c.bf16 %v844_v32, %v843_v31 }
  0x9f   : > { %6086 = vmatprep.subr.bf16.mxu0 %v7094_v39  ;;  %v6099_v30 = vpack.c.bf16 %v842_v29, %v841_v28  ;;  %v846_v35 = vld [vmem:[#allocation7 + $0x68] sm:$0xff] }
  0xa0   : > { %v6105_v36 = vpack.c.bf16 %v846_v35, %v845_v34 }
  0xa1   : > { %6085 = vmatpush3.bf16.msra.mxu1 %v6084_v38  ;;  %v848_v38 = vld [vmem:[#allocation7 + $0x78] sm:$0xff] }
  0xa2   : > { %v6108_v40 = vpack.c.bf16 %v848_v38, %v847_v37 }
 0x152   : > { %v521_v49 = vpop.f32.mrb[0].mxu1 }
 0x153   : > { %v522_v50 = vadd.f32 %v521_v49, %v434_v45  ;;  %v523_v51 = vpop.f32.mrb[1].mxu1 }
 0x154   : > { %v524_v53 = vadd.f32 %v523_v51, %v438_v47 }
 0x155   : > { %v597_v55 = vmul.f32 0.5, %v522_v50 }
 0x156   : > { %v598_v56 = vmul.f32 0.5, %v524_v53  ;;  %v592_v57 = vpop.f32.mrb[2].mxu1 }
 0x157   : > { %6276 = vtanh.f32 %v597_v55  ;;  %v593_v58 = vadd.f32 %v592_v57, %v442_v52  ;;  %v594_v59 = vpop.f32.mrb[3].mxu1 }
 0x158   : > { %6278 = vtanh.f32 %v598_v56  ;;  %v595_v60 = vadd.f32 %v594_v59, %v446_v54 }
 0x159   : > { %v599_v61 = vmul.f32 0.5, %v593_v58 }
 0x15a   : > { %v600_v62 = vmul.f32 0.5, %v595_v60 }
 0x15b   : > { %6280 = vtanh.f32 %v599_v61 }
 0x15c   : > { %6282 = vtanh.f32 %v600_v62 }
 0x161   : > { %v6277_v63 = vpop.eup %6276 }
 0x162   : > { %v6279_v0 = vpop.eup %6278  ;;  %v605_v1 = vmul.f32 0.5, %v6277_v63 }
 0x163   : > { %v606_v2 = vmul.f32 0.5, %v6279_v0 }
 0x164   : > { %v609_v4 = vadd.f32 0.5, %v605_v1 }
 0x165   : > { %v6281_v7 = vpop.eup %6280  ;;  %v610_v8 = vadd.f32 0.5, %v606_v2 }
 0x166   : > { %v6283_v9 = vpop.eup %6282  ;;  %v607_v10 = vmul.f32 0.5, %v6281_v7  ;;  %v613_v14 = vmul.f32 %v609_v4, %v522_v50 }
 0x167   : > { %v608_v11 = vmul.f32 0.5, %v6283_v9  ;;  %v614_v12 = vmul.f32 %v610_v8, %v524_v53 }
 0x168   : > { %v611_v15 = vadd.f32 0.5, %v607_v10 }
 0x169   : > { %v612_v16 = vadd.f32 0.5, %v608_v11  ;;  %752 = vmatprep.mubr.f32.mxu0 %v614_v12 }
 0x16a   : > { %753 = vmatmul.mubr.f32.vlgmr.msra.gmra.mrb[0].mxu0 %v613_v14  ;;  %v615_v18 = vmul.f32 %v611_v15, %v593_v58 }
 0x16b   : > { %v616_v17 = vmul.f32 %v612_v16, %v595_v60  ;;  %6088 = vmatpush3.bf16.msra.mxu0 %v6087_v13  ;;  %5487 = vmatprep.mubr.msk.f32.mxu0 %vm7095_vm1, %v7093_v3  ;;  %v4777_v3 = vld [vmem:[%s9584_s9] ss:$0 sm:$0xff] }
 0x16c   : > { %6089 = vmatprep.subr.bf16.mxu0 %v7094_v39 }
 0x16d   : > { %822 = vmatprep.mubr.f32.mxu1 %v616_v17 }
 0x16e   : > { %823 = vmatmul.mubr.f32.vlgmr.msra.gmra.mrb[4].mxu1 %v615_v18 }
 0x16f   : > { %6091 = vmatpush3.bf16.msra.mxu0 %v6090_v21 }
 0x170   : > { %6092 = vmatprep.subr.bf16.mxu0 %v7094_v39 }
 0x173   : > { %6094 = vmatpush3.bf16.msra.mxu0 %v6093_v24 }
 0x174   : > { %6095 = vmatprep.subr.bf16.mxu0 %v7094_v39 }
 0x177   : > { %6097 = vmatpush3.bf16.msra.mxu0 %v6096_v27 }
 0x178   : > { %6098 = vmatprep.subr.bf16.mxu0 %v7094_v39 }
 0x17b   : > { %6100 = vmatpush3.bf16.msra.mxu0 %v6099_v30 }
 0x17c   : > { %6101 = vmatprep.subr.bf16.mxu0 %v7094_v39 }
 0x17f   : > { %6103 = vmatpush3.bf16.msra.mxu0 %v6102_v33 }
 0x180   : > { %6104 = vmatprep.subr.bf16.mxu0 %v7094_v39 }
 0x183   : > { %6106 = vmatpush3.bf16.msra.mxu0 %v6105_v36 }
 0x184   : > { %6107 = vmatprep.subr.bf16.mxu0 %v7094_v39 }
 0x187   : > { %6109 = vmatpush3.bf16.msra.mxu0 %v6108_v40 }
 0x23d   : > { %v5072_v41 = vpop.f32.mrb[0].mxu0 }
 0x23e   : > { %v5073_v42 = vpop.f32.mrb[1].mxu0 }
 0x23f   : > { %v5074_v43 = vadd.f32 %v5073_v42, %v5072_v41 }
 0x241   : > { %v5107_v45 = vpop.f32.mrb[4].mxu1  ;;  %v755_v47 = vadd.f32 %v5074_v43, %v4776_v44 }
 0x242   : > { %v5108_v46 = vpop.f32.mrb[5].mxu1 }
 0x243   : > { %v5109_v48 = vadd.f32 %v5108_v46, %v5107_v45 }
 0x245   : > { %v825_v49 = vadd.f32 %v5109_v48, %v755_v47 }
 0x247   : > { %v828_v39 = vmul.f32 0.5, %v825_v49 }
 0x249   : > { %6284 = vtanh.f32 %v828_v39 }
 0x253   : > { %v6285_v50 = vpop.eup %6284 }
 0x254   : > { %v830_v51 = vmul.f32 0.5, %v6285_v50 }
 0x256   : > { %v831_v52 = vadd.f32 0.5, %v830_v51 }
 0x258   : > { %v832_v53 = vmul.f32 %v831_v52, %v825_v49 }
 0x25a   : > { %5488 = vmatmul.mubr.f32.vlgmr.msra.gmra.mrb[2].mxu0 %v832_v53 }
 0x32d   : > { %v922_v54 = vpop.f32.mrb[2].mxu0 }
 0x32e   : > { %v923_v55 = vadd.f32 %v4777_v3, %v922_v54  ;;  %v5489_v56 = vpop.f32.mrb[3].mxu0 }
 0x330   : > { %926 = vst [vmem:[#allocation8] sm:$0x3] %v923_v55 }
 0x331 PF: > { %v991_v57 = vld [vmem:[%s7319_s27] sm:$0xff]  ;;  %v1980_v58 = vld [vmem:[%s7319_s27 + $0x8] sm:$0xff]  ;;  %vm992_vm2 = vcmask 64512   ;;  %v929_v61 = vld [vmem:[%s9575_s0 + $0x10] sm:$0xff]  ;;  %vm7097_vm3 = vmmov 0   ;;  %vm2778_vm4 = vcmask 1041409  }
 0x332   : > { %v927_v59 = vld [vmem:[%s9575_s0] sm:$0xff]  ;;  %5490 = vmatprep.subr.mxu0 %v991_v57  ;;  %5588 = vmatprep.subr.mxu1 %v1980_v58  ;;  %v928_v60 = vld [vmem:[%s9575_s0 + $0x8] sm:$0xff]  ;;  %v930_v62 = vld [vmem:[%s9575_s0 + $0x18] sm:$0xff]  ;;  %p6232_p9 = scmp.eq.s32.totalorder %s7174_s17, 2 }
 0x333   : > { %5491 = vmatpush3.msra.mxu0 %v991_v57  ;;  %5492 = vmatprep.mubr.msk.f32.mxu0 %vm992_vm2, %v927_v59  ;;  %v931_v63 = vld [vmem:[%s9575_s0 + $0x20] sm:$0xff]  ;;  %v932_v0 = vld [vmem:[%s9575_s0 + $0x28] sm:$0xff]  ;;  %v933_v1 = vld [vmem:[%s9575_s0 + $0x30] sm:$0xff] }
 0x334   : > { %5589 = vmatpush3.msra.mxu1 %v1980_v58  ;;  %5590 = vmatprep.mubr.msk.f32.mxu1 %vm992_vm2, %v927_v59  ;;  %v934_v2 = vld [vmem:[%s9575_s0 + $0x38] sm:$0xff]  ;;  %v935_v4 = vld [vmem:[%s9575_s0 + $0x40] sm:$0xff]  ;;  %v936_v5 = vld [vmem:[%s9575_s0 + $0x48] sm:$0xff] }
 0x335   : > { %5493 = vmatmul.mubr.msk.f32.vlgmr.msra.gmra.mrb[0].mxu0 %vm992_vm2, %v928_v60  ;;  %5591 = vmatmul.mubr.msk.f32.vlgmr.msra.gmra.mrb[0].mxu1 %vm992_vm2, %v928_v60  ;;  %v937_v6 = vld [vmem:[%s9575_s0 + $0x50] sm:$0xff]  ;;  %v938_v7 = vld [vmem:[%s9575_s0 + $0x58] sm:$0xff]  ;;  %v939_v8 = vld [vmem:[%s9575_s0 + $0x60] sm:$0xff] }
 0x336   : > { %5495 = vmatprep.mubr.msk.f32.mxu0 %vm992_vm2, %v929_v61  ;;  %5593 = vmatprep.mubr.msk.f32.mxu1 %vm992_vm2, %v929_v61  ;;  %v940_v9 = vld [vmem:[%s9575_s0 + $0x68] sm:$0xff]  ;;  %v941_v10 = vld [vmem:[%s9575_s0 + $0x70] sm:$0xff]  ;;  %v942_v11 = vld [vmem:[%s9575_s0 + $0x78] sm:$0xff]  ;;  %v9591_v61 = vmov 0.0|0.0  }
 0x337   : > { %v943_v12 = vld [vmem:[%s9575_s0 + $0x80] sm:$0xff]  ;;  %v944_v13 = vld [vmem:[%s9575_s0 + $0x88] sm:$0xff]  ;;  %v945_v14 = vld [vmem:[%s9575_s0 + $0x90] sm:$0xff]  ;;  %6110 = vmatprep.subr.bf16.mxu0 %v9591_v61  ;;  %6134 = vmatprep.subr.bf16.mxu1 %v9591_v61 }
 0x338   : > { %v946_v15 = vld [vmem:[%s9575_s0 + $0x98] sm:$0xff]  ;;  %v947_v16 = vld [vmem:[%s9575_s0 + $0xa0] sm:$0xff]  ;;  %v948_v17 = vld [vmem:[%s9575_s0 + $0xa8] sm:$0xff] }
 0x339   : > { %5496 = vmatmul.mubr.msk.f32.gmra.mrb[2].mxu0 %vm992_vm2, %v930_v62  ;;  %5594 = vmatmul.mubr.msk.f32.gmra.mrb[2].mxu1 %vm992_vm2, %v930_v62  ;;  %v949_v18 = vld [vmem:[%s9575_s0 + $0xb0] sm:$0xff]  ;;  %v950_v19 = vld [vmem:[%s9575_s0 + $0xb8] sm:$0xff]  ;;  %v951_v20 = vld [vmem:[%s9575_s0 + $0xc0] sm:$0xff] }
 0x33a   : > { %5498 = vmatprep.mubr.msk.f32.mxu0 %vm992_vm2, %v931_v63  ;;  %5596 = vmatprep.mubr.msk.f32.mxu1 %vm992_vm2, %v931_v63  ;;  %v952_v21 = vld [vmem:[%s9575_s0 + $0xc8] sm:$0xff]  ;;  %v953_v22 = vld [vmem:[%s9575_s0 + $0xd0] sm:$0xff]  ;;  %v954_v23 = vld [vmem:[%s9575_s0 + $0xd8] sm:$0xff] }
 0x33b   : > { %v955_v24 = vld [vmem:[%s9575_s0 + $0xe0] sm:$0xff]  ;;  %v956_v25 = vld [vmem:[%s9575_s0 + $0xe8] sm:$0xff]  ;;  %v957_v26 = vld [vmem:[%s9575_s0 + $0xf0] sm:$0xff] }
 0x33c   : > { %v958_v27 = vld [vmem:[%s9575_s0 + $0xf8] sm:$0xff]  ;;  %v959_v28 = vld [vmem:[%s9575_s0 + $0x100] sm:$0xff]  ;;  %v960_v29 = vld [vmem:[%s9575_s0 + $0x108] sm:$0xff] }
 0x33d   : > { %5499 = vmatmul.mubr.msk.f32.gmra.mrb[4].mxu0 %vm992_vm2, %v932_v0  ;;  %5597 = vmatmul.mubr.msk.f32.gmra.mrb[4].mxu1 %vm992_vm2, %v932_v0  ;;  %v961_v30 = vld [vmem:[%s9575_s0 + $0x110] sm:$0xff]  ;;  %v962_v31 = vld [vmem:[%s9575_s0 + $0x118] sm:$0xff]  ;;  %v963_v32 = vld [vmem:[%s9575_s0 + $0x120] sm:$0xff] }
 0x33e   : > { %5501 = vmatprep.mubr.msk.f32.mxu0 %vm992_vm2, %v933_v1  ;;  %5599 = vmatprep.mubr.msk.f32.mxu1 %vm992_vm2, %v933_v1  ;;  %v964_v33 = vld [vmem:[%s9575_s0 + $0x128] sm:$0xff]  ;;  %v965_v34 = vld [vmem:[%s9575_s0 + $0x130] sm:$0xff]  ;;  %v966_v35 = vld [vmem:[%s9575_s0 + $0x138] sm:$0xff] }
 0x33f   : > { %v967_v36 = vld [vmem:[%s9575_s0 + $0x140] sm:$0xff]  ;;  %v968_v37 = vld [vmem:[%s9575_s0 + $0x148] sm:$0xff]  ;;  %v969_v38 = vld [vmem:[%s9575_s0 + $0x150] sm:$0xff] }
 0x340   : > { %v970_v40 = vld [vmem:[%s9575_s0 + $0x158] sm:$0xff]  ;;  %v971_v41 = vld [vmem:[%s9575_s0 + $0x160] sm:$0xff]  ;;  %v972_v42 = vld [vmem:[%s9575_s0 + $0x168] sm:$0xff] }
 0x341   : > { %5502 = vmatmul.mubr.msk.f32.gmra.mrb[6].mxu0 %vm992_vm2, %v934_v2  ;;  %5600 = vmatmul.mubr.msk.f32.gmra.mrb[6].mxu1 %vm992_vm2, %v934_v2  ;;  %v973_v43 = vld [vmem:[%s9575_s0 + $0x170] sm:$0xff]  ;;  %v974_v44 = vld [vmem:[%s9575_s0 + $0x178] sm:$0xff]  ;;  %v975_v45 = vld [vmem:[%s9575_s0 + $0x180] sm:$0xff] }
 0x342   : > { %5504 = vmatprep.mubr.msk.f32.mxu0 %vm992_vm2, %v935_v4  ;;  %5602 = vmatprep.mubr.msk.f32.mxu1 %vm992_vm2, %v935_v4  ;;  %v976_v46 = vld [vmem:[%s9575_s0 + $0x188] sm:$0xff]  ;;  %v977_v47 = vld [vmem:[%s9575_s0 + $0x190] sm:$0xff]  ;;  %v978_v48 = vld [vmem:[%s9575_s0 + $0x198] sm:$0xff] }
 0x343   : > { %v979_v49 = vld [vmem:[%s9575_s0 + $0x1a0] sm:$0xff]  ;;  %v980_v39 = vld [vmem:[%s9575_s0 + $0x1a8] sm:$0xff]  ;;  %v981_v50 = vld [vmem:[%s9575_s0 + $0x1b0] sm:$0xff] }
 0x344   : > { %v982_v51 = vld [vmem:[%s9575_s0 + $0x1b8] sm:$0xff]  ;;  %v983_v52 = vld [vmem:[%s9575_s0 + $0x1c0] sm:$0xff]  ;;  %v984_v53 = vld [vmem:[%s9575_s0 + $0x1c8] sm:$0xff] }
 0x345   : > { %5505 = vmatmul.mubr.msk.f32.gmra.mrb[8].mxu0 %vm992_vm2, %v936_v5  ;;  %5603 = vmatmul.mubr.msk.f32.gmra.mrb[8].mxu1 %vm992_vm2, %v936_v5  ;;  %v985_v3 = vld [vmem:[%s9575_s0 + $0x1d0] sm:$0xff]  ;;  %v986_v54 = vld [vmem:[%s9575_s0 + $0x1d8] sm:$0xff]  ;;  %v987_v55 = vld [vmem:[%s9575_s0 + $0x1e0] sm:$0xff] }
 0x346   : > { %5507 = vmatprep.mubr.msk.f32.mxu0 %vm992_vm2, %v937_v6  ;;  %5605 = vmatprep.mubr.msk.f32.mxu1 %vm992_vm2, %v937_v6  ;;  %v988_v56 = vld [vmem:[%s9575_s0 + $0x1e8] sm:$0xff]  ;;  %v989_v57 = vld [vmem:[%s9575_s0 + $0x1f0] sm:$0xff]  ;;  %v990_v58 = vld [vmem:[%s9575_s0 + $0x1f8] sm:$0xff] }
 0x347   : > { %v2760_v59 = vld [vmem:[%s7326_s13 + $0x80] sm:$0xff]  ;;  %v2761_v60 = vld [vmem:[%s7326_s13 + $0x88] sm:$0xff]  ;;  %v2762_v63 = vld [vmem:[%s7326_s13 + $0x90] sm:$0xff] }
 0x348   : > { %v6111_v62 = vpack.c.bf16 %v2761_v60, %v2760_v59  ;;  %v2763_v0 = vld [vmem:[%s7326_s13 + $0x98] sm:$0xff]  ;;  %v2764_v2 = vld [vmem:[%s7326_s13 + $0xa0] sm:$0xff]  ;;  %v2765_v4 = vld [vmem:[%s7326_s13 + $0xa8] sm:$0xff] }
 0x349   : > { %5508 = vmatmul.mubr.msk.f32.gmra.mrb[10].mxu0 %vm992_vm2, %v938_v7  ;;  %5606 = vmatmul.mubr.msk.f32.gmra.mrb[10].mxu1 %vm992_vm2, %v938_v7  ;;  %v6114_v1 = vpack.c.bf16 %v2763_v0, %v2762_v63  ;;  %v6117_v7 = vpack.c.bf16 %v2765_v4, %v2764_v2 }
 0x34a   : > { %5510 = vmatprep.mubr.msk.f32.mxu0 %vm992_vm2, %v939_v8  ;;  %5608 = vmatprep.mubr.msk.f32.mxu1 %vm992_vm2, %v939_v8 }
 0x34b   : > { %6112 = vmatpush3.bf16.msra.mxu0 %v6111_v62 }
 0x34c   : > { %6113 = vmatprep.subr.bf16.mxu0 %v9591_v61 }
 0x34d   : > { %5511 = vmatmul.mubr.msk.f32.gmra.mrb[12].mxu0 %vm992_vm2, %v940_v9  ;;  %5609 = vmatmul.mubr.msk.f32.gmra.mrb[12].mxu1 %vm992_vm2, %v940_v9 }
 0x34e   : > { %5513 = vmatprep.mubr.msk.f32.mxu0 %vm992_vm2, %v941_v10  ;;  %5611 = vmatprep.mubr.msk.f32.mxu1 %vm992_vm2, %v941_v10 }
 0x34f   : > { %6115 = vmatpush3.bf16.msra.mxu0 %v6114_v1 }
 0x350   : > { %6116 = vmatprep.subr.bf16.mxu0 %v9591_v61 }
 0x351   : > { %5514 = vmatmul.mubr.msk.f32.gmra.mrb[14].mxu0 %vm992_vm2, %v942_v11  ;;  %5612 = vmatmul.mubr.msk.f32.gmra.mrb[14].mxu1 %vm992_vm2, %v942_v11 }
 0x352   : > { %5516 = vmatprep.mubr.msk.f32.mxu0 %vm992_vm2, %v943_v12  ;;  %5614 = vmatprep.mubr.msk.f32.mxu1 %vm992_vm2, %v943_v12 }
 0x353   : > { %6118 = vmatpush3.bf16.msra.mxu0 %v6117_v7 }
 0x354   : > { %6119 = vmatprep.subr.bf16.mxu0 %v9591_v61 }
 0x355   : > { %5517 = vmatmul.mubr.msk.f32.gmra.mrb[16].mxu0 %vm992_vm2, %v944_v13  ;;  %5615 = vmatmul.mubr.msk.f32.gmra.mrb[16].mxu1 %vm992_vm2, %v944_v13 }
 0x356   : > { %5519 = vmatprep.mubr.msk.f32.mxu0 %vm992_vm2, %v945_v14  ;;  %5617 = vmatprep.mubr.msk.f32.mxu1 %vm992_vm2, %v945_v14 }
 0x359   : > { %5520 = vmatmul.mubr.msk.f32.gmra.mrb[18].mxu0 %vm992_vm2, %v946_v15  ;;  %5618 = vmatmul.mubr.msk.f32.gmra.mrb[18].mxu1 %vm992_vm2, %v946_v15 }
 0x35a   : > { %5522 = vmatprep.mubr.msk.f32.mxu0 %vm992_vm2, %v947_v16  ;;  %5620 = vmatprep.mubr.msk.f32.mxu1 %vm992_vm2, %v947_v16 }
 0x35d   : > { %5523 = vmatmul.mubr.msk.f32.gmra.mrb[20].mxu0 %vm992_vm2, %v948_v17  ;;  %5621 = vmatmul.mubr.msk.f32.gmra.mrb[20].mxu1 %vm992_vm2, %v948_v17 }
 0x35e   : > { %5525 = vmatprep.mubr.msk.f32.mxu0 %vm992_vm2, %v949_v18  ;;  %5623 = vmatprep.mubr.msk.f32.mxu1 %vm992_vm2, %v949_v18 }
 0x361   : > { %5526 = vmatmul.mubr.msk.f32.gmra.mrb[22].mxu0 %vm992_vm2, %v950_v19  ;;  %5624 = vmatmul.mubr.msk.f32.gmra.mrb[22].mxu1 %vm992_vm2, %v950_v19 }
 0x362   : > { %5528 = vmatprep.mubr.msk.f32.mxu0 %vm992_vm2, %v951_v20  ;;  %5626 = vmatprep.mubr.msk.f32.mxu1 %vm992_vm2, %v951_v20 }
 0x365   : > { %5529 = vmatmul.mubr.msk.f32.gmra.mrb[24].mxu0 %vm992_vm2, %v952_v21  ;;  %5627 = vmatmul.mubr.msk.f32.gmra.mrb[24].mxu1 %vm992_vm2, %v952_v21 }
 0x366   : > { %5531 = vmatprep.mubr.msk.f32.mxu0 %vm992_vm2, %v953_v22  ;;  %5629 = vmatprep.mubr.msk.f32.mxu1 %vm992_vm2, %v953_v22 }
 0x369   : > { %5532 = vmatmul.mubr.msk.f32.gmra.mrb[26].mxu0 %vm992_vm2, %v954_v23  ;;  %5630 = vmatmul.mubr.msk.f32.gmra.mrb[26].mxu1 %vm992_vm2, %v954_v23 }
 0x36a   : > { %5534 = vmatprep.mubr.msk.f32.mxu0 %vm992_vm2, %v955_v24  ;;  %5632 = vmatprep.mubr.msk.f32.mxu1 %vm992_vm2, %v955_v24 }
 0x36d   : > { %5535 = vmatmul.mubr.msk.f32.gmra.mrb[28].mxu0 %vm992_vm2, %v956_v25  ;;  %5633 = vmatmul.mubr.msk.f32.gmra.mrb[28].mxu1 %vm992_vm2, %v956_v25 }
 0x36e   : > { %5537 = vmatprep.mubr.msk.f32.mxu0 %vm992_vm2, %v957_v26  ;;  %5635 = vmatprep.mubr.msk.f32.mxu1 %vm992_vm2, %v957_v26 }
 0x371   : > { %5538 = vmatmul.mubr.msk.f32.gmra.mrb[30].mxu0 %vm992_vm2, %v958_v27  ;;  %5636 = vmatmul.mubr.msk.f32.gmra.mrb[30].mxu1 %vm992_vm2, %v958_v27 }
 0x372   : > { %5540 = vmatprep.mubr.msk.f32.mxu0 %vm992_vm2, %v959_v28  ;;  %5638 = vmatprep.mubr.msk.f32.mxu1 %vm992_vm2, %v959_v28 }
 0x375   : > { %5541 = vmatmul.mubr.msk.f32.gmra.mrb[32].mxu0 %vm992_vm2, %v960_v29  ;;  %5639 = vmatmul.mubr.msk.f32.gmra.mrb[32].mxu1 %vm992_vm2, %v960_v29 }
 0x376   : > { %5543 = vmatprep.mubr.msk.f32.mxu0 %vm992_vm2, %v961_v30  ;;  %5641 = vmatprep.mubr.msk.f32.mxu1 %vm992_vm2, %v961_v30 }
 0x379   : > { %5544 = vmatmul.mubr.msk.f32.gmra.mrb[34].mxu0 %vm992_vm2, %v962_v31  ;;  %5642 = vmatmul.mubr.msk.f32.gmra.mrb[34].mxu1 %vm992_vm2, %v962_v31 }
 0x37a   : > { %5546 = vmatprep.mubr.msk.f32.mxu0 %vm992_vm2, %v963_v32  ;;  %5644 = vmatprep.mubr.msk.f32.mxu1 %vm992_vm2, %v963_v32 }
 0x37d   : > { %5547 = vmatmul.mubr.msk.f32.gmra.mrb[36].mxu0 %vm992_vm2, %v964_v33  ;;  %5645 = vmatmul.mubr.msk.f32.gmra.mrb[36].mxu1 %vm992_vm2, %v964_v33 }
 0x37e   : > { %5549 = vmatprep.mubr.msk.f32.mxu0 %vm992_vm2, %v965_v34  ;;  %5647 = vmatprep.mubr.msk.f32.mxu1 %vm992_vm2, %v965_v34 }
 0x381   : > { %5550 = vmatmul.mubr.msk.f32.gmra.mrb[38].mxu0 %vm992_vm2, %v966_v35  ;;  %5648 = vmatmul.mubr.msk.f32.gmra.mrb[38].mxu1 %vm992_vm2, %v966_v35 }
 0x382   : > { %5552 = vmatprep.mubr.msk.f32.mxu0 %vm992_vm2, %v967_v36  ;;  %5650 = vmatprep.mubr.msk.f32.mxu1 %vm992_vm2, %v967_v36 }
 0x385   : > { %5553 = vmatmul.mubr.msk.f32.gmra.mrb[40].mxu0 %vm992_vm2, %v968_v37  ;;  %5651 = vmatmul.mubr.msk.f32.gmra.mrb[40].mxu1 %vm992_vm2, %v968_v37 }
 0x386   : > { %5555 = vmatprep.mubr.msk.f32.mxu0 %vm992_vm2, %v969_v38  ;;  %5653 = vmatprep.mubr.msk.f32.mxu1 %vm992_vm2, %v969_v38 }
 0x389   : > { %5556 = vmatmul.mubr.msk.f32.gmra.mrb[42].mxu0 %vm992_vm2, %v970_v40  ;;  %5654 = vmatmul.mubr.msk.f32.gmra.mrb[42].mxu1 %vm992_vm2, %v970_v40 }
 0x38a   : > { %5558 = vmatprep.mubr.msk.f32.mxu0 %vm992_vm2, %v971_v41  ;;  %5656 = vmatprep.mubr.msk.f32.mxu1 %vm992_vm2, %v971_v41 }
 0x38d   : > { %5559 = vmatmul.mubr.msk.f32.gmra.mrb[44].mxu0 %vm992_vm2, %v972_v42  ;;  %5657 = vmatmul.mubr.msk.f32.gmra.mrb[44].mxu1 %vm992_vm2, %v972_v42 }
 0x38e   : > { %5561 = vmatprep.mubr.msk.f32.mxu0 %vm992_vm2, %v973_v43  ;;  %5659 = vmatprep.mubr.msk.f32.mxu1 %vm992_vm2, %v973_v43 }
 0x391   : > { %5562 = vmatmul.mubr.msk.f32.gmra.mrb[46].mxu0 %vm992_vm2, %v974_v44  ;;  %5660 = vmatmul.mubr.msk.f32.gmra.mrb[46].mxu1 %vm992_vm2, %v974_v44 }
 0x392   : > { %5564 = vmatprep.mubr.msk.f32.mxu0 %vm992_vm2, %v975_v45  ;;  %5662 = vmatprep.mubr.msk.f32.mxu1 %vm992_vm2, %v975_v45 }
 0x395   : > { %5565 = vmatmul.mubr.msk.f32.gmra.mrb[48].mxu0 %vm992_vm2, %v976_v46  ;;  %5663 = vmatmul.mubr.msk.f32.gmra.mrb[48].mxu1 %vm992_vm2, %v976_v46 }
 0x396   : > { %5567 = vmatprep.mubr.msk.f32.mxu0 %vm992_vm2, %v977_v47  ;;  %5665 = vmatprep.mubr.msk.f32.mxu1 %vm992_vm2, %v977_v47 }
 0x399   : > { %5568 = vmatmul.mubr.msk.f32.gmra.mrb[50].mxu0 %vm992_vm2, %v978_v48  ;;  %5666 = vmatmul.mubr.msk.f32.gmra.mrb[50].mxu1 %vm992_vm2, %v978_v48 }
 0x39a   : > { %5570 = vmatprep.mubr.msk.f32.mxu0 %vm992_vm2, %v979_v49  ;;  %5668 = vmatprep.mubr.msk.f32.mxu1 %vm992_vm2, %v979_v49 }
 0x39d   : > { %5571 = vmatmul.mubr.msk.f32.gmra.mrb[52].mxu0 %vm992_vm2, %v980_v39  ;;  %5669 = vmatmul.mubr.msk.f32.gmra.mrb[52].mxu1 %vm992_vm2, %v980_v39 }
 0x39e   : > { %5573 = vmatprep.mubr.msk.f32.mxu0 %vm992_vm2, %v981_v50  ;;  %5671 = vmatprep.mubr.msk.f32.mxu1 %vm992_vm2, %v981_v50 }
 0x3a1   : > { %5574 = vmatmul.mubr.msk.f32.gmra.mrb[54].mxu0 %vm992_vm2, %v982_v51  ;;  %5672 = vmatmul.mubr.msk.f32.gmra.mrb[54].mxu1 %vm992_vm2, %v982_v51 }
 0x3a2   : > { %5576 = vmatprep.mubr.msk.f32.mxu0 %vm992_vm2, %v983_v52  ;;  %5674 = vmatprep.mubr.msk.f32.mxu1 %vm992_vm2, %v983_v52 }
 0x3a5   : > { %5577 = vmatmul.mubr.msk.f32.gmra.mrb[56].mxu0 %vm992_vm2, %v984_v53  ;;  %5675 = vmatmul.mubr.msk.f32.gmra.mrb[56].mxu1 %vm992_vm2, %v984_v53 }
 0x3a6   : > { %5579 = vmatprep.mubr.msk.f32.mxu0 %vm992_vm2, %v985_v3  ;;  %5677 = vmatprep.mubr.msk.f32.mxu1 %vm992_vm2, %v985_v3 }
 0x3a9   : > { %5580 = vmatmul.mubr.msk.f32.gmra.mrb[58].mxu0 %vm992_vm2, %v986_v54  ;;  %5678 = vmatmul.mubr.msk.f32.gmra.mrb[58].mxu1 %vm992_vm2, %v986_v54 }
 0x3aa   : > { %5582 = vmatprep.mubr.msk.f32.mxu0 %vm992_vm2, %v987_v55  ;;  %5680 = vmatprep.mubr.msk.f32.mxu1 %vm992_vm2, %v987_v55 }
 0x3ad   : > { %5583 = vmatmul.mubr.msk.f32.gmra.mrb[60].mxu0 %vm992_vm2, %v988_v56  ;;  %5681 = vmatmul.mubr.msk.f32.gmra.mrb[60].mxu1 %vm992_vm2, %v988_v56 }
 0x3ae   : > { %5585 = vmatprep.mubr.msk.f32.mxu0 %vm992_vm2, %v989_v57  ;;  %5683 = vmatprep.mubr.msk.f32.mxu1 %vm992_vm2, %v989_v57 }
 0x3b1   : > { %5586 = vmatmul.mubr.msk.f32.gmra.mrb[62].mxu0 %vm992_vm2, %v990_v58  ;;  %5684 = vmatmul.mubr.msk.f32.gmra.mrb[62].mxu1 %vm992_vm2, %v990_v58 }
 0x408   : > { %v7899_v5 = vpop.f32.mrb[0].mxu1  ;;  %v7901_v6 = vpop.f32.mrb[0].mxu0 }
 0x409   : > { %v2367_v8 = vmul.f32 0.5, %v7899_v5  ;;  %v7904_v9 = vpop.f32.mrb[1].mxu1  ;;  %v1571_v10 = vmul.f32 0.5, %v7901_v6  ;;  %v7907_v11 = vpop.f32.mrb[1].mxu0 }
 0x40a   : > { %v2366_v12 = vmul.f32 0.5, %v7904_v9  ;;  %v1570_v13 = vmul.f32 0.5, %v7907_v11 }
 0x40b   : > { %6286 = vtanh.f32 %v2367_v8 }
 0x40c   : > { %6288 = vtanh.f32 %v2366_v12  ;;  %v7912_v14 = vpop.f32.mrb[2].mxu1  ;;  %v7914_v15 = vpop.f32.mrb[2].mxu0 }
 0x40d   : > { %v2369_v16 = vmul.f32 0.5, %v7912_v14  ;;  %v7917_v17 = vpop.f32.mrb[3].mxu1  ;;  %6290 = vtanh.f32 %v1571_v10  ;;  %v1573_v18 = vmul.f32 0.5, %v7914_v15  ;;  %v7920_v19 = vpop.f32.mrb[3].mxu0 }
 0x40e   : > { %v2368_v20 = vmul.f32 0.5, %v7917_v17  ;;  %6292 = vtanh.f32 %v1570_v13  ;;  %v1572_v21 = vmul.f32 0.5, %v7920_v19 }
 0x40f   : > { %6294 = vtanh.f32 %v2369_v16 }
 0x410   : > { %6296 = vtanh.f32 %v2368_v20  ;;  %v7924_v22 = vpop.f32.mrb[4].mxu1  ;;  %v7926_v23 = vpop.f32.mrb[4].mxu0 }
 0x411   : > { %v2371_v24 = vmul.f32 0.5, %v7924_v22  ;;  %v7929_v25 = vpop.f32.mrb[5].mxu1  ;;  %6298 = vtanh.f32 %v1573_v18  ;;  %v1575_v26 = vmul.f32 0.5, %v7926_v23  ;;  %v7932_v27 = vpop.f32.mrb[5].mxu0 }
 0x412   : > { %v2370_v28 = vmul.f32 0.5, %v7929_v25  ;;  %6300 = vtanh.f32 %v1572_v21  ;;  %v1574_v29 = vmul.f32 0.5, %v7932_v27 }
 0x413   : > { %6302 = vtanh.f32 %v2371_v24 }
 0x414   : > { %6304 = vtanh.f32 %v2370_v28  ;;  %v7936_v30 = vpop.f32.mrb[6].mxu1  ;;  %v7938_v31 = vpop.f32.mrb[6].mxu0 }
 0x415   : > { %v6287_v32 = vpop.eup %6286  ;;  %v2373_v33 = vmul.f32 0.5, %v7936_v30  ;;  %v7941_v34 = vpop.f32.mrb[7].mxu1  ;;  %6306 = vtanh.f32 %v1575_v26  ;;  %v1577_v35 = vmul.f32 0.5, %v7938_v31 }
 0x416   : > { %v7944_v36 = vpop.f32.mrb[7].mxu0  ;;  %v6289_v37 = vpop.eup %6288  ;;  %v2495_v38 = vmul.f32 0.5, %v6287_v32  ;;  %v2372_v40 = vmul.f32 0.5, %v7941_v34  ;;  %6308 = vtanh.f32 %v1574_v29 }
 0x417   : > { %v6291_v41 = vpop.eup %6290  ;;  %v2494_v42 = vmul.f32 0.5, %v6289_v37  ;;  %6310 = vtanh.f32 %v2373_v33  ;;  %v7950_v47 = vmul.f32 0.5, %v7944_v36 }
 0x418   : > { %v6293_v43 = vpop.eup %6292  ;;  %v2559_v44 = vadd.f32 0.5, %v2495_v38  ;;  %6312 = vtanh.f32 %v2372_v40  ;;  %v7947_v45 = vpop.f32.mrb[8].mxu1  ;;  %v1699_v46 = vmul.f32 0.5, %v6291_v41 }
 0x419   : > { %v7952_v48 = vpop.f32.mrb[8].mxu0  ;;  %v6295_v49 = vpop.eup %6294  ;;  %v2558_v39 = vadd.f32 0.5, %v2494_v42  ;;  %v2375_v50 = vmul.f32 0.5, %v7947_v45  ;;  %v1698_v52 = vmul.f32 0.5, %v6293_v43  ;;  %6314 = vtanh.f32 %v1577_v35 }
 0x41a   : > { %v7955_v51 = vpop.f32.mrb[9].mxu1  ;;  %v7957_v53 = vpop.f32.mrb[9].mxu0  ;;  %v2623_v54 = vmul.f32 %v7899_v5, %v2559_v44  ;;  %v2497_v55 = vmul.f32 0.5, %v6295_v49  ;;  %v1763_v57 = vadd.f32 0.5, %v1699_v46 }
 0x41b   : > { %v6297_v3 = vpop.eup %6296  ;;  %v2374_v56 = vmul.f32 0.5, %v7955_v51  ;;  %v2622_v59 = vmul.f32 %v2558_v39, %v7904_v9  ;;  %6316 = vtanh.f32 %v2375_v50  ;;  %v1762_v62 = vadd.f32 0.5, %v1698_v52 }
 0x41c   : > { %v6299_v58 = vpop.eup %6298  ;;  %v2496_v60 = vmul.f32 0.5, %v6297_v3  ;;  %v2561_v0 = vadd.f32 0.5, %v2497_v55  ;;  %v7962_v1 = vpop.f32.mrb[10].mxu1  ;;  %v1827_v2 = vmul.f32 %v7901_v6, %v1763_v57 }
 0x41d   : > { %v6301_v63 = vpop.eup %6300  ;;  %6318 = vtanh.f32 %v2374_v56  ;;  %v1701_v4 = vmul.f32 0.5, %v6299_v58  ;;  %v7965_v7 = vpop.f32.mrb[10].mxu0  ;;  %v2686_v8 = vadd.f32 %v2623_v54, %v2622_v59  ;;  %v2377_v12 = vmul.f32 0.5, %v7962_v1 }
 0x41e   : > { %v6303_v5 = vpop.eup %6302  ;;  %v2560_v10 = vadd.f32 0.5, %v2496_v60  ;;  %v7968_v13 = vpop.f32.mrb[11].mxu1  ;;  %v1826_v9 = vmul.f32 %v1762_v62, %v7907_v11  ;;  %v2625_v20 = vmul.f32 %v7912_v14, %v2561_v0  ;;  %v1700_v38 = vmul.f32 0.5, %v6301_v63 }
 0x41f   : > { %v7971_v16 = vpop.f32.mrb[11].mxu0  ;;  %v6305_v18 = vpop.eup %6304  ;;  %v2499_v21 = vmul.f32 0.5, %v6303_v5  ;;  %v2376_v6 = vmul.f32 0.5, %v7968_v13  ;;  %v1765_v24 = vadd.f32 0.5, %v1701_v4  ;;  %6320 = vtanh.f32 %v2377_v12 }
 0x420   : > { %v6307_v26 = vpop.eup %6306  ;;  %v2624_v28 = vmul.f32 %v2560_v10, %v7917_v17  ;;  %v2498_v29 = vmul.f32 0.5, %v6305_v18  ;;  %v1890_v32 = vadd.f32 %v1827_v2, %v1826_v9  ;;  %v7976_v37 = vpop.f32.mrb[12].mxu1 }
 0x421   : > { %v6309_v33 = vpop.eup %6308  ;;  %v2563_v35 = vadd.f32 0.5, %v2499_v21  ;;  %6322 = vtanh.f32 %v2376_v6  ;;  %v1829_v11 = vmul.f32 %v7914_v15, %v1765_v24  ;;  %v7979_v40 = vpop.f32.mrb[12].mxu0  ;;  %v2379_v43 = vmul.f32 0.5, %v7976_v37 }
 0x422   : > { %v6311_v14 = vpop.eup %6310  ;;  %v2687_v41 = vadd.f32 %v2686_v8, %v2624_v28  ;;  %v2562_v42 = vadd.f32 0.5, %v2498_v29  ;;  %v7982_v44 = vpop.f32.mrb[13].mxu1  ;;  %v1703_v17 = vmul.f32 0.5, %v6307_v26  ;;  %v1764_v15 = vadd.f32 0.5, %v1700_v38 }
 0x423   : > { %v7984_v46 = vpop.f32.mrb[13].mxu0  ;;  %v6313_v49 = vpop.eup %6312  ;;  %v2627_v39 = vmul.f32 %v7924_v22, %v2563_v35  ;;  %v2501_v50 = vmul.f32 0.5, %v6311_v14  ;;  %v2378_v52 = vmul.f32 0.5, %v7982_v44  ;;  %6324 = vtanh.f32 %v2379_v43 }
 0x424   : > { %v6315_v3 = vpop.eup %6314  ;;  %v2626_v54 = vmul.f32 %v2562_v42, %v7929_v25  ;;  %v2688_v55 = vadd.f32 %v2687_v41, %v2625_v20  ;;  %v2500_v56 = vmul.f32 0.5, %v6313_v49  ;;  %v7989_v58 = vpop.f32.mrb[14].mxu1  ;;  %v1828_v59 = vmul.f32 %v1764_v15, %v7920_v19 }
 0x425   : > { %v2565_v57 = vadd.f32 0.5, %v2501_v50  ;;  %6326 = vtanh.f32 %v2378_v52  ;;  %v1767_v60 = vadd.f32 0.5, %v1703_v17  ;;  %v7992_v62 = vpop.f32.mrb[14].mxu0  ;;  %v6317_v22 = vpop.eup %6316  ;;  %v2381_v2 = vmul.f32 0.5, %v7989_v58 }
 0x426   : > { %v2689_v63 = vadd.f32 %v2688_v55, %v2626_v54  ;;  %v2564_v0 = vadd.f32 0.5, %v2500_v56  ;;  %v7995_v4 = vpop.f32.mrb[15].mxu1  ;;  %v1702_v25 = vmul.f32 0.5, %v6309_v33  ;;  %v7997_v5 = vpop.f32.mrb[15].mxu0  ;;  %v2503_v12 = vmul.f32 0.5, %v6317_v22 }
 0x427   : > { %v6319_v8 = vpop.eup %6318  ;;  %v2629_v10 = vmul.f32 %v7936_v30, %v2565_v57  ;;  %v2380_v9 = vmul.f32 0.5, %v7995_v4  ;;  %v1891_v19 = vadd.f32 %v1890_v32, %v1828_v59  ;;  %6328 = vtanh.f32 %v2381_v2 }
 0x428   : > { %v2628_v18 = vmul.f32 %v2564_v0, %v7941_v34  ;;  %v2690_v20 = vadd.f32 %v2689_v63, %v2627_v39  ;;  %v2502_v21 = vmul.f32 0.5, %v6319_v8  ;;  %v2567_v6 = vadd.f32 0.5, %v2503_v12  ;;  %v8002_v24 = vpop.f32.mrb[16].mxu1  ;;  %v8005_v29 = vpop.f32.mrb[16].mxu0 }
 0x429   : > { %6330 = vtanh.f32 %v2380_v9  ;;  %v1831_v26 = vmul.f32 %v7926_v23, %v1767_v60  ;;  %v1766_v28 = vadd.f32 0.5, %v1702_v25  ;;  %v6321_v33 = vpop.eup %6320  ;;  %v2383_v38 = vmul.f32 0.5, %v8002_v24  ;;  %v8008_v32 = vpop.f32.mrb[17].mxu1 }
 0x42a   : > { %v2691_v30 = vadd.f32 %v2690_v20, %v2628_v18  ;;  %v2566_v35 = vadd.f32 0.5, %v2502_v21  ;;  %v1892_v34 = vadd.f32 %v1891_v19, %v1829_v11  ;;  %v8010_v14 = vpop.f32.mrb[17].mxu0  ;;  %v2631_v42 = vmul.f32 %v7947_v45, %v2567_v6 }
 0x42b   : > { %v6323_v41 = vpop.eup %6322  ;;  %v2505_v43 = vmul.f32 0.5, %v6321_v33  ;;  %v2382_v17 = vmul.f32 0.5, %v8008_v32  ;;  %v1830_v23 = vmul.f32 %v1766_v28, %v7932_v27  ;;  %6332 = vtanh.f32 %v2383_v38 }
 0x42c   : > { %v2630_v49 = vmul.f32 %v2566_v35, %v7955_v51  ;;  %v2692_v39 = vadd.f32 %v2691_v30, %v2629_v10  ;;  %v2504_v50 = vmul.f32 0.5, %v6323_v41  ;;  %v8016_v15 = vpop.f32.mrb[18].mxu1  ;;  %v1705_v54 = vmul.f32 0.5, %v6315_v3  ;;  %v8018_v55 = vpop.f32.mrb[18].mxu0 }
 0x42d   : > { %v2569_v52 = vadd.f32 0.5, %v2505_v43  ;;  %6334 = vtanh.f32 %v2382_v17  ;;  %v1893_v11 = vadd.f32 %v1892_v34, %v1830_v23  ;;  %v6325_v56 = vpop.eup %6324  ;;  %v2385_v59 = vmul.f32 0.5, %v8016_v15  ;;  %v8021_v60 = vpop.f32.mrb[19].mxu1 }
 0x42e   : > { %v2693_v45 = vadd.f32 %v2692_v39, %v2630_v49  ;;  %v2568_v57 = vadd.f32 0.5, %v2504_v50  ;;  %6336 = vtanh.f32 %v7950_v47  ;;  %v8024_v27 = vpop.f32.mrb[19].mxu0  ;;  %v2507_v63 = vmul.f32 0.5, %v6325_v56 }
 0x42f   : > { %v6327_v51 = vpop.eup %6326  ;;  %v2633_v22 = vmul.f32 %v7962_v1, %v2569_v52  ;;  %v2384_v0 = vmul.f32 0.5, %v8021_v60  ;;  %v1769_v3 = vadd.f32 0.5, %v1705_v54  ;;  %6338 = vtanh.f32 %v2385_v59 }
 0x430   : > { %v2632_v2 = vmul.f32 %v2568_v57, %v7968_v13  ;;  %v2694_v25 = vadd.f32 %v2693_v45, %v2631_v42  ;;  %v2506_v8 = vmul.f32 0.5, %v6327_v51  ;;  %v2571_v10 = vadd.f32 0.5, %v2507_v63  ;;  %v8032_v47 = vpop.f32.mrb[20].mxu1  ;;  %v8036_v19 = vpop.f32.mrb[20].mxu0 }
 0x431   : > { %6340 = vtanh.f32 %v2384_v0  ;;  %v8030_v12 = vmul.f32 %v7938_v31, %v1769_v3  ;;  %v8034_v9 = vadd.f32 %v1893_v11, %v1831_v26  ;;  %v6329_v1 = vpop.eup %6328  ;;  %v2387_v21 = vmul.f32 0.5, %v8032_v47  ;;  %v8039_v13 = vpop.f32.mrb[21].mxu1 }
 0x432   : > { %v2695_v18 = vadd.f32 %v2694_v25, %v2632_v2  ;;  %v2570_v20 = vadd.f32 0.5, %v2506_v8  ;;  %v1579_v6 = vmul.f32 0.5, %v7952_v48  ;;  %v8042_v28 = vpop.f32.mrb[21].mxu0  ;;  %v2635_v31 = vmul.f32 %v7976_v37, %v2571_v10 }
 0x433   : > { %v6331_v33 = vpop.eup %6330  ;;  %v2509_v30 = vmul.f32 0.5, %v6329_v1  ;;  %v2386_v26 = vmul.f32 0.5, %v8039_v13  ;;  %v1578_v35 = vmul.f32 0.5, %v7957_v53  ;;  %6342 = vtanh.f32 %v2387_v21 }
 0x434   : > { %v2634_v38 = vmul.f32 %v2570_v20, %v7982_v44  ;;  %v2696_v34 = vadd.f32 %v2695_v18, %v2633_v22  ;;  %v2508_v41 = vmul.f32 0.5, %v6331_v33  ;;  %v1581_v43 = vmul.f32 0.5, %v7965_v7  ;;  %v8049_v17 = vpop.f32.mrb[22].mxu1  ;;  %v8052_v49 = vpop.f32.mrb[22].mxu0 }
 0x435   : > { %v2573_v42 = vadd.f32 0.5, %v2509_v30  ;;  %6344 = vtanh.f32 %v2386_v26  ;;  %v1580_v23 = vmul.f32 0.5, %v7971_v16  ;;  %v6333_v37 = vpop.eup %6332  ;;  %v2389_v52 = vmul.f32 0.5, %v8049_v17  ;;  %v8055_v44 = vpop.f32.mrb[23].mxu1 }
 0x436   : > { %v2697_v39 = vadd.f32 %v2696_v34, %v2634_v38  ;;  %v2572_v50 = vadd.f32 0.5, %v2508_v41  ;;  %6346 = vtanh.f32 %v1579_v6  ;;  %v8057_v11 = vpop.f32.mrb[23].mxu0  ;;  %v2511_v45 = vmul.f32 0.5, %v6333_v37 }
 0x437   : > { %v6335_v54 = vpop.eup %6334  ;;  %v2637_v56 = vmul.f32 %v7989_v58, %v2573_v42  ;;  %6348 = vtanh.f32 %v1578_v35  ;;  %v2388_v57 = vmul.f32 0.5, %v8055_v44  ;;  %v1583_v2 = vmul.f32 0.5, %v7979_v40 }
 0x438   : > { %v6337_v59 = vpop.eup %6336  ;;  %v2636_v51 = vmul.f32 %v2572_v50, %v7995_v4  ;;  %v2698_v22 = vadd.f32 %v2697_v39, %v2635_v31  ;;  %v2510_v63 = vmul.f32 0.5, %v6335_v54  ;;  %6350 = vtanh.f32 %v1581_v43  ;;  %v8063_v25 = vpop.f32.mrb[24].mxu1 }
 0x439   : > { %v2575_v0 = vadd.f32 0.5, %v2511_v45  ;;  %v1704_v3 = vmul.f32 0.5, %v6337_v59  ;;  %6352 = vtanh.f32 %v2389_v52  ;;  %v8065_v8 = vpop.f32.mrb[24].mxu0  ;;  %v6339_v58 = vpop.eup %6338  ;;  %v1582_v18 = vmul.f32 0.5, %v7984_v46 }
 0x43a   : > { %v2699_v10 = vadd.f32 %v2698_v22, %v2636_v51  ;;  %v2574_v1 = vadd.f32 0.5, %v2510_v63  ;;  %6354 = vtanh.f32 %v1580_v23  ;;  %v8068_v20 = vpop.f32.mrb[25].mxu1  ;;  %v8070_v4 = vpop.f32.mrb[25].mxu0  ;;  %v2513_v33 = vmul.f32 0.5, %v6339_v58 }
 0x43b   : > { %v6341_v21 = vpop.eup %6340  ;;  %v2639_v6 = vmul.f32 %v8002_v24, %v2575_v0  ;;  %v1768_v31 = vadd.f32 0.5, %v1704_v3  ;;  %6356 = vtanh.f32 %v2388_v57  ;;  %v1585_v41 = vmul.f32 0.5, %v7992_v62 }
 0x43c   : > { %v2638_v30 = vmul.f32 %v2574_v1, %v8008_v32  ;;  %v2700_v26 = vadd.f32 %v2699_v10, %v2637_v56  ;;  %v2512_v35 = vmul.f32 0.5, %v6341_v21  ;;  %6358 = vtanh.f32 %v1583_v2  ;;  %v8076_v42 = vpop.f32.mrb[26].mxu1  ;;  %v8078_v43 = vpop.f32.mrb[26].mxu0 }
 0x43d   : > { %v2577_v38 = vadd.f32 0.5, %v2513_v33  ;;  %v1832_v34 = vmul.f32 %v1768_v31, %v7944_v36  ;;  %6360 = vtanh.f32 %v1582_v18  ;;  %v6343_v23 = vpop.eup %6342  ;;  %v2391_v39 = vmul.f32 0.5, %v8063_v25  ;;  %v8082_v50 = vpop.f32.mrb[27].mxu1 }
 0x43e   : > { %v2701_v24 = vadd.f32 %v2700_v26, %v2638_v30  ;;  %v2576_v37 = vadd.f32 0.5, %v2512_v35  ;;  %v1584_v32 = vmul.f32 0.5, %v7997_v5  ;;  %v8084_v52 = vpop.f32.mrb[27].mxu0  ;;  %v2515_v56 = vmul.f32 0.5, %v6343_v23 }
 0x43f   : > { %v6345_v54 = vpop.eup %6344  ;;  %v2641_v36 = vmul.f32 %v8016_v15, %v2577_v38  ;;  %v1895_v45 = vadd.f32 %v8034_v9, %v1832_v34  ;;  %6362 = vtanh.f32 %v1585_v41  ;;  %v2390_v21 = vmul.f32 0.5, %v8068_v20 }
 0x440   : > { %v6347_v57 = vpop.eup %6346  ;;  %v2640_v59 = vmul.f32 %v2576_v37, %v8021_v60  ;;  %v2702_v51 = vadd.f32 %v2701_v24, %v2639_v6  ;;  %v2514_v22 = vmul.f32 0.5, %v6345_v54  ;;  %6364 = vtanh.f32 %v2391_v39  ;;  %v8090_v58 = vpop.f32.mrb[28].mxu1 }
 0x441   : > { %v6349_v63 = vpop.eup %6348  ;;  %v2579_v0 = vadd.f32 0.5, %v2515_v56  ;;  %v1707_v3 = vmul.f32 0.5, %v6347_v57  ;;  %v1896_v2 = vadd.f32 %v1895_v45, %v8030_v12  ;;  %6366 = vtanh.f32 %v1584_v32  ;;  %v8092_v10 = vpop.f32.mrb[28].mxu0 }
 0x442   : > { %v6351_v15 = vpop.eup %6350  ;;  %v2703_v1 = vadd.f32 %v2702_v51, %v2640_v59  ;;  %v2578_v9 = vadd.f32 0.5, %v2514_v22  ;;  %v1706_v18 = vmul.f32 0.5, %v6349_v63  ;;  %v8095_v60 = vpop.f32.mrb[29].mxu1  ;;  %v1587_v12 = vmul.f32 0.5, %v8005_v29 }
 0x443   : > { %v8097_v6 = vpop.f32.mrb[29].mxu0  ;;  %v6353_v33 = vpop.eup %6352  ;;  %v1771_v31 = vadd.f32 0.5, %v1707_v3  ;;  %v1709_v30 = vmul.f32 0.5, %v6351_v15  ;;  %v2643_v24 = vmul.f32 %v8032_v47, %v2579_v0  ;;  %6368 = vtanh.f32 %v2390_v21 }
 0x444   : > { %v6355_v26 = vpop.eup %6354  ;;  %v2642_v35 = vmul.f32 %v2578_v9, %v8039_v13  ;;  %v2704_v38 = vadd.f32 %v2703_v1, %v2641_v36  ;;  %v1770_v34 = vadd.f32 0.5, %v1706_v18  ;;  %v2517_v41 = vmul.f32 0.5, %v6353_v33  ;;  %v8102_v32 = vpop.f32.mrb[30].mxu1 }
 0x445   : > { %v6357_v23 = vpop.eup %6356  ;;  %v1773_v37 = vadd.f32 0.5, %v1709_v30  ;;  %v1708_v39 = vmul.f32 0.5, %v6355_v26  ;;  %v8104_v54 = vpop.f32.mrb[30].mxu0  ;;  %v1835_v57 = vmul.f32 %v7952_v48, %v1771_v31  ;;  %6370 = vtanh.f32 %v1587_v12 }
 0x446   : > { %v6359_v56 = vpop.eup %6358  ;;  %v2705_v45 = vadd.f32 %v2704_v38, %v2642_v35  ;;  %v1834_v59 = vmul.f32 %v1770_v34, %v7957_v53  ;;  %v2516_v13 = vmul.f32 0.5, %v6357_v23  ;;  %v8108_v36 = vpop.f32.mrb[31].mxu1  ;;  %v2581_v47 = vadd.f32 0.5, %v2517_v41 }
 0x447   : > { %v8110_v51 = vpop.f32.mrb[31].mxu0  ;;  %v6361_v22 = vpop.eup %6360  ;;  %v1772_v63 = vadd.f32 0.5, %v1708_v39  ;;  %v1711_v0 = vmul.f32 0.5, %v6359_v56  ;;  %v1837_v15 = vmul.f32 %v7965_v7, %v1773_v37  ;;  %v1586_v33 = vmul.f32 0.5, %v8010_v14 }
 0x448   : > { %v1897_v3 = vadd.f32 %v1896_v2, %v1834_v59  ;;  %v2580_v1 = vadd.f32 0.5, %v2516_v13  ;;  %v2706_v9 = vadd.f32 %v2705_v45, %v2643_v24  ;;  %v1710_v53 = vmul.f32 0.5, %v6361_v22  ;;  %v8115_v31 = vpop.f32.mrb[32].mxu1  ;;  %v8117_v30 = vpop.f32.mrb[32].mxu0 }
 0x449   : > { %v6363_v18 = vpop.eup %6362  ;;  %v1836_v48 = vmul.f32 %v1772_v63, %v7971_v16  ;;  %v1775_v21 = vadd.f32 0.5, %v1711_v0  ;;  %v1589_v7 = vmul.f32 0.5, %v8018_v55  ;;  %v8121_v38 = vpop.f32.mrb[33].mxu1  ;;  %6372 = vtanh.f32 %v1586_v33 }
 0x44a   : > { %v6365_v26 = vpop.eup %6364  ;;  %v1898_v35 = vadd.f32 %v1897_v3, %v1835_v57  ;;  %v2644_v12 = vmul.f32 %v2580_v1, %v8055_v44  ;;  %v1713_v2 = vmul.f32 0.5, %v6363_v18  ;;  %v8123_v34 = vpop.f32.mrb[33].mxu0  ;;  %v1774_v41 = vadd.f32 0.5, %v1710_v53 }
 0x44b   : > { %v6367_v16 = vpop.eup %6366  ;;  %v2519_v23 = vmul.f32 0.5, %v6365_v26  ;;  %v2645_v24 = vmul.f32 %v8049_v17, %v2581_v47  ;;  %6374 = vtanh.f32 %v1589_v7  ;;  %v2393_v44 = vmul.f32 0.5, %v8076_v42 }
 0x44c   : > { %v1899_v37 = vadd.f32 %v1898_v35, %v1836_v48  ;;  %v2707_v39 = vadd.f32 %v2706_v9, %v2644_v12  ;;  %v1712_v56 = vmul.f32 0.5, %v6367_v16  ;;  %v1838_v45 = vmul.f32 %v1774_v41, %v7984_v46  ;;  %v8128_v59 = vpop.f32.mrb[34].mxu0  ;;  %v8130_v13 = vpop.f32.mrb[34].mxu1 }
 0x44d   : > { %v1777_v57 = vadd.f32 0.5, %v1713_v2  ;;  %v1839_v22 = vmul.f32 %v7979_v40, %v1775_v21  ;;  %v8133_v1 = vpop.f32.mrb[35].mxu0  ;;  %v8135_v17 = vpop.f32.mrb[35].mxu1  ;;  %v2583_v9 = vadd.f32 0.5, %v2519_v23  ;;  %6376 = vtanh.f32 %v2393_v44 }
 0x44e   : > { %v1900_v63 = vadd.f32 %v1899_v37, %v1837_v15  ;;  %v1776_v0 = vadd.f32 0.5, %v1712_v56  ;;  %v2708_v3 = vadd.f32 %v2707_v39, %v2645_v24  ;;  %v6369_v47 = vpop.eup %6368  ;;  %v1588_v46 = vmul.f32 0.5, %v8024_v27 }
 0x44f   : > { %v2392_v18 = vmul.f32 0.5, %v8082_v50  ;;  %v2518_v33 = vmul.f32 0.5, %v6369_v47  ;;  %v1591_v40 = vmul.f32 0.5, %v8036_v19  ;;  %v6371_v15 = vpop.eup %6370  ;;  %v1841_v21 = vmul.f32 %v7992_v62, %v1777_v57 }
 0x450   : > { %v1901_v48 = vadd.f32 %v1900_v63, %v1838_v45  ;;  %v1840_v53 = vmul.f32 %v1776_v0, %v7997_v5  ;;  %6378 = vtanh.f32 %v1588_v46  ;;  %v1590_v26 = vmul.f32 0.5, %v8042_v28  ;;  %v8144_v12 = vpop.f32.mrb[36].mxu0  ;;  %v8146_v2 = vpop.f32.mrb[36].mxu1 }
 0x451   : > { %v1593_v35 = vmul.f32 0.5, %v8052_v49  ;;  %v2582_v16 = vadd.f32 0.5, %v2518_v33  ;;  %v1715_v41 = vmul.f32 0.5, %v6371_v15  ;;  %6380 = vtanh.f32 %v2392_v18  ;;  %v8148_v5 = vpop.f32.mrb[37].mxu0  ;;  %v8150_v23 = vpop.f32.mrb[37].mxu1 }
 0x452   : > { %v1902_v7 = vadd.f32 %v1901_v48, %v1839_v22  ;;  %6382 = vtanh.f32 %v1591_v40  ;;  %v2395_v62 = vmul.f32 0.5, %v8090_v58  ;;  %v1592_v39 = vmul.f32 0.5, %v8057_v11 }
 0x453   : > { %v2646_v37 = vmul.f32 %v2582_v16, %v8068_v20  ;;  %6384 = vtanh.f32 %v1590_v26  ;;  %v6373_v56 = vpop.eup %6372  ;;  %v2647_v45 = vmul.f32 %v8063_v25, %v2583_v9  ;;  %v2394_v57 = vmul.f32 0.5, %v8095_v60 }
 0x454   : > { %v1903_v24 = vadd.f32 %v1902_v7, %v1840_v53  ;;  %6386 = vtanh.f32 %v1593_v35  ;;  %v1595_v44 = vmul.f32 0.5, %v8065_v8  ;;  %v8158_v22 = vpop.f32.mrb[38].mxu0  ;;  %v8160_v63 = vpop.f32.mrb[38].mxu1  ;;  %v1779_v47 = vadd.f32 0.5, %v1715_v41 }
 0x455   : > { %v2709_v0 = vadd.f32 %v2708_v3, %v2646_v37  ;;  %v1714_v46 = vmul.f32 0.5, %v6373_v56  ;;  %v8162_v20 = vpop.f32.mrb[39].mxu0  ;;  %v8164_v48 = vpop.f32.mrb[39].mxu1  ;;  %6388 = vtanh.f32 %v2395_v62  ;;  %v1594_v25 = vmul.f32 0.5, %v8070_v4 }
 0x456   : > { %v1904_v18 = vadd.f32 %v1903_v24, %v1841_v21  ;;  %9649 = vst [vmem:[#allocation14_spill] sm:$0xff] %v8164_v48  ;;  %v6375_v53 = vpop.eup %6374  ;;  %6390 = vtanh.f32 %v1592_v39  ;;  %v1597_v26 = vmul.f32 0.5, %v8078_v43  ;;  %v1843_v21 = vmul.f32 %v8005_v29, %v1779_v47 }
 0x457   : > { %v1778_v9 = vadd.f32 0.5, %v1714_v46  ;;  %v1717_v33 = vmul.f32 0.5, %v6375_v53  ;;  %v2710_v40 = vadd.f32 %v2709_v0, %v2647_v45  ;;  %v6377_v15 = vpop.eup %6376  ;;  %6392 = vtanh.f32 %v2394_v57 }
 0x458   : > { %v8168_v3 = vpop.f32.mrb[40].mxu0  ;;  %v8170_v35 = vpop.f32.mrb[40].mxu1  ;;  %v2521_v16 = vmul.f32 0.5, %v6377_v15  ;;  %6394 = vtanh.f32 %v1595_v44  ;;  %v2397_v39 = vmul.f32 0.5, %v8102_v32  ;;  %v1596_v56 = vmul.f32 0.5, %v8084_v52 }
 0x459   : > { %9650 = vst [vmem:[#allocation15_spill] sm:$0xff] %v8168_v3  ;;  %9651 = vst [vmem:[#allocation16_spill] sm:$0xff] %v8170_v35  ;;  %v1842_v7 = vmul.f32 %v1778_v9, %v8010_v14  ;;  %v8174_v41 = vpop.f32.mrb[41].mxu0  ;;  %v8176_v62 = vpop.f32.mrb[41].mxu1  ;;  %v1781_v37 = vadd.f32 0.5, %v1717_v33  ;;  %6396 = vtanh.f32 %v1594_v25  ;;  %v2396_v29 = vmul.f32 0.5, %v8108_v36 }
 0x45a   : > { %9652 = vst [vmem:[#allocation17_spill] sm:$0xff] %v8174_v41  ;;  %9653 = vst [vmem:[#allocation18_spill] sm:$0xff] %v8176_v62  ;;  %v6379_v24 = vpop.eup %6378  ;;  %v1599_v14 = vmul.f32 0.5, %v8092_v10  ;;  %6398 = vtanh.f32 %v1597_v26  ;;  %v1598_v46 = vmul.f32 0.5, %v8097_v6  ;;  %v1601_v53 = vmul.f32 0.5, %v8104_v54 }
 0x45b   : > { %v6381_v45 = vpop.eup %6380  ;;  %v1905_v57 = vadd.f32 %v1904_v18, %v1842_v7  ;;  %v1716_v0 = vmul.f32 0.5, %v6379_v24  ;;  %v2585_v15 = vadd.f32 0.5, %v2521_v16  ;;  %v1845_v26 = vmul.f32 %v8018_v55, %v1781_v37 }
 0x45c   : > { %v6383_v47 = vpop.eup %6382  ;;  %v2520_v44 = vmul.f32 0.5, %v6381_v45  ;;  %v8184_v9 = vpop.f32.mrb[42].mxu0  ;;  %6400 = vtanh.f32 %v2397_v39 }
 0x45d   : > { %9654 = vst [vmem:[#allocation19_spill] sm:$0xff] %v8184_v9  ;;  %v8186_v25 = vpop.f32.mrb[42].mxu1  ;;  %v6385_v33 = vpop.eup %6384  ;;  %v1780_v61 = vadd.f32 0.5, %v1716_v0  ;;  %v1906_v18 = vadd.f32 %v1905_v57, %v1843_v21  ;;  %v1719_v7 = vmul.f32 0.5, %v6383_v47  ;;  %6402 = vtanh.f32 %v1596_v56 }
 0x45e   : > { %9655 = vst [vmem:[#allocation20_spill] sm:$0xff] %v8186_v25  ;;  %v8188_v24 = vpop.f32.mrb[43].mxu0  ;;  %v8190_v62 = vpop.f32.mrb[43].mxu1  ;;  %v2584_v45 = vadd.f32 0.5, %v2520_v44  ;;  %v1718_v35 = vmul.f32 0.5, %v6385_v33  ;;  %6404 = vtanh.f32 %v2396_v29  ;;  %v2399_v57 = vmul.f32 0.5, %v8115_v31 }
 0x45f   : > { %v6387_v41 = vpop.eup %6386  ;;  %v1844_v3 = vmul.f32 %v1780_v61, %v8024_v27  ;;  %v1783_v9 = vadd.f32 0.5, %v1719_v7  ;;  %v2649_v37 = vmul.f32 %v8076_v42, %v2585_v15  ;;  %6406 = vtanh.f32 %v1599_v14 }
 0x460   : > { %v1721_v48 = vmul.f32 0.5, %v6387_v41  ;;  %v6389_v25 = vpop.eup %6388  ;;  %v2648_v16 = vmul.f32 %v2584_v45, %v8082_v50  ;;  %v1782_v21 = vadd.f32 0.5, %v1718_v35  ;;  %v8196_v0 = vpop.f32.mrb[44].mxu0  ;;  %v1600_v42 = vmul.f32 0.5, %v8110_v51 }
 0x461   : > { %v8198_v47 = vpop.f32.mrb[44].mxu1  ;;  %v6391_v55 = vpop.eup %6390  ;;  %v1907_v39 = vadd.f32 %v1906_v18, %v1844_v3  ;;  %v2523_v61 = vmul.f32 0.5, %v6389_v25  ;;  %v1847_v7 = vmul.f32 %v8036_v19, %v1783_v9  ;;  %6408 = vtanh.f32 %v1598_v46 }
 0x462   : > { %9656 = vst [vmem:[#allocation21_spill] sm:$0xff] %v8198_v47  ;;  %v1785_v44 = vadd.f32 0.5, %v1721_v48  ;;  %v8201_v27 = vpop.f32.mrb[45].mxu0  ;;  %v8203_v41 = vpop.f32.mrb[45].mxu1  ;;  %v2711_v50 = vadd.f32 %v2710_v40, %v2648_v16  ;;  %v1846_v35 = vmul.f32 %v1782_v21, %v8042_v28  ;;  %v1720_v29 = vmul.f32 0.5, %v6391_v55 }
 0x463   : > { %9657 = vst [vmem:[#allocation22_spill] sm:$0xff] %v8203_v41  ;;  %v6393_v56 = vpop.eup %6392  ;;  %v1908_v45 = vadd.f32 %v1907_v39, %v1845_v26  ;;  %v2587_v28 = vadd.f32 0.5, %v2523_v61  ;;  %6410 = vtanh.f32 %v1601_v53  ;;  %v1603_v61 = vmul.f32 0.5, %v8117_v30 }
 0x464   : > { %v6395_v33 = vpop.eup %6394  ;;  %v2522_v47 = vmul.f32 0.5, %v6393_v56  ;;  %v1784_v48 = vadd.f32 0.5, %v1720_v29  ;;  %v2712_v25 = vadd.f32 %v2711_v50, %v2649_v37  ;;  %v8208_v18 = vpop.f32.mrb[46].mxu0  ;;  %v1849_v26 = vmul.f32 %v8052_v49, %v1785_v44 }
 0x465   : > { %v6397_v3 = vpop.eup %6396  ;;  %v1723_v15 = vmul.f32 0.5, %v6395_v33  ;;  %v8210_v41 = vpop.f32.mrb[46].mxu1  ;;  %v1909_v40 = vadd.f32 %v1908_v45, %v1846_v35  ;;  %6412 = vtanh.f32 %v2399_v57  ;;  %v1602_v29 = vmul.f32 0.5, %v8123_v34 }
 0x466   : > { %9658 = vst [vmem:[#allocation23_spill] sm:$0xff] %v8210_v41  ;;  %v2586_v16 = vadd.f32 0.5, %v2522_v47  ;;  %v1722_v14 = vmul.f32 0.5, %v6397_v3  ;;  %v8212_v21 = vpop.f32.mrb[47].mxu0  ;;  %v8214_v19 = vpop.f32.mrb[47].mxu1  ;;  %v1848_v55 = vmul.f32 %v1784_v48, %v8057_v11  ;;  %v2398_v47 = vmul.f32 0.5, %v8121_v38 }
 0x467   : > { %9659 = vst [vmem:[#allocation24_spill] sm:$0xff] %v8214_v19  ;;  %v6399_v9 = vpop.eup %6398  ;;  %v1787_v37 = vadd.f32 0.5, %v1723_v15  ;;  %v1910_v46 = vadd.f32 %v1909_v40, %v1847_v7  ;;  %v2651_v53 = vmul.f32 %v8090_v58, %v2587_v28  ;;  %6414 = vtanh.f32 %v1600_v42 }
 0x468   : > { %v2650_v39 = vmul.f32 %v2586_v16, %v8095_v60  ;;  %v1786_v56 = vadd.f32 0.5, %v1722_v14  ;;  %v1725_v50 = vmul.f32 0.5, %v6399_v9  ;;  %v6401_v35 = vpop.eup %6400  ;;  %v8222_v33 = vpop.f32.mrb[48].mxu0  ;;  %6416 = vtanh.f32 %v2398_v47 }
 0x469   : > { %9660 = vst [vmem:[#allocation25_spill] sm:$0xff] %v8222_v33  ;;  %v8224_v49 = vpop.f32.mrb[48].mxu1  ;;  %v6403_v11 = vpop.eup %6402  ;;  %v1911_v44 = vadd.f32 %v1910_v46, %v1848_v55  ;;  %v2525_v15 = vmul.f32 0.5, %v6401_v35  ;;  %v1851_v16 = vmul.f32 %v8065_v8, %v1787_v37  ;;  %6418 = vtanh.f32 %v1603_v61 }
 0x46a   : > { %9661 = vst [vmem:[#allocation26_spill] sm:$0xff] %v8224_v49  ;;  %v2713_v7 = vadd.f32 %v2712_v25, %v2650_v39  ;;  %v1850_v60 = vmul.f32 %v1786_v56, %v8070_v4  ;;  %v8228_v45 = vpop.f32.mrb[49].mxu0  ;;  %v8230_v57 = vpop.f32.mrb[49].mxu1  ;;  %v1789_v48 = vadd.f32 0.5, %v1725_v50  ;;  %v1724_v40 = vmul.f32 0.5, %v6403_v11 }
 0x46b   : > { %v6405_v3 = vpop.eup %6404  ;;  %v1912_v14 = vadd.f32 %v1911_v44, %v1849_v26  ;;  %v2589_v58 = vadd.f32 0.5, %v2525_v15  ;;  %v1605_v4 = vmul.f32 0.5, %v8128_v59  ;;  %6420 = vtanh.f32 %v1602_v29 }
 0x46c   : > { %v2524_v9 = vmul.f32 0.5, %v6405_v3  ;;  %v2714_v49 = vadd.f32 %v2713_v7, %v2651_v53  ;;  %v6407_v33 = vpop.eup %6406  ;;  %v1788_v28 = vadd.f32 0.5, %v1724_v40  ;;  %v8234_v25 = vpop.f32.mrb[50].mxu0  ;;  %v1853_v37 = vmul.f32 %v8078_v43, %v1789_v48 }
 0x46d   : > { %v8236_v55 = vpop.f32.mrb[50].mxu1  ;;  %v1913_v46 = vadd.f32 %v1912_v14, %v1850_v60  ;;  %v1727_v56 = vmul.f32 0.5, %v6407_v33  ;;  %v8238_v42 = vpop.f32.mrb[51].mxu0  ;;  %v2401_v35 = vmul.f32 0.5, %v8130_v13  ;;  %6422 = vtanh.f32 %v1605_v4  ;;  %v2766_v4 = vld [vmem:[%s7326_s13 + $0xb0] sm:$0xff] }
 0x46e   : > { %v2588_v39 = vadd.f32 0.5, %v2524_v9  ;;  %v8240_v8 = vpop.f32.mrb[51].mxu1  ;;  %v6409_v26 = vpop.eup %6408  ;;  %v1852_v50 = vmul.f32 %v1788_v28, %v8084_v52  ;;  %v1604_v61 = vmul.f32 0.5, %v8133_v1  ;;  %v2653_v43 = vmul.f32 %v8102_v32, %v2589_v58 }
 0x46f   : > { %v1914_v47 = vadd.f32 %v1913_v46, %v1851_v16  ;;  %v1791_v53 = vadd.f32 0.5, %v1727_v56  ;;  %v1726_v44 = vmul.f32 0.5, %v6409_v26  ;;  %v6411_v7 = vpop.eup %6410  ;;  %6424 = vtanh.f32 %v2401_v35 }
 0x470   : > { %v2652_v11 = vmul.f32 %v2588_v39, %v8108_v36  ;;  %v8247_v33 = vpop.f32.mrb[52].mxu0  ;;  %v8249_v60 = vpop.f32.mrb[52].mxu1  ;;  %v1729_v16 = vmul.f32 0.5, %v6411_v7  ;;  %v2400_v14 = vmul.f32 0.5, %v8135_v17  ;;  %6426 = vtanh.f32 %v1604_v61 }
 0x471   : > { %9662 = vst [vmem:[#allocation27_spill] sm:$0xff] %v8247_v33  ;;  %9663 = vst [vmem:[#allocation28_spill] sm:$0xff] %v8249_v60  ;;  %v1915_v52 = vadd.f32 %v1914_v47, %v1852_v50  ;;  %v1790_v3 = vadd.f32 0.5, %v1726_v44  ;;  %v8252_v48 = vpop.f32.mrb[53].mxu0  ;;  %v8254_v36 = vpop.f32.mrb[53].mxu1  ;;  %v1855_v40 = vmul.f32 %v8092_v10, %v1791_v53  ;;  %v1607_v39 = vmul.f32 0.5, %v8144_v12 }
 0x472   : > { %v2715_v29 = vadd.f32 %v2714_v49, %v2652_v11  ;;  %9664 = vst [vmem:[#allocation29_spill] sm:$0xff] %v8252_v48  ;;  %9665 = vst [vmem:[#allocation30_spill] sm:$0xff] %v8254_v36  ;;  %v6413_v15 = vpop.eup %6412  ;;  %v2767_v49 = vld [vmem:[%s7326_s13 + $0xb8] sm:$0xff]  ;;  %v1793_v50 = vadd.f32 0.5, %v1729_v16  ;;  %v2403_v47 = vmul.f32 0.5, %v8146_v2  ;;  %6428 = vtanh.f32 %v2400_v14 }
 0x473   : > { %v1854_v28 = vmul.f32 %v1790_v3, %v8097_v6  ;;  %v1916_v32 = vadd.f32 %v1915_v52, %v1853_v37  ;;  %v2527_v58 = vmul.f32 0.5, %v6413_v15  ;;  %v6415_v46 = vpop.eup %6414  ;;  %v1606_v44 = vmul.f32 0.5, %v8148_v5 }
 0x474   : > { %v8258_v9 = vadd.f32 %v2715_v29, %v2653_v43  ;;  %v8264_v56 = vpop.f32.mrb[54].mxu0  ;;  %v8266_v26 = vpop.f32.mrb[54].mxu1  ;;  %v1728_v35 = vmul.f32 0.5, %v6415_v46  ;;  %v6120_v7 = vpack.c.bf16 %v2767_v49, %v2766_v4  ;;  %v2402_v29 = vmul.f32 0.5, %v8150_v23 }
 0x475   : > { %9667 = vst [vmem:[#allocation32_spill] sm:$0xff] %v8264_v56  ;;  %9668 = vst [vmem:[#allocation33_spill] sm:$0xff] %v8266_v26  ;;  %v1917_v10 = vadd.f32 %v1916_v32, %v1854_v28  ;;  %v8269_v11 = vpop.f32.mrb[55].mxu0  ;;  %v8271_v6 = vpop.f32.mrb[55].mxu1  ;;  %v2591_v53 = vadd.f32 0.5, %v2527_v58  ;;  %v1609_v3 = vmul.f32 0.5, %v8158_v22  ;;  %6430 = vtanh.f32 %v1607_v39 }
 0x476   : > { %9666 = vst [vmem:[#allocation31_spill] sm:$0xff] %v8258_v9  ;;  %9669 = vst [vmem:[#allocation34_spill] sm:$0xff] %v8269_v11  ;;  %v6417_v37 = vpop.eup %6416  ;;  %v1792_v43 = vadd.f32 0.5, %v1728_v35  ;;  %v2405_v32 = vmul.f32 0.5, %v8160_v63  ;;  %6121 = vmatpush3.bf16.msra.mxu0 %v6120_v7  ;;  %v1857_v58 = vmul.f32 %v8104_v54, %v1793_v50  ;;  %6432 = vtanh.f32 %v2403_v47  ;;  %v9687_v11 = vld [vmem:[#allocation20_spill] sm:$0xff] }
 0x477   : > { %9670 = vst [vmem:[#allocation35_spill] sm:$0xff] %v8271_v6  ;;  %v6419_v61 = vpop.eup %6418  ;;  %v1918_v52 = vadd.f32 %v1917_v10, %v1855_v40  ;;  %v2526_v16 = vmul.f32 0.5, %v6417_v37  ;;  %v9673_v49 = vmov 0.0|0.0   ;;  %v2655_v37 = vmul.f32 %v8115_v31, %v2591_v53 }
 0x478   : > { %v6421_v15 = vpop.eup %6420  ;;  %v1731_v28 = vmul.f32 0.5, %v6419_v61  ;;  %v8277_v46 = vpop.f32.mrb[56].mxu0  ;;  %v1856_v4 = vmul.f32 %v1792_v43, %v8110_v51  ;;  %6122 = vmatprep.subr.bf16.mxu0 %v9673_v49  ;;  %6434 = vtanh.f32 %v1606_v44  ;;  %v1608_v54 = vmul.f32 0.5, %v8162_v20  ;;  %v9676_v43 = vld [vmem:[#allocation14_spill] sm:$0xff]  ;;  %v9680_v44 = vld [vmem:[#allocation15_spill] sm:$0xff] }
 0x479   : > { %9671 = vst [vmem:[#allocation36_spill] sm:$0xff] %v8277_v46  ;;  %v8279_v14 = vpop.f32.mrb[56].mxu1  ;;  %v1730_v40 = vmul.f32 0.5, %v6421_v15  ;;  %v8284_v10 = vpop.f32.mrb[57].mxu0  ;;  %v2590_v7 = vadd.f32 0.5, %v2526_v16  ;;  %6436 = vtanh.f32 %v2402_v29  ;;  %v2404_v15 = vmul.f32 0.5, %v9676_v43 }
 0x47a   : > { %9672 = vst [vmem:[#allocation37_spill] sm:$0xff] %v8279_v14  ;;  %9674 = vst [vmem:[#allocation38_spill] sm:$0xff] %v8284_v10  ;;  %v8286_v35 = vpop.f32.mrb[57].mxu1  ;;  %v6423_v39 = vpop.eup %6422  ;;  %v1795_v61 = vadd.f32 0.5, %v1731_v28  ;;  %v1919_v9 = vadd.f32 %v1918_v52, %v1856_v4  ;;  %v1611_v52 = vmul.f32 0.5, %v9680_v44  ;;  %v9681_v16 = vld [vmem:[#allocation16_spill] sm:$0xff]  ;;  %6438 = vtanh.f32 %v1609_v3 }
 0x47b   : > { %9675 = vst [vmem:[#allocation39_spill] sm:$0xff] %v8286_v35  ;;  %v1794_v14 = vadd.f32 0.5, %v1730_v40  ;;  %v1733_v46 = vmul.f32 0.5, %v6423_v39  ;;  %v6425_v51 = vpop.eup %6424  ;;  %v2654_v50 = vmul.f32 %v2590_v7, %v8121_v38  ;;  %v2407_v28 = vmul.f32 0.5, %v9681_v16 }
 0x47c   : > { %v1859_v47 = vmul.f32 %v8117_v30, %v1795_v61  ;;  %v8293_v35 = vpop.f32.mrb[58].mxu0  ;;  %v8295_v10 = vpop.f32.mrb[58].mxu1  ;;  %v8297_v31 = vadd.f32 %v1919_v9, %v1857_v58  ;;  %v2529_v39 = vmul.f32 0.5, %v6425_v51  ;;  %v9685_v58 = vld [vmem:[#allocation18_spill] sm:$0xff]  ;;  %6440 = vtanh.f32 %v2405_v32 }
 0x47d   : > { %9677 = vst [vmem:[#allocation14_spill] sm:$0xff] %v8293_v35  ;;  %9678 = vst [vmem:[#allocation40_spill] sm:$0xff] %v8295_v10  ;;  %v1858_v53 = vmul.f32 %v1794_v14, %v8123_v34  ;;  %v8302_v4 = vpop.f32.mrb[59].mxu0  ;;  %v8304_v38 = vpop.f32.mrb[59].mxu1  ;;  %v2723_v29 = vadd.f32 %v2655_v37, %v2654_v50  ;;  %v1797_v40 = vadd.f32 0.5, %v1733_v46  ;;  %v9684_v10 = vld [vmem:[#allocation17_spill] sm:$0xff]  ;;  %6442 = vtanh.f32 %v1608_v54 }
 0x47e   : > { %9679 = vst [vmem:[#allocation41_spill] sm:$0xff] %v8297_v31  ;;  %9682 = vst [vmem:[#allocation15_spill] sm:$0xff] %v8302_v4  ;;  %v6427_v30 = vpop.eup %6426  ;;  %v1610_v9 = vmul.f32 0.5, %v9684_v10  ;;  %v2406_v31 = vmul.f32 0.5, %v9685_v58  ;;  %v2593_v14 = vadd.f32 0.5, %v2529_v39  ;;  %v9686_v35 = vld [vmem:[#allocation19_spill] sm:$0xff]  ;;  %6444 = vtanh.f32 %v2404_v15 }
 0x47f   : > { %9683 = vst [vmem:[#allocation16_spill] sm:$0xff] %v8304_v38  ;;  %v1927_v7 = vadd.f32 %v1859_v47, %v1858_v53  ;;  %v1732_v61 = vmul.f32 0.5, %v6427_v30  ;;  %v6429_v34 = vpop.eup %6428  ;;  %v1613_v6 = vmul.f32 0.5, %v9686_v35  ;;  %v2409_v4 = vmul.f32 0.5, %v9687_v11  ;;  %v9692_v54 = vld [vmem:[#allocation21_spill] sm:$0xff] }
 0x480   : > { %v8310_v26 = vpop.f32.mrb[60].mxu0  ;;  %v8312_v38 = vpop.f32.mrb[60].mxu1  ;;  %v2528_v37 = vmul.f32 0.5, %v6429_v34  ;;  %v1612_v3 = vmul.f32 0.5, %v8188_v24  ;;  %v1861_v32 = vmul.f32 %v8128_v59, %v1797_v40  ;;  %v2408_v53 = vmul.f32 0.5, %v8190_v62 }
 0x481   : > { %9688 = vst [vmem:[#allocation17_spill] sm:$0xff] %v8310_v26  ;;  %9689 = vst [vmem:[#allocation18_spill] sm:$0xff] %v8312_v38  ;;  %v1796_v46 = vadd.f32 0.5, %v1732_v61  ;;  %v8315_v51 = vpop.f32.mrb[61].mxu0  ;;  %v8317_v50 = vpop.f32.mrb[61].mxu1  ;;  %v1615_v30 = vmul.f32 0.5, %v8196_v0  ;;  %6446 = vtanh.f32 %v1611_v52 }
 0x482   : > { %9690 = vst [vmem:[#allocation19_spill] sm:$0xff] %v8315_v51  ;;  %9691 = vst [vmem:[#allocation20_spill] sm:$0xff] %v8317_v50  ;;  %v6431_v47 = vpop.eup %6430  ;;  %v2592_v61 = vadd.f32 0.5, %v2528_v37  ;;  %v2411_v26 = vmul.f32 0.5, %v9692_v54  ;;  %v2657_v51 = vmul.f32 %v8130_v13, %v2593_v14  ;;  %v1614_v50 = vmul.f32 0.5, %v8201_v27 }
 0x483   : > { %v6433_v39 = vpop.eup %6432  ;;  %v1860_v38 = vmul.f32 %v1796_v46, %v8133_v1  ;;  %v1735_v34 = vmul.f32 0.5, %v6431_v47  ;;  %v9695_v1 = vld [vmem:[#allocation22_spill] sm:$0xff]  ;;  %6448 = vtanh.f32 %v2407_v28  ;;  %v1617_v52 = vmul.f32 0.5, %v8208_v18 }
 0x484   : > { %v6435_v56 = vpop.eup %6434  ;;  %v2531_v36 = vmul.f32 0.5, %v6433_v39  ;;  %v8326_v59 = vpop.f32.mrb[62].mxu0  ;;  %v2656_v48 = vmul.f32 %v2592_v61, %v8135_v17  ;;  %v2410_v46 = vmul.f32 0.5, %v9695_v1  ;;  %v8341_v17 = vmul.f32 0.5, %v8212_v21 }
 0x485   : > { %9693 = vst [vmem:[#allocation21_spill] sm:$0xff] %v8326_v59  ;;  %v8328_v15 = vpop.f32.mrb[62].mxu1  ;;  %v1928_v40 = vadd.f32 %v1927_v7, %v1860_v38  ;;  %v1799_v60 = vadd.f32 0.5, %v1735_v34  ;;  %v8332_v37 = vpop.f32.mrb[63].mxu0  ;;  %v1734_v14 = vmul.f32 0.5, %v6435_v56  ;;  %6450 = vtanh.f32 %v1610_v9 }
 0x486   : > { %9694 = vst [vmem:[#allocation42_spill] sm:$0xff] %v8328_v15  ;;  %9696 = vst [vmem:[#allocation22_spill] sm:$0xff] %v8332_v37  ;;  %v8334_v47 = vpop.f32.mrb[63].mxu1  ;;  %v6437_v33 = vpop.eup %6436  ;;  %v2595_v13 = vadd.f32 0.5, %v2531_v36  ;;  %v2724_v39 = vadd.f32 %v2723_v29, %v2656_v48  ;;  %v8338_v15 = vmul.f32 0.5, %v8210_v41  ;;  %v8344_v34 = vmul.f32 0.5, %v8214_v19 }
 0x487   : > { %9697 = vst [vmem:[#allocation43_spill] sm:$0xff] %v8334_v47  ;;  %v1929_v59 = vadd.f32 %v1928_v40, %v1861_v32  ;;  %v6439_v38 = vpop.eup %6438  ;;  %v1798_v7 = vadd.f32 0.5, %v1734_v14  ;;  %v2530_v61 = vmul.f32 0.5, %v6437_v33  ;;  %v1863_v36 = vmul.f32 %v8144_v12, %v1799_v60  ;;  %v9698_v33 = vld [vmem:[#allocation25_spill] sm:$0xff] }
 0x488   : > { %v2725_v56 = vadd.f32 %v2724_v39, %v2657_v51  ;;  %v1737_v28 = vmul.f32 0.5, %v6439_v38  ;;  %6452 = vtanh.f32 %v2406_v31  ;;  %v6441_v48 = vpop.eup %6440  ;;  %v2659_v29 = vmul.f32 %v8146_v2, %v2595_v13 }
 0x489   : > { %v1862_v32 = vmul.f32 %v1798_v7, %v8148_v5  ;;  %v2594_v40 = vadd.f32 0.5, %v2530_v61  ;;  %6454 = vtanh.f32 %v1613_v6  ;;  %v6443_v47 = vpop.eup %6442  ;;  %v2533_v14 = vmul.f32 0.5, %v6441_v48  ;;  %v9699_v5 = vld [vmem:[#allocation26_spill] sm:$0xff] }
 0x48a   : > { %v1801_v37 = vadd.f32 0.5, %v1737_v28  ;;  %6456 = vtanh.f32 %v2409_v4  ;;  %v8350_v9 = vmul.f32 0.5, %v9698_v33  ;;  %v6445_v41 = vpop.eup %6444  ;;  %v1736_v60 = vmul.f32 0.5, %v6443_v47  ;;  %v2769_v47 = vld [vmem:[%s7326_s13 + $0xc8] sm:$0xff] }
 0x48b   : > { %v1930_v19 = vadd.f32 %v1929_v59, %v1862_v32  ;;  %v2658_v12 = vmul.f32 %v2594_v40, %v8150_v23  ;;  %6458 = vtanh.f32 %v1612_v3  ;;  %v2597_v2 = vadd.f32 0.5, %v2533_v14  ;;  %v6447_v51 = vpop.eup %6446  ;;  %v2768_v59 = vld [vmem:[%s7326_s13 + $0xc0] sm:$0xff] }
 0x48c   : > { %v2532_v31 = vmul.f32 0.5, %v6445_v41  ;;  %6460 = vtanh.f32 %v2408_v53  ;;  %v8354_v6 = vmul.f32 0.5, %v9699_v5  ;;  %v1800_v4 = vadd.f32 0.5, %v1736_v60 }
 0x48d   : > { %v2726_v13 = vadd.f32 %v2725_v56, %v2658_v12  ;;  %v1931_v39 = vadd.f32 %v1930_v19, %v1863_v36  ;;  %6462 = vtanh.f32 %v1615_v30  ;;  %v1739_v7 = vmul.f32 0.5, %v6447_v51  ;;  %v6449_v3 = vpop.eup %6448 }
 0x48e   : > { %v2596_v38 = vadd.f32 0.5, %v2532_v31  ;;  %6464 = vtanh.f32 %v2411_v26  ;;  %v8357_v23 = vmul.f32 0.5, %v8228_v45  ;;  %v1865_v41 = vmul.f32 %v8158_v22, %v1801_v37 }
 0x48f   : > { %v1864_v53 = vmul.f32 %v1800_v4, %v8162_v20  ;;  %v2727_v61 = vadd.f32 %v2726_v13, %v2659_v29  ;;  %6466 = vtanh.f32 %v1614_v50  ;;  %v1803_v28 = vadd.f32 0.5, %v1739_v7  ;;  %v6451_v30 = vpop.eup %6450 }
 0x490   : > { %v2660_v56 = vmul.f32 %v2596_v38, %v9676_v43  ;;  %v2535_v19 = vmul.f32 0.5, %v6449_v3  ;;  %6468 = vtanh.f32 %v2410_v46  ;;  %v2661_v26 = vmul.f32 %v8160_v63, %v2597_v2 }
 0x491   : > { %v1932_v36 = vadd.f32 %v1931_v39, %v1864_v53  ;;  %6470 = vtanh.f32 %v1617_v52  ;;  %v6123_v48 = vpack.c.bf16 %v2769_v47, %v2768_v59  ;;  %v1738_v14 = vmul.f32 0.5, %v6451_v30 }
 0x492   : > { %v6453_v32 = vpop.eup %6452  ;;  %v2728_v40 = vadd.f32 %v2727_v61, %v2660_v56  ;;  %v8366_v22 = vmul.f32 0.5, %v8230_v57  ;;  %v8369_v20 = vmul.f32 0.5, %v8234_v25  ;;  %v1867_v43 = vmul.f32 %v9680_v44, %v1803_v28 }
 0x493   : > { %v6455_v50 = vpop.eup %6454  ;;  %v1933_v37 = vadd.f32 %v1932_v36, %v1865_v41  ;;  %v2534_v46 = vmul.f32 0.5, %v6453_v32  ;;  %6472 = vtanh.f32 %v8338_v15  ;;  %6124 = vmatpush3.bf16.msra.mxu0 %v6123_v48  ;;  %v2599_v52 = vadd.f32 0.5, %v2535_v19 }
 0x494   : > { %v6457_v63 = vpop.eup %6456  ;;  %v1802_v29 = vadd.f32 0.5, %v1738_v14  ;;  %v2729_v12 = vadd.f32 %v2728_v40, %v2661_v26  ;;  %v1741_v60 = vmul.f32 0.5, %v6455_v50  ;;  %6125 = vmatprep.subr.bf16.mxu0 %v9673_v49  ;;  %6474 = vtanh.f32 %v8341_v17 }
 0x495   : > { %v6459_v2 = vpop.eup %6458  ;;  %v2598_v31 = vadd.f32 0.5, %v2534_v46  ;;  %v2537_v51 = vmul.f32 0.5, %v6457_v63  ;;  %v8376_v13 = vmul.f32 0.5, %v8236_v55  ;;  %6476 = vtanh.f32 %v8344_v34 }
 0x496   : > { %v6461_v44 = vpop.eup %6460  ;;  %v1866_v4 = vmul.f32 %v1802_v29, %v9684_v10  ;;  %v1805_v15 = vadd.f32 0.5, %v1741_v60  ;;  %v1740_v39 = vmul.f32 0.5, %v6459_v2  ;;  %6478 = vtanh.f32 %v8350_v9 }
 0x497   : > { %v6463_v38 = vpop.eup %6462  ;;  %v2662_v7 = vmul.f32 %v2598_v31, %v9685_v58  ;;  %v2601_v59 = vadd.f32 0.5, %v2537_v51  ;;  %v2536_v47 = vmul.f32 0.5, %v6461_v44  ;;  %v2663_v17 = vmul.f32 %v9681_v16, %v2599_v52 }
 0x498   : > { %v6465_v3 = vpop.eup %6464  ;;  %v1934_v41 = vadd.f32 %v1933_v37, %v1866_v4  ;;  %v1804_v53 = vadd.f32 0.5, %v1740_v39  ;;  %v1743_v61 = vmul.f32 0.5, %v6463_v38  ;;  %v1869_v10 = vmul.f32 %v9686_v35, %v1805_v15 }
 0x499   : > { %v6467_v56 = vpop.eup %6466  ;;  %v2730_v28 = vadd.f32 %v2729_v12, %v2662_v7  ;;  %v2600_v19 = vadd.f32 0.5, %v2536_v47  ;;  %v2539_v30 = vmul.f32 0.5, %v6465_v3  ;;  %v2665_v9 = vmul.f32 %v9687_v11, %v2601_v59 }
 0x49a   : > { %v6469_v34 = vpop.eup %6468  ;;  %v1868_v26 = vmul.f32 %v1804_v53, %v8188_v24  ;;  %v1935_v58 = vadd.f32 %v1934_v41, %v1867_v43  ;;  %v1807_v36 = vadd.f32 0.5, %v1743_v61  ;;  %v1742_v48 = vmul.f32 0.5, %v6467_v56  ;;  %v9701_v56 = vld [vmem:[#allocation28_spill] sm:$0xff] }
 0x49b   : > { %v6471_v32 = vpop.eup %6470  ;;  %v2664_v16 = vmul.f32 %v2600_v19, %v8190_v62  ;;  %v2731_v40 = vadd.f32 %v2730_v28, %v2663_v17  ;;  %v2538_v14 = vmul.f32 0.5, %v6469_v34  ;;  %v2603_v37 = vadd.f32 0.5, %v2539_v30  ;;  %v9702_v28 = vld [vmem:[#allocation24_spill] sm:$0xff]  ;;  %v9704_v30 = vld [vmem:[#allocation23_spill] sm:$0xff] }
 0x49c   : > { %v1936_v50 = vadd.f32 %v1935_v58, %v1868_v26  ;;  %v1806_v46 = vadd.f32 0.5, %v1742_v48  ;;  %v1745_v63 = vmul.f32 0.5, %v6471_v32  ;;  %v1871_v29 = vmul.f32 %v8196_v0, %v1807_v36 }
 0x49d   : > { %v6473_v35 = vpop.eup %6472  ;;  %v2732_v52 = vadd.f32 %v2731_v40, %v2664_v16  ;;  %v2602_v12 = vadd.f32 0.5, %v2538_v14  ;;  %6480 = vtanh.f32 %v8354_v6  ;;  %v1620_v51 = vmul.f32 0.5, %v8238_v42  ;;  %v9707_v40 = vld [vmem:[#allocation33_spill] sm:$0xff] }
 0x49e   : > { %v1870_v24 = vmul.f32 %v1806_v46, %v8201_v27  ;;  %v1937_v43 = vadd.f32 %v1936_v50, %v1869_v10  ;;  %v1809_v60 = vadd.f32 0.5, %v1745_v63  ;;  %v2541_v11 = vmul.f32 0.5, %v6473_v35  ;;  %v6475_v2 = vpop.eup %6474  ;;  %v2770_v50 = vld [vmem:[%s7326_s13 + $0xd0] sm:$0xff]  ;;  %v9708_v35 = vld [vmem:[#allocation34_spill] sm:$0xff] }
 0x49f   : > { %v2666_v62 = vmul.f32 %v2602_v12, %v9695_v1  ;;  %v2733_v31 = vadd.f32 %v2732_v52, %v2665_v9  ;;  %6482 = vtanh.f32 %v8357_v23  ;;  %v6477_v44 = vpop.eup %6476  ;;  %v2667_v4 = vmul.f32 %v9692_v54, %v2603_v37  ;;  %v9700_v54 = vld [vmem:[#allocation27_spill] sm:$0xff]  ;;  %v2771_v37 = vld [vmem:[%s7326_s13 + $0xd8] sm:$0xff] }
 0x4a0   : > { %v1938_v0 = vadd.f32 %v1937_v43, %v1870_v24  ;;  %v1744_v15 = vmul.f32 0.5, %v6475_v2  ;;  %v2416_v6 = vmul.f32 0.5, %v8240_v8  ;;  %v6479_v39 = vpop.eup %6478  ;;  %v1873_v38 = vmul.f32 %v8208_v18, %v1809_v60  ;;  %v9711_v2 = vld [vmem:[#allocation37_spill] sm:$0xff] }
 0x4a1   : > { %v2734_v27 = vadd.f32 %v2733_v31, %v2666_v62  ;;  %v2540_v7 = vmul.f32 0.5, %v6477_v44  ;;  %6484 = vtanh.f32 %v8366_v22  ;;  %v2605_v1 = vadd.f32 0.5, %v2541_v11  ;;  %v9703_v22 = vld [vmem:[#allocation29_spill] sm:$0xff]  ;;  %v9712_v31 = vld [vmem:[#allocation38_spill] sm:$0xff] }
 0x4a2   : > { %v1808_v59 = vadd.f32 0.5, %v1744_v15  ;;  %v1939_v47 = vadd.f32 %v1938_v0, %v1871_v29  ;;  %v1747_v23 = vmul.f32 0.5, %v6479_v39  ;;  %6486 = vtanh.f32 %v8369_v20  ;;  %v9705_v20 = vld [vmem:[#allocation30_spill] sm:$0xff]  ;;  %v9709_v29 = vld [vmem:[#allocation35_spill] sm:$0xff] }
 0x4a3   : > { %v2604_v3 = vadd.f32 0.5, %v2540_v7  ;;  %v2735_v17 = vadd.f32 %v2734_v27, %v2667_v4  ;;  %v1623_v41 = vmul.f32 0.5, %v9700_v54  ;;  %6488 = vtanh.f32 %v8376_v13  ;;  %v9706_v13 = vld [vmem:[#allocation32_spill] sm:$0xff]  ;;  %v9713_v15 = vld [vmem:[#allocation39_spill] sm:$0xff] }
 0x4a4   : > { %v1872_v53 = vmul.f32 %v1808_v59, %v8212_v21  ;;  %v1811_v61 = vadd.f32 0.5, %v1747_v23  ;;  %v2419_v18 = vmul.f32 0.5, %v9701_v56  ;;  %6490 = vtanh.f32 %v1620_v51 }
 0x4a5   : > { %v2668_v10 = vmul.f32 %v2604_v3, %v9702_v28  ;;  %v1622_v19 = vmul.f32 0.5, %v9703_v22  ;;  %v2669_v34 = vmul.f32 %v9704_v30, %v2605_v1  ;;  %6492 = vtanh.f32 %v2416_v6  ;;  %v9715_v1 = vld [vmem:[#allocation40_spill] sm:$0xff] }
 0x4a6   : > { %v1940_v26 = vadd.f32 %v1939_v47, %v1872_v53  ;;  %v2418_v58 = vmul.f32 0.5, %v9705_v20  ;;  %v1875_v48 = vmul.f32 %v9698_v33, %v1811_v61  ;;  %6494 = vtanh.f32 %v1623_v41  ;;  %v9710_v33 = vld [vmem:[#allocation36_spill] sm:$0xff] }
 0x4a7   : > { %v6481_v36 = vpop.eup %6480  ;;  %v2736_v21 = vadd.f32 %v2735_v17, %v2668_v10  ;;  %v1625_v32 = vmul.f32 0.5, %v9706_v13  ;;  %6496 = vtanh.f32 %v2419_v18  ;;  %v2421_v14 = vmul.f32 0.5, %v9707_v40  ;;  %v9717_v18 = vld [vmem:[#allocation16_spill] sm:$0xff] }
 0x4a8   : > { %v2543_v9 = vmul.f32 0.5, %v6481_v36  ;;  %v1941_v16 = vadd.f32 %v1940_v26, %v1873_v38  ;;  %6498 = vtanh.f32 %v1622_v19  ;;  %v1624_v52 = vmul.f32 0.5, %v9708_v35  ;;  %v9714_v38 = vld [vmem:[#allocation14_spill] sm:$0xff]  ;;  %v9718_v36 = vld [vmem:[#allocation17_spill] sm:$0xff] }
 0x4a9   : > { %v6483_v46 = vpop.eup %6482  ;;  %v2737_v63 = vadd.f32 %v2736_v21, %v2669_v34  ;;  %v2420_v12 = vmul.f32 0.5, %v9709_v29  ;;  %6500 = vtanh.f32 %v2418_v58  ;;  %v1627_v60 = vmul.f32 0.5, %v9710_v33 }
 0x4aa   : > { %v2607_v24 = vadd.f32 0.5, %v2543_v9  ;;  %v1746_v43 = vmul.f32 0.5, %v6483_v46  ;;  %6502 = vtanh.f32 %v1625_v32  ;;  %v2423_v62 = vmul.f32 0.5, %v9711_v2  ;;  %v9719_v32 = vld [vmem:[#allocation18_spill] sm:$0xff] }
 0x4ab   : > { %v6485_v11 = vpop.eup %6484  ;;  %v1626_v51 = vmul.f32 0.5, %v9712_v31  ;;  %v6126_v44 = vpack.c.bf16 %v2771_v37, %v2770_v50  ;;  %6504 = vtanh.f32 %v2421_v14  ;;  %v2422_v6 = vmul.f32 0.5, %v9713_v15 }
 0x4ac   : > { %v1810_v4 = vadd.f32 0.5, %v1746_v43  ;;  %v2542_v0 = vmul.f32 0.5, %v6485_v11  ;;  %v6487_v39 = vpop.eup %6486  ;;  %v2671_v27 = vmul.f32 %v9699_v5, %v2607_v24  ;;  %6506 = vtanh.f32 %v1624_v52  ;;  %v9716_v5 = vld [vmem:[#allocation15_spill] sm:$0xff] }
 0x4ad   : > { %6127 = vmatpush3.bf16.msra.mxu0 %v6126_v44  ;;  %v8419_v7 = vmul.f32 0.5, %v9714_v38  ;;  %v8422_v59 = vmul.f32 0.5, %v9715_v1  ;;  %v6489_v47 = vpop.eup %6488  ;;  %v1749_v17 = vmul.f32 0.5, %v6487_v39  ;;  %6508 = vtanh.f32 %v2420_v12 }
 0x4ae   : > { %v1874_v23 = vmul.f32 %v1810_v4, %v8228_v45  ;;  %v2606_v3 = vadd.f32 0.5, %v2542_v0  ;;  %6128 = vmatprep.subr.bf16.mxu0 %v9673_v49  ;;  %v6491_v41 = vpop.eup %6490  ;;  %v2545_v53 = vmul.f32 0.5, %v6489_v47  ;;  %6510 = vtanh.f32 %v1627_v60 }
 0x4af   : > { %v8427_v61 = vmul.f32 0.5, %v9716_v5  ;;  %v8430_v28 = vmul.f32 0.5, %v9717_v18  ;;  %v6493_v10 = vpop.eup %6492  ;;  %v1813_v34 = vadd.f32 0.5, %v1749_v17  ;;  %v1748_v45 = vmul.f32 0.5, %v6491_v41 }
 0x4b0   : > { %v1942_v19 = vadd.f32 %v1941_v16, %v1874_v23  ;;  %v2670_v30 = vmul.f32 %v2606_v3, %v8230_v57  ;;  %v6495_v26 = vpop.eup %6494  ;;  %v2544_v58 = vmul.f32 0.5, %v6493_v10  ;;  %6512 = vtanh.f32 %v2423_v62 }
 0x4b1   : > { %v8434_v21 = vmul.f32 0.5, %v9718_v36  ;;  %v8437_v9 = vmul.f32 0.5, %v9719_v32  ;;  %v6497_v14 = vpop.eup %6496  ;;  %v2609_v37 = vadd.f32 0.5, %v2545_v53  ;;  %v1812_v46 = vadd.f32 0.5, %v1748_v45 }
 0x4b2   : > { %v2738_v50 = vadd.f32 %v2737_v63, %v2670_v30  ;;  %v1943_v52 = vadd.f32 %v1942_v19, %v1875_v48  ;;  %v6499_v12 = vpop.eup %6498  ;;  %v1877_v16 = vmul.f32 %v8234_v25, %v1813_v34  ;;  %v2608_v57 = vadd.f32 0.5, %v2544_v58 }
 0x4b3   : > { %v1751_v24 = vmul.f32 0.5, %v6495_v26  ;;  %v2547_v43 = vmul.f32 0.5, %v6497_v14  ;;  %v6501_v60 = vpop.eup %6500  ;;  %v1876_v11 = vmul.f32 %v1812_v46, %v8238_v42  ;;  %v1750_v44 = vmul.f32 0.5, %v6499_v12 }
 0x4b4   : > { %v2739_v62 = vadd.f32 %v2738_v50, %v2671_v27  ;;  %6514 = vtanh.f32 %v1626_v51  ;;  %v6503_v4 = vpop.eup %6502  ;;  %v2672_v0 = vmul.f32 %v2608_v57, %v8240_v8  ;;  %v2546_v47 = vmul.f32 0.5, %v6501_v60 }
 0x4b5   : > { %v1815_v39 = vadd.f32 0.5, %v1751_v24  ;;  %v2611_v63 = vadd.f32 0.5, %v2547_v43  ;;  %v6505_v23 = vpop.eup %6504  ;;  %v1944_v48 = vadd.f32 %v1943_v52, %v1876_v11  ;;  %v1814_v3 = vadd.f32 0.5, %v1750_v44 }
 0x4b6   : > { %v1753_v17 = vmul.f32 0.5, %v6503_v4  ;;  %6516 = vtanh.f32 %v2422_v6  ;;  %v6507_v25 = vpop.eup %6506  ;;  %v2673_v41 = vmul.f32 %v8236_v55, %v2609_v37  ;;  %v2740_v53 = vadd.f32 %v2739_v62, %v2672_v0  ;;  %v9721_v62 = vld [vmem:[#allocation20_spill] sm:$0xff]  ;;  %v1964_v4 = vld [vmem:[%s7326_s13] sm:$0xff] }
 0x4b7   : > { %v1879_v42 = vmul.f32 %v9700_v54, %v1815_v39  ;;  %v2610_v27 = vadd.f32 0.5, %v2546_v47  ;;  %v6509_v10 = vpop.eup %6508  ;;  %v1878_v51 = vmul.f32 %v1814_v3, %v9703_v22  ;;  %v1945_v19 = vadd.f32 %v1944_v48, %v1877_v16  ;;  %v1966_v3 = vld [vmem:[%s7326_s13 + $0x10] sm:$0xff] }
 0x4b8   : > { %v1817_v8 = vadd.f32 0.5, %v1753_v17  ;;  %v2549_v30 = vmul.f32 0.5, %v6505_v23  ;;  %v6511_v34 = vpop.eup %6510  ;;  %v2741_v26 = vadd.f32 %v2740_v53, %v2673_v41  ;;  %v1752_v58 = vmul.f32 0.5, %v6507_v25  ;;  %v9722_v23 = vld [vmem:[#allocation21_spill] sm:$0xff] }
 0x4b9   : > { %v2674_v45 = vmul.f32 %v2610_v27, %v9705_v20  ;;  %v2548_v14 = vmul.f32 0.5, %v6509_v10  ;;  %v2675_v6 = vmul.f32 %v9701_v56, %v2611_v63  ;;  %v1946_v50 = vadd.f32 %v1945_v19, %v1878_v51  ;;  %v1965_v63 = vld [vmem:[%s7326_s13 + $0x8] sm:$0xff]  ;;  %v2774_v27 = vld [vmem:[%s7326_s13 + $0xf0] sm:$0xff] }
 0x4ba   : > { %v2613_v55 = vadd.f32 0.5, %v2549_v30  ;;  %v1755_v37 = vmul.f32 0.5, %v6511_v34  ;;  %v6513_v46 = vpop.eup %6512  ;;  %v1816_v52 = vadd.f32 0.5, %v1752_v58  ;;  %6518 = vtanh.f32 %v8419_v7  ;;  %v9720_v7 = vld [vmem:[#allocation19_spill] sm:$0xff]  ;;  %v9723_v10 = vld [vmem:[#allocation42_spill] sm:$0xff] }
 0x4bb   : > { %v2742_v54 = vadd.f32 %v2741_v26, %v2674_v45  ;;  %v2612_v12 = vadd.f32 0.5, %v2548_v14  ;;  %v1881_v22 = vmul.f32 %v9706_v13, %v1817_v8  ;;  %v1947_v16 = vadd.f32 %v1946_v50, %v1879_v42  ;;  %v1967_v42 = vld [vmem:[%s7326_s13 + $0x18] sm:$0xff]  ;;  %v9724_v30 = vld [vmem:[#allocation22_spill] sm:$0xff]  ;;  %v9725_v45 = vld [vmem:[#allocation43_spill] sm:$0xff] }
 0x4bc   : > { %v1819_v57 = vadd.f32 0.5, %v1755_v37  ;;  %v2551_v20 = vmul.f32 0.5, %v6513_v46  ;;  %v1880_v24 = vmul.f32 %v1816_v52, %v9708_v35  ;;  %6520 = vtanh.f32 %v8422_v59  ;;  %v2773_v59 = vld [vmem:[%s7326_s13 + $0xe8] sm:$0xff]  ;;  %v8479_v46 = vld [vmem:[%s7319_s27 + $0x10] sm:$0xff] }
 0x4bd   : > { %v2676_v56 = vmul.f32 %v2612_v12, %v9709_v29  ;;  %v2743_v43 = vadd.f32 %v2742_v54, %v2675_v6  ;;  %v2677_v11 = vmul.f32 %v9707_v40, %v2613_v55  ;;  %6522 = vtanh.f32 %v8427_v61  ;;  %v2772_v29 = vld [vmem:[%s7326_s13 + $0xe0] sm:$0xff]  ;;  %v1969_v55 = vld [vmem:[%s7326_s13 + $0x28] sm:$0xff] }
 0x4be   : > { %v6515_v60 = vpop.eup %6514  ;;  %v1630_v13 = vmul.f32 0.5, %v9720_v7  ;;  %v2426_v44 = vmul.f32 0.5, %v9721_v62  ;;  %v1948_v0 = vadd.f32 %v1947_v16, %v1880_v24  ;;  %6524 = vtanh.f32 %v8430_v28  ;;  %v2775_v28 = vld [vmem:[%s7326_s13 + $0xf8] sm:$0xff] }
 0x4bf   : > { %v2744_v39 = vadd.f32 %v2743_v43, %v2676_v56  ;;  %v1754_v35 = vmul.f32 0.5, %v6515_v60  ;;  %v1883_v61 = vmul.f32 %v9710_v33, %v1819_v57  ;;  %v2615_v47 = vadd.f32 0.5, %v2551_v20  ;;  %v1970_v60 = vld [vmem:[%s7326_s13 + $0x30] sm:$0xff] }
 0x4c0   : > { %v6517_v40 = vpop.eup %6516  ;;  %6526 = vtanh.f32 %v8434_v21  ;;  %v1633_v48 = vmul.f32 0.5, %v9722_v23  ;;  %v1949_v25 = vadd.f32 %v1948_v0, %v1881_v22  ;;  %v2429_v51 = vmul.f32 0.5, %v9723_v10 }
 0x4c1   : > { %v1818_v17 = vadd.f32 0.5, %v1754_v35  ;;  %v2550_v41 = vmul.f32 0.5, %v6517_v40  ;;  %v2745_v53 = vadd.f32 %v2744_v39, %v2677_v11  ;;  %6528 = vtanh.f32 %v8437_v9  ;;  %v1971_v11 = vld [vmem:[%s7326_s13 + $0x38] sm:$0xff]  ;;  %v1973_v40 = vld [vmem:[%s7326_s13 + $0x48] sm:$0xff] }
 0x4c2   : > { %v6129_v19 = vpack.c.bf16 %v2773_v59, %v2772_v29  ;;  %v6135_v8 = vpack.c.bf16 %v1965_v63, %v1964_v4  ;;  %6530 = vtanh.f32 %v1630_v13  ;;  %v1632_v34 = vmul.f32 0.5, %v9724_v30  ;;  %v1972_v63 = vld [vmem:[%s7326_s13 + $0x40] sm:$0xff] }
 0x4c3   : > { %v1882_v33 = vmul.f32 %v1818_v17, %v9712_v31  ;;  %v2614_v21 = vadd.f32 0.5, %v2550_v41  ;;  %6532 = vtanh.f32 %v2426_v44  ;;  %v2428_v26 = vmul.f32 0.5, %v9725_v45  ;;  %v1968_v31 = vld [vmem:[%s7326_s13 + $0x20] sm:$0xff] }
 0x4c4   : > { %6130 = vmatpush3.bf16.msra.mxu0 %v6129_v19  ;;  %6136 = vmatpush3.bf16.msra.mxu1 %v6135_v8  ;;  %v6138_v58 = vpack.c.bf16 %v1967_v42, %v1966_v3  ;;  %v6132_v9 = vpack.c.bf16 %v2775_v28, %v2774_v27  ;;  %v6519_v14 = vpop.eup %6518  ;;  %6534 = vtanh.f32 %v1633_v48  ;;  %v2679_v52 = vmul.f32 %v9711_v2, %v2615_v47  ;;  %v9726_v41 = vld [vmem:[#allocation41_spill] sm:$0xff] }
 0x4c5   : > { %v1950_v6 = vadd.f32 %v1949_v25, %v1882_v33  ;;  %v2678_v50 = vmul.f32 %v2614_v21, %v9713_v15  ;;  %6137 = vmatprep.subr.bf16.mxu1 %v9673_v49  ;;  %6131 = vmatprep.subr.bf16.mxu0 %v9673_v49  ;;  %v1757_v37 = vmul.f32 0.5, %v6519_v14  ;;  %6536 = vtanh.f32 %v2429_v51 }
 0x4c6   : > { %v6521_v54 = vpop.eup %6520  ;;  %6538 = vtanh.f32 %v1632_v34  ;;  %v6141_v57 = vpack.c.bf16 %v1969_v55, %v1968_v31  ;;  %v7098_v44 = vmov 0.0   ;;  %v6144_v59 = vpack.c.bf16 %v1971_v11, %v1970_v60  ;;  %v1976_v11 = vld [vmem:[%s7326_s13 + $0x60] sm:$0xff] }
 0x4c7   : > { %v2746_v12 = vadd.f32 %v2745_v53, %v2678_v50  ;;  %v1951_v22 = vadd.f32 %v1950_v6, %v1883_v61  ;;  %v6523_v15 = vpop.eup %6522  ;;  %v2553_v16 = vmul.f32 0.5, %v6521_v54  ;;  %6540 = vtanh.f32 %v2428_v26  ;;  %5718 = vmatprep.mubr.msk.f32.mxu0 %vm7097_vm3, %v7098_v44  ;;  %5753 = vmatprep.mubr.msk.f32.mxu1 %vm7097_vm3, %v7098_v44  ;;  %v1975_v50 = vld [vmem:[%s7326_s13 + $0x58] sm:$0xff] }
 0x4c8   : > { %6139 = vmatpush3.bf16.msra.mxu1 %v6138_v58  ;;  %6133 = vmatpush3.bf16.msra.mxu0 %v6132_v9  ;;  %v6525_v20 = vpop.eup %6524  ;;  %v1821_v24 = vadd.f32 0.5, %v1757_v37  ;;  %v1756_v56 = vmul.f32 0.5, %v6523_v15  ;;  %v1921_v53 = vrot.slane %v9726_v41, 4 }
 0x4c9   : > { %v2747_v43 = vadd.f32 %v2746_v12, %v2679_v52  ;;  %6140 = vmatprep.subr.bf16.mxu1 %v9673_v49  ;;  %5756 = vmatprep.subr.mxu0 %v8479_v46  ;;  %v2552_v13 = vmul.f32 0.5, %v6525_v20  ;;  %v2617_v4 = vadd.f32 0.5, %v2553_v16  ;;  %v9727_v52 = vld [vmem:[#allocation31_spill] sm:$0xff] }
 0x4ca   : > { %v6527_v2 = vpop.eup %6526  ;;  %v1820_v0 = vadd.f32 0.5, %v1756_v56  ;;  %v1885_v47 = vmul.f32 %v9714_v38, %v1821_v24  ;;  %v6147_v38 = vpack.c.bf16 %v1973_v40, %v1972_v63  ;;  %v2717_v12 = vrot.slane %v9727_v52, 4 }
 0x4cb   : > { %v1759_v39 = vmul.f32 0.5, %v6527_v2  ;;  %v6529_v35 = vpop.eup %6528  ;;  %v2616_v29 = vadd.f32 0.5, %v2552_v13  ;;  %v2681_v51 = vmul.f32 %v9715_v1, %v2617_v4  ;;  %v1974_v1 = vld [vmem:[%s7326_s13 + $0x50] sm:$0xff]  ;;  %v1922_v16 = vadd.f32 %v1921_v53, %v9726_v41  ;;  %v1977_v2 = vld [vmem:[%s7326_s13 + $0x68] sm:$0xff] }
 0x4cc   : > { %6142 = vmatpush3.bf16.msra.mxu1 %v6141_v57  ;;  %v6531_v61 = vpop.eup %6530  ;;  %v1884_v48 = vmul.f32 %v1820_v0, %v9716_v5  ;;  %v2555_v17 = vmul.f32 0.5, %v6529_v35  ;;  %v6150_v24 = vpack.c.bf16 %v1975_v50, %v1974_v1  ;;  %v2718_v0 = vadd.f32 %v2717_v12, %v9727_v52  ;;  %v6802_v1 = vld [vmem:[%s9575_s0 + $0x20] sm:$0xff]  ;;  %v6803_v50 = vld [vmem:[%s9575_s0 + $0x28] sm:$0xff]  ;;  %v6809_v52 = vld [vmem:[%s9575_s0 + $0x58] sm:$0xff] }
 0x4cd   : > { %v1823_v3 = vadd.f32 0.5, %v1759_v39  ;;  %6143 = vmatprep.subr.bf16.mxu1 %v9673_v49  ;;  %v6533_v25 = vpop.eup %6532  ;;  %v2680_v42 = vmul.f32 %v2616_v29, %v9717_v18  ;;  %v1758_v27 = vmul.f32 0.5, %v6531_v61  ;;  %v1978_v61 = vld [vmem:[%s7326_s13 + $0x70] sm:$0xff]  ;;  %v6810_v12 = vld [vmem:[%s9575_s0 + $0x60] sm:$0xff] }
 0x4ce   : > { %v6535_v28 = vpop.eup %6534  ;;  %v1952_v19 = vadd.f32 %v1951_v22, %v1884_v48  ;;  %v2554_v8 = vmul.f32 0.5, %v6533_v25  ;;  %v2619_v9 = vadd.f32 0.5, %v2555_v17  ;;  %v2719_v48 = vrot.slane %v2718_v0, 2 }
 0x4cf   : > { %v6537_v33 = vpop.eup %6536  ;;  %v2748_v5 = vadd.f32 %v2747_v43, %v2680_v42  ;;  %v1887_v21 = vmul.f32 %v9718_v36, %v1823_v3  ;;  %v1822_v34 = vadd.f32 0.5, %v1758_v27  ;;  %v1761_v26 = vmul.f32 0.5, %v6535_v28 }
 0x4d0   : > { %6145 = vmatpush3.bf16.msra.mxu1 %v6144_v59  ;;  %v6539_v58 = vpop.eup %6538  ;;  %v1953_v14 = vadd.f32 %v1952_v19, %v1885_v47  ;;  %v2618_v18 = vadd.f32 0.5, %v2554_v8  ;;  %v2557_v6 = vmul.f32 0.5, %v6537_v33  ;;  %v2683_v56 = vmul.f32 %v9719_v32, %v2619_v9  ;;  %v1979_v47 = vld [vmem:[%s7326_s13 + $0x78] sm:$0xff] }
 0x4d1   : > { %6146 = vmatprep.subr.bf16.mxu1 %v9673_v49  ;;  %v6541_v31 = vpop.eup %6540  ;;  %v1886_v55 = vmul.f32 %v1822_v34, %v9720_v7  ;;  %v2749_v37 = vadd.f32 %v2748_v5, %v2681_v51  ;;  %v1825_v54 = vadd.f32 0.5, %v1761_v26  ;;  %v1760_v36 = vmul.f32 0.5, %v6539_v58 }
 0x4d2   : > { %v2682_v22 = vmul.f32 %v2618_v18, %v9721_v62  ;;  %v2556_v15 = vmul.f32 0.5, %v6541_v31  ;;  %v2621_v7 = vadd.f32 0.5, %v2557_v6  ;;  %v1923_v32 = vrot.slane %v1922_v16, 2  ;;  %v6799_v18 = vld [vmem:[%s9575_s0 + $0x8] sm:$0xff]  ;;  %v6800_v6 = vld [vmem:[%s9575_s0 + $0x10] sm:$0xff] }
 0x4d3   : > { %v1954_v57 = vadd.f32 %v1953_v14, %v1886_v55  ;;  %v1824_v20 = vadd.f32 0.5, %v1760_v36  ;;  %v1889_v62 = vmul.f32 %v9722_v23, %v1825_v54  ;;  %v6153_v59 = vpack.c.bf16 %v1977_v2, %v1976_v11  ;;  %v6798_v14 = vld [vmem:[%s9575_s0] sm:$0xff]  ;;  %v6804_v31 = vld [vmem:[%s9575_s0 + $0x30] sm:$0xff]  ;;  %v6805_v55 = vld [vmem:[%s9575_s0 + $0x38] sm:$0xff] }
 0x4d4   : > { %6148 = vmatpush3.bf16.msra.mxu1 %v6147_v38  ;;  %v2750_v43 = vadd.f32 %v2749_v37, %v2682_v22  ;;  %v2620_v60 = vadd.f32 0.5, %v2556_v15  ;;  %v2685_v63 = vmul.f32 %v9723_v10, %v2621_v7  ;;  %v1924_v3 = vadd.f32 %v1923_v32, %v1922_v16  ;;  %v6806_v37 = vld [vmem:[%s9575_s0 + $0x40] sm:$0xff]  ;;  %v6807_v54 = vld [vmem:[%s9575_s0 + $0x48] sm:$0xff]  ;;  %v6808_v36 = vld [vmem:[%s9575_s0 + $0x50] sm:$0xff] }
 0x4d5   : > { %6149 = vmatprep.subr.bf16.mxu1 %v9673_v49  ;;  %v1888_v13 = vmul.f32 %v1824_v20, %v9724_v30  ;;  %v1955_v4 = vadd.f32 %v1954_v57, %v1887_v21  ;;  %v6156_v25 = vpack.c.bf16 %v1979_v47, %v1978_v61  ;;  %v2720_v53 = vadd.f32 %v2719_v48, %v2718_v0  ;;  %v6811_v22 = vld [vmem:[%s9575_s0 + $0x68] sm:$0xff]  ;;  %v6812_v15 = vld [vmem:[%s9575_s0 + $0x70] sm:$0xff]  ;;  %v6813_v16 = vld [vmem:[%s9575_s0 + $0x78] sm:$0xff] }
 0x4d6   : > { %v2684_v39 = vmul.f32 %v2620_v60, %v9725_v45  ;;  %v2751_v35 = vadd.f32 %v2750_v43, %v2683_v56  ;;  %v1925_v27 = vrot.slane %v1924_v3, 1  ;;  %v6814_v57 = vld [vmem:[%s9575_s0 + $0x80] sm:$0xff]  ;;  %v6815_v20 = vld [vmem:[%s9575_s0 + $0x88] sm:$0xff]  ;;  %v6817_v56 = vld [vmem:[%s9575_s0 + $0x98] sm:$0xff] }
 0x4d7   : > { %v1956_v29 = vadd.f32 %v1955_v4, %v1888_v13  ;;  %v2721_v19 = vrot.slane %v2720_v53, 1  ;;  %v6818_v43 = vld [vmem:[%s9575_s0 + $0xa0] sm:$0xff]  ;;  %v6819_v7 = vld [vmem:[%s9575_s0 + $0xa8] sm:$0xff]  ;;  %v6820_v60 = vld [vmem:[%s9575_s0 + $0xb0] sm:$0xff] }
 0x4d8   : > { %6151 = vmatpush3.bf16.msra.mxu1 %v6150_v24  ;;  %v2752_v40 = vadd.f32 %v2751_v35, %v2684_v39  ;;  %v1926_v33 = vadd.f32 %v1925_v27, %v1924_v3  ;;  %v6816_v24 = vld [vmem:[%s9575_s0 + $0x90] sm:$0xff]  ;;  %v6821_v11 = vld [vmem:[%s9575_s0 + $0xb8] sm:$0xff]  ;;  %v6822_v2 = vld [vmem:[%s9575_s0 + $0xc0] sm:$0xff] }
 0x4d9   : > { %6152 = vmatprep.subr.bf16.mxu1 %v9673_v49  ;;  %v1957_v23 = vadd.f32 %v1956_v29, %v1889_v62  ;;  %v2722_v34 = vadd.f32 %v2721_v19, %v2720_v53  ;;  %v6823_v62 = vld [vmem:[%s9575_s0 + $0xc8] sm:$0xff]  ;;  %v6824_v13 = vld [vmem:[%s9575_s0 + $0xd0] sm:$0xff]  ;;  %v6825_v4 = vld [vmem:[%s9575_s0 + $0xd8] sm:$0xff] }
 0x4da   : > { %v2753_v30 = vadd.f32 %v2752_v40, %v2685_v63  ;;  %v6826_v0 = vld [vmem:[%s9575_s0 + $0xe0] sm:$0xff]  ;;  %v6827_v39 = vld [vmem:[%s9575_s0 + $0xe8] sm:$0xff]  ;;  %v6828_v35 = vld [vmem:[%s9575_s0 + $0xf0] sm:$0xff] }
 0x4db   : > { %v1958_v17 = vrot.slane %v1957_v23, 4  ;;  %v6829_v32 = vld [vmem:[%s9575_s0 + $0xf8] sm:$0xff]  ;;  %v6830_v29 = vld [vmem:[%s9575_s0 + $0x100] sm:$0xff]  ;;  %v6832_v63 = vld [vmem:[%s9575_s0 + $0x110] sm:$0xff] }
 0x4dc   : > { %6154 = vmatpush3.bf16.msra.mxu1 %v6153_v59  ;;  %v2754_v45 = vrot.slane %v2753_v30, 4  ;;  %v6831_v59 = vld [vmem:[%s9575_s0 + $0x108] sm:$0xff]  ;;  %v6833_v40 = vld [vmem:[%s9575_s0 + $0x118] sm:$0xff]  ;;  %v6834_v61 = vld [vmem:[%s9575_s0 + $0x120] sm:$0xff] }
 0x4dd   : > { %6155 = vmatprep.subr.bf16.mxu1 %v9673_v49  ;;  %v1959_v41 = vadd.f32 %v1958_v17, %v1957_v23  ;;  %v6835_v47 = vld [vmem:[%s9575_s0 + $0x128] sm:$0xff]  ;;  %v6836_v23 = vld [vmem:[%s9575_s0 + $0x130] sm:$0xff]  ;;  %v6837_v48 = vld [vmem:[%s9575_s0 + $0x138] sm:$0xff] }
 0x4de   : > { %v2755_v42 = vadd.f32 %v2754_v45, %v2753_v30  ;;  %v6838_v30 = vld [vmem:[%s9575_s0 + $0x140] sm:$0xff]  ;;  %v6839_v3 = vld [vmem:[%s9575_s0 + $0x148] sm:$0xff]  ;;  %v6840_v17 = vld [vmem:[%s9575_s0 + $0x150] sm:$0xff] }
 0x4df   : > { %v1960_v10 = vrot.slane %v1959_v41, 2  ;;  %v6842_v45 = vld [vmem:[%s9575_s0 + $0x160] sm:$0xff]  ;;  %v6844_v53 = vld [vmem:[%s9575_s0 + $0x170] sm:$0xff] }
 0x4e0   : > { %6157 = vmatpush3.bf16.msra.mxu1 %v6156_v25  ;;  %v2756_v28 = vrot.slane %v2755_v42, 2  ;;  %v6841_v25 = vld [vmem:[%s9575_s0 + $0x158] sm:$0xff]  ;;  %v6846_v27 = vld [vmem:[%s9575_s0 + $0x180] sm:$0xff] }
 0x4e1   : > { %6158 = vmatprep.subr.bf16.mxu1 %v9673_v49  ;;  %v1961_v51 = vadd.f32 %v1960_v10, %v1959_v41  ;;  %v6843_v41 = vld [vmem:[%s9575_s0 + $0x168] sm:$0xff]  ;;  %v6850_v19 = vld [vmem:[%s9575_s0 + $0x1a0] sm:$0xff] }
 0x4e2   : > { %v2757_v8 = vadd.f32 %v2756_v28, %v2755_v42  ;;  %v6845_v42 = vld [vmem:[%s9575_s0 + $0x178] sm:$0xff]  ;;  %v6847_v10 = vld [vmem:[%s9575_s0 + $0x188] sm:$0xff]  ;;  %v6848_v28 = vld [vmem:[%s9575_s0 + $0x190] sm:$0xff] }
 0x4e3   : > { %v1962_v38 = vrot.slane %v1961_v51, 1 }
 0x4e4   : > { %v2758_v5 = vrot.slane %v2757_v8, 1 }
 0x4e5   : > { %v1963_v21 = vadd.f32 %v1962_v38, %v1961_v51  ;;  %v6849_v51 = vld [vmem:[%s9575_s0 + $0x198] sm:$0xff]  ;;  %v6852_v38 = vld [vmem:[%s9575_s0 + $0x1b0] sm:$0xff] }
 0x4e6   : > { %v2759_v26 = vadd.f32 %v2758_v5, %v2757_v8  ;;  %v6851_v8 = vld [vmem:[%s9575_s0 + $0x1a8] sm:$0xff]  ;;  %v6854_v5 = vld [vmem:[%s9575_s0 + $0x1c0] sm:$0xff] }
 0x4e7   : > { %v2853_v58 = vsel %vm2778_vm4, %v1963_v21, %v1926_v33  ;;  %v6853_v33 = vld [vmem:[%s9575_s0 + $0x1b8] sm:$0xff]  ;;  %v6855_v21 = vld [vmem:[%s9575_s0 + $0x1c8] sm:$0xff] }
 0x4e8   : > { %v2779_v9 = vsel %vm2778_vm4, %v2759_v26, %v2722_v34  ;;  %5754 = vmatmul.mubr.f32.vlgmr.msra.gmra.mrb[64].mxu1 %v2853_v58  ;;  %v6856_v34 = vld [vmem:[%s9575_s0 + $0x1d0] sm:$0xff]  ;;  %v6857_v26 = vld [vmem:[%s9575_s0 + $0x1d8] sm:$0xff]  ;;  %v6858_v58 = vld [vmem:[%s9575_s0 + $0x1e0] sm:$0xff] }
 0x4e9   : > { %5719 = vmatmul.mubr.f32.vlgmr.msra.gmra.mrb[64].mxu0 %v2779_v9  ;;  %5886 = vmatprep.mubr.msk.f32.mxu1 %vm7097_vm3, %v7098_v44  ;;  %v6859_v9 = vld [vmem:[%s9575_s0 + $0x1e8] sm:$0xff] }
 0x4ea   : > { %5757 = vmatpush3.msra.mxu0 %v8479_v46  ;;  %5758 = vmatprep.mubr.msk.f32.mxu0 %vm992_vm2, %v6798_v14  ;;  %v6801_v46 = vld [vmem:[%s9575_s0 + $0x18] sm:$0xff]  ;;  %v6860_v14 = vld [vmem:[%s9575_s0 + $0x1f0] sm:$0xff] }
 0x4eb   : > { %6182 = vmatprep.subr.bf16.mxu0 %v9673_v49 }
 0x4ed   : > { %5759 = vmatmul.mubr.msk.f32.vlgmr.msra.gmra.mrb[66].mxu0 %vm992_vm2, %v6799_v18  ;;  %v6861_v18 = vld [vmem:[%s9575_s0 + $0x1f8] sm:$0xff] }
 0x4ee   : > { %5761 = vmatprep.mubr.msk.f32.mxu0 %vm992_vm2, %v6800_v6 }
 0x4f1   : > { %5762 = vmatmul.mubr.msk.f32.gmra.mrb[68].mxu0 %vm992_vm2, %v6801_v46 }
 0x4f2   : > { %5764 = vmatprep.mubr.msk.f32.mxu0 %vm992_vm2, %v6802_v1 }
 0x4f5   : > { %5765 = vmatmul.mubr.msk.f32.gmra.mrb[70].mxu0 %vm992_vm2, %v6803_v50 }
 0x4f6   : > { %5767 = vmatprep.mubr.msk.f32.mxu0 %vm992_vm2, %v6804_v31 }
 0x4f9   : > { %5768 = vmatmul.mubr.msk.f32.gmra.mrb[72].mxu0 %vm992_vm2, %v6805_v55 }
 0x4fa   : > { %5770 = vmatprep.mubr.msk.f32.mxu0 %vm992_vm2, %v6806_v37 }
 0x4fd   : > { %5771 = vmatmul.mubr.msk.f32.gmra.mrb[74].mxu0 %vm992_vm2, %v6807_v54 }
 0x4fe   : > { %5773 = vmatprep.mubr.msk.f32.mxu0 %vm992_vm2, %v6808_v36 }
 0x501   : > { %5774 = vmatmul.mubr.msk.f32.gmra.mrb[76].mxu0 %vm992_vm2, %v6809_v52 }
 0x502   : > { %5776 = vmatprep.mubr.msk.f32.mxu0 %vm992_vm2, %v6810_v12 }
 0x505   : > { %5777 = vmatmul.mubr.msk.f32.gmra.mrb[78].mxu0 %vm992_vm2, %v6811_v22 }
 0x506   : > { %5779 = vmatprep.mubr.msk.f32.mxu0 %vm992_vm2, %v6812_v15 }
 0x509   : > { %5780 = vmatmul.mubr.msk.f32.gmra.mrb[80].mxu0 %vm992_vm2, %v6813_v16 }
 0x50a   : > { %5782 = vmatprep.mubr.msk.f32.mxu0 %vm992_vm2, %v6814_v57 }
 0x50d   : > { %5783 = vmatmul.mubr.msk.f32.gmra.mrb[82].mxu0 %vm992_vm2, %v6815_v20 }
 0x50e   : > { %5785 = vmatprep.mubr.msk.f32.mxu0 %vm992_vm2, %v6816_v24 }
 0x511   : > { %5786 = vmatmul.mubr.msk.f32.gmra.mrb[84].mxu0 %vm992_vm2, %v6817_v56 }
 0x512   : > { %5788 = vmatprep.mubr.msk.f32.mxu0 %vm992_vm2, %v6818_v43 }
 0x515   : > { %5789 = vmatmul.mubr.msk.f32.gmra.mrb[86].mxu0 %vm992_vm2, %v6819_v7 }
 0x516   : > { %5791 = vmatprep.mubr.msk.f32.mxu0 %vm992_vm2, %v6820_v60 }
 0x519   : > { %5792 = vmatmul.mubr.msk.f32.gmra.mrb[88].mxu0 %vm992_vm2, %v6821_v11 }
 0x51a   : > { %5794 = vmatprep.mubr.msk.f32.mxu0 %vm992_vm2, %v6822_v2 }
 0x51d   : > { %5795 = vmatmul.mubr.msk.f32.gmra.mrb[90].mxu0 %vm992_vm2, %v6823_v62 }
 0x51e   : > { %5797 = vmatprep.mubr.msk.f32.mxu0 %vm992_vm2, %v6824_v13 }
 0x521   : > { %5798 = vmatmul.mubr.msk.f32.gmra.mrb[92].mxu0 %vm992_vm2, %v6825_v4 }
 0x522   : > { %5800 = vmatprep.mubr.msk.f32.mxu0 %vm992_vm2, %v6826_v0 }
 0x525   : > { %5801 = vmatmul.mubr.msk.f32.gmra.mrb[94].mxu0 %vm992_vm2, %v6827_v39 }
 0x526   : > { %5803 = vmatprep.mubr.msk.f32.mxu0 %vm992_vm2, %v6828_v35 }
 0x529   : > { %5804 = vmatmul.mubr.msk.f32.gmra.mrb[96].mxu0 %vm992_vm2, %v6829_v32 }
 0x52a   : > { %5806 = vmatprep.mubr.msk.f32.mxu0 %vm992_vm2, %v6830_v29 }
 0x52d   : > { %5807 = vmatmul.mubr.msk.f32.gmra.mrb[98].mxu0 %vm992_vm2, %v6831_v59 }
 0x52e   : > { %5809 = vmatprep.mubr.msk.f32.mxu0 %vm992_vm2, %v6832_v63 }
 0x531   : > { %5810 = vmatmul.mubr.msk.f32.gmra.mrb[100].mxu0 %vm992_vm2, %v6833_v40 }
 0x532   : > { %5812 = vmatprep.mubr.msk.f32.mxu0 %vm992_vm2, %v6834_v61 }
 0x535   : > { %5813 = vmatmul.mubr.msk.f32.gmra.mrb[102].mxu0 %vm992_vm2, %v6835_v47 }
 0x536   : > { %5815 = vmatprep.mubr.msk.f32.mxu0 %vm992_vm2, %v6836_v23 }
 0x539   : > { %5816 = vmatmul.mubr.msk.f32.gmra.mrb[104].mxu0 %vm992_vm2, %v6837_v48 }
 0x53a   : > { %5818 = vmatprep.mubr.msk.f32.mxu0 %vm992_vm2, %v6838_v30 }
 0x53d   : > { %5819 = vmatmul.mubr.msk.f32.gmra.mrb[106].mxu0 %vm992_vm2, %v6839_v3 }
 0x53e   : > { %5821 = vmatprep.mubr.msk.f32.mxu0 %vm992_vm2, %v6840_v17 }
 0x541   : > { %5822 = vmatmul.mubr.msk.f32.gmra.mrb[108].mxu0 %vm992_vm2, %v6841_v25 }
 0x542   : > { %5824 = vmatprep.mubr.msk.f32.mxu0 %vm992_vm2, %v6842_v45 }
 0x545   : > { %5825 = vmatmul.mubr.msk.f32.gmra.mrb[110].mxu0 %vm992_vm2, %v6843_v41 }
 0x546   : > { %5827 = vmatprep.mubr.msk.f32.mxu0 %vm992_vm2, %v6844_v53 }
 0x549   : > { %5828 = vmatmul.mubr.msk.f32.gmra.mrb[112].mxu0 %vm992_vm2, %v6845_v42 }
 0x54a   : > { %5830 = vmatprep.mubr.msk.f32.mxu0 %vm992_vm2, %v6846_v27 }
 0x54d   : > { %5831 = vmatmul.mubr.msk.f32.gmra.mrb[114].mxu0 %vm992_vm2, %v6847_v10 }
 0x54e   : > { %5833 = vmatprep.mubr.msk.f32.mxu0 %vm992_vm2, %v6848_v28 }
 0x551   : > { %5834 = vmatmul.mubr.msk.f32.gmra.mrb[116].mxu0 %vm992_vm2, %v6849_v51 }
 0x552   : > { %5836 = vmatprep.mubr.msk.f32.mxu0 %vm992_vm2, %v6850_v19 }
 0x555   : > { %5837 = vmatmul.mubr.msk.f32.gmra.mrb[118].mxu0 %vm992_vm2, %v6851_v8 }
 0x556   : > { %5839 = vmatprep.mubr.msk.f32.mxu0 %vm992_vm2, %v6852_v38 }
 0x559   : > { %5840 = vmatmul.mubr.msk.f32.gmra.mrb[120].mxu0 %vm992_vm2, %v6853_v33 }
 0x55a   : > { %5842 = vmatprep.mubr.msk.f32.mxu0 %vm992_vm2, %v6854_v5 }
 0x55d   : > { %5843 = vmatmul.mubr.msk.f32.gmra.mrb[122].mxu0 %vm992_vm2, %v6855_v21 }
 0x55e   : > { %5845 = vmatprep.mubr.msk.f32.mxu0 %vm992_vm2, %v6856_v34 }
 0x561   : > { %5846 = vmatmul.mubr.msk.f32.gmra.mrb[124].mxu0 %vm992_vm2, %v6857_v26 }
 0x562   : > { %5848 = vmatprep.mubr.msk.f32.mxu0 %vm992_vm2, %v6858_v58 }
 0x565   : > { %5849 = vmatmul.mubr.msk.f32.gmra.mrb[126].mxu0 %vm992_vm2, %v6859_v9 }
 0x566   : > { %5851 = vmatprep.mubr.msk.f32.mxu0 %vm992_vm2, %v6860_v14 }
 0x569   : > { %5852 = vmatmul.mubr.msk.f32.gmra.mrb[128].mxu0 %vm992_vm2, %v6861_v18 }
 0x56a   : > { %6019 = vmatprep.mubr.msk.f32.mxu0 %vm7097_vm3, %v7098_v44 }
 0x5bb   : > { %v2921_v6 = vpop.f32.mrb[64].mxu1 }
 0x5bc   : > { %v2847_v46 = vpop.f32.mrb[64].mxu0  ;;  %v5755_v1 = vpop.f32.mrb[65].mxu1 }
 0x5bd   : > { %v8784_v50 = vadd.f32 %v2921_v6, %v2847_v46  ;;  %v5720_v31 = vpop.f32.mrb[65].mxu0 }
 0x5be   : > { %v3705_v31 = vld [vmem:[%s7326_s13 + $0x100] sm:$0xff] }
 0x5c0   : > { %v5760_v55 = vpop.f32.mrb[66].mxu0 }
 0x5c1   : > { %v3312_v37 = vmul.f32 0.5, %v5760_v55  ;;  %v2992_v54 = vpop.f32.mrb[67].mxu0 }
 0x5c2   : > { %v3311_v36 = vmul.f32 0.5, %v2992_v54 }
 0x5c3   : > { %6542 = vtanh.f32 %v3312_v37  ;;  %v3707_v37 = vld [vmem:[%s7326_s13 + $0x110] sm:$0xff] }
 0x5c4   : > { %6544 = vtanh.f32 %v3311_v36  ;;  %v5763_v52 = vpop.f32.mrb[68].mxu0 }
 0x5c5   : > { %v3314_v12 = vmul.f32 0.5, %v5763_v52  ;;  %v3002_v22 = vpop.f32.mrb[69].mxu0 }
 0x5c6   : > { %v3313_v15 = vmul.f32 0.5, %v3002_v22 }
 0x5c7   : > { %6546 = vtanh.f32 %v3314_v12 }
 0x5c8   : > { %6548 = vtanh.f32 %v3313_v15  ;;  %v5766_v16 = vpop.f32.mrb[70].mxu0 }
 0x5c9   : > { %v3316_v44 = vmul.f32 0.5, %v5766_v16  ;;  %v3012_v57 = vpop.f32.mrb[71].mxu0 }
 0x5ca   : > { %v3315_v20 = vmul.f32 0.5, %v3012_v57 }
 0x5cb   : > { %6550 = vtanh.f32 %v3316_v44  ;;  %v3708_v44 = vld [vmem:[%s7326_s13 + $0x118] sm:$0xff] }
 0x5cc   : > { %6552 = vtanh.f32 %v3315_v20  ;;  %v8786_v24 = vpop.f32.mrb[72].mxu0 }
 0x5cd   : > { %v6543_v56 = vpop.eup %6542  ;;  %v3318_v43 = vmul.f32 0.5, %v8786_v24  ;;  %v8789_v7 = vpop.f32.mrb[73].mxu0 }
 0x5ce   : > { %v6545_v60 = vpop.eup %6544  ;;  %v3440_v11 = vmul.f32 0.5, %v6543_v56  ;;  %v3317_v2 = vmul.f32 0.5, %v8789_v7  ;;  %v6162_v56 = vpack.c.bf16 %v3708_v44, %v3707_v37 }
 0x5cf   : > { %v3439_v62 = vmul.f32 0.5, %v6545_v60  ;;  %6554 = vtanh.f32 %v3318_v43 }
 0x5d0   : > { %v3504_v13 = vadd.f32 0.5, %v3440_v11  ;;  %6556 = vtanh.f32 %v3317_v2  ;;  %v8792_v4 = vpop.f32.mrb[74].mxu0  ;;  %v3709_v2 = vld [vmem:[%s7326_s13 + $0x120] sm:$0xff] }
 0x5d1   : > { %v6547_v0 = vpop.eup %6546  ;;  %v3503_v39 = vadd.f32 0.5, %v3439_v62  ;;  %v3320_v35 = vmul.f32 0.5, %v8792_v4  ;;  %v8795_v32 = vpop.f32.mrb[75].mxu0  ;;  %v3710_v62 = vld [vmem:[%s7326_s13 + $0x128] sm:$0xff] }
 0x5d2   : > { %v6549_v29 = vpop.eup %6548  ;;  %v3568_v59 = vmul.f32 %v5760_v55, %v3504_v13  ;;  %v3442_v63 = vmul.f32 0.5, %v6547_v0  ;;  %v3319_v40 = vmul.f32 0.5, %v8795_v32  ;;  %v3706_v55 = vld [vmem:[%s7326_s13 + $0x108] sm:$0xff] }
 0x5d3   : > { %v3567_v61 = vmul.f32 %v3503_v39, %v2992_v54  ;;  %v3441_v47 = vmul.f32 0.5, %v6549_v29  ;;  %6558 = vtanh.f32 %v3320_v35  ;;  %v6159_v15 = vpack.c.bf16 %v3706_v55, %v3705_v31 }
 0x5d4   : > { %6560 = vtanh.f32 %v3319_v40  ;;  %v8798_v23 = vpop.f32.mrb[76].mxu0  ;;  %v3506_v3 = vadd.f32 0.5, %v3442_v63 }
 0x5d5   : > { %v6551_v48 = vpop.eup %6550  ;;  %v3631_v30 = vadd.f32 %v3568_v59, %v3567_v61  ;;  %v3505_v17 = vadd.f32 0.5, %v3441_v47  ;;  %v3322_v25 = vmul.f32 0.5, %v8798_v23  ;;  %v8801_v45 = vpop.f32.mrb[77].mxu0  ;;  %6160 = vmatpush3.bf16.msra.mxu1 %v6159_v15 }
 0x5d6   : > { %v6553_v41 = vpop.eup %6552  ;;  %v3444_v53 = vmul.f32 0.5, %v6551_v48  ;;  %v3321_v42 = vmul.f32 0.5, %v8801_v45  ;;  %v3570_v8 = vmul.f32 %v5763_v52, %v3506_v3  ;;  %6161 = vmatprep.subr.bf16.mxu1 %v9673_v49  ;;  %v6165_v48 = vpack.c.bf16 %v3710_v62, %v3709_v2 }
 0x5d7   : > { %v3569_v27 = vmul.f32 %v3505_v17, %v3002_v22  ;;  %v3443_v10 = vmul.f32 0.5, %v6553_v41  ;;  %6562 = vtanh.f32 %v3322_v25  ;;  %v3711_v25 = vld [vmem:[%s7326_s13 + $0x130] sm:$0xff]  ;;  %v3712_v41 = vld [vmem:[%s7326_s13 + $0x138] sm:$0xff] }
 0x5d8   : > { %v3508_v28 = vadd.f32 0.5, %v3444_v53  ;;  %6564 = vtanh.f32 %v3321_v42  ;;  %v8804_v51 = vpop.f32.mrb[78].mxu0 }
 0x5d9   : > { %v6555_v19 = vpop.eup %6554  ;;  %v3632_v38 = vadd.f32 %v3631_v30, %v3569_v27  ;;  %v3507_v33 = vadd.f32 0.5, %v3443_v10  ;;  %v3324_v5 = vmul.f32 0.5, %v8804_v51  ;;  %v8807_v21 = vpop.f32.mrb[79].mxu0  ;;  %6163 = vmatpush3.bf16.msra.mxu1 %v6162_v56 }
 0x5da   : > { %v6557_v34 = vpop.eup %6556  ;;  %v3446_v26 = vmul.f32 0.5, %v6555_v19  ;;  %v3323_v58 = vmul.f32 0.5, %v8807_v21  ;;  %v3572_v6 = vmul.f32 %v5766_v16, %v3508_v28  ;;  %6164 = vmatprep.subr.bf16.mxu1 %v9673_v49 }
 0x5db   : > { %v3571_v9 = vmul.f32 %v3507_v33, %v3012_v57  ;;  %v3633_v14 = vadd.f32 %v3632_v38, %v3570_v8  ;;  %v3445_v18 = vmul.f32 0.5, %v6557_v34  ;;  %6566 = vtanh.f32 %v3324_v5 }
 0x5dc   : > { %v3510_v46 = vadd.f32 0.5, %v3446_v26  ;;  %6568 = vtanh.f32 %v3323_v58  ;;  %v8810_v1 = vpop.f32.mrb[80].mxu0  ;;  %v3713_v58 = vld [vmem:[%s7326_s13 + $0x140] sm:$0xff] }
 0x5dd   : > { %v6559_v54 = vpop.eup %6558  ;;  %v3634_v36 = vadd.f32 %v3633_v14, %v3571_v9  ;;  %v3509_v52 = vadd.f32 0.5, %v3445_v18  ;;  %v3326_v12 = vmul.f32 0.5, %v8810_v1  ;;  %v8816_v22 = vpop.f32.mrb[81].mxu0  ;;  %6166 = vmatpush3.bf16.msra.mxu1 %v6165_v48  ;;  %v3714_v9 = vld [vmem:[%s7326_s13 + $0x148] sm:$0xff] }
 0x5de   : > { %v6561_v57 = vpop.eup %6560  ;;  %v3448_v16 = vmul.f32 0.5, %v6559_v54  ;;  %v3325_v20 = vmul.f32 0.5, %v8816_v22  ;;  %v3574_v35 = vmul.f32 %v8786_v24, %v3510_v46  ;;  %6167 = vmatprep.subr.bf16.mxu1 %v9673_v49 }
 0x5df   : > { %v3573_v43 = vmul.f32 %v3509_v52, %v8789_v7  ;;  %v3635_v60 = vadd.f32 %v3634_v36, %v3572_v6  ;;  %v3447_v11 = vmul.f32 0.5, %v6561_v57  ;;  %6570 = vtanh.f32 %v3326_v12 }
 0x5e0   : > { %v3512_v13 = vadd.f32 0.5, %v3448_v16  ;;  %6572 = vtanh.f32 %v3325_v20  ;;  %v8823_v0 = vpop.f32.mrb[82].mxu0  ;;  %v6171_v12 = vpack.c.bf16 %v3714_v9, %v3713_v58  ;;  %v3715_v16 = vld [vmem:[%s7326_s13 + $0x150] sm:$0xff]  ;;  %v3716_v20 = vld [vmem:[%s7326_s13 + $0x158] sm:$0xff] }
 0x5e1   : > { %v6563_v39 = vpop.eup %6562  ;;  %v3636_v29 = vadd.f32 %v3635_v60, %v3573_v43  ;;  %v3511_v59 = vadd.f32 0.5, %v3447_v11  ;;  %v3328_v7 = vmul.f32 0.5, %v8823_v0  ;;  %v8828_v63 = vpop.f32.mrb[83].mxu0 }
 0x5e2   : > { %v6565_v40 = vpop.eup %6564  ;;  %v3450_v61 = vmul.f32 0.5, %v6563_v39  ;;  %v3327_v47 = vmul.f32 0.5, %v8828_v63  ;;  %v3576_v24 = vmul.f32 %v8792_v4, %v3512_v13  ;;  %v6168_v4 = vpack.c.bf16 %v3712_v41, %v3711_v25 }
 0x5e3   : > { %v3575_v30 = vmul.f32 %v3511_v59, %v8795_v32  ;;  %v3637_v3 = vadd.f32 %v3636_v29, %v3574_v35  ;;  %v3449_v17 = vmul.f32 0.5, %v6565_v40  ;;  %6574 = vtanh.f32 %v3328_v7  ;;  %v3717_v40 = vld [vmem:[%s7326_s13 + $0x160] sm:$0xff] }
 0x5e4   : > { %6576 = vtanh.f32 %v3327_v47  ;;  %v8835_v53 = vpop.f32.mrb[84].mxu0  ;;  %v3514_v10 = vadd.f32 0.5, %v3450_v61  ;;  %6169 = vmatpush3.bf16.msra.mxu1 %v6168_v4  ;;  %v3718_v61 = vld [vmem:[%s7326_s13 + $0x168] sm:$0xff] }
 0x5e5   : > { %v6567_v42 = vpop.eup %6566  ;;  %v3638_v27 = vadd.f32 %v3637_v3, %v3575_v30  ;;  %v3513_v28 = vadd.f32 0.5, %v3449_v17  ;;  %v3330_v32 = vmul.f32 0.5, %v8835_v53  ;;  %v8839_v19 = vpop.f32.mrb[85].mxu0  ;;  %6170 = vmatprep.subr.bf16.mxu1 %v9673_v49 }
 0x5e6   : > { %v6569_v8 = vpop.eup %6568  ;;  %v3452_v38 = vmul.f32 0.5, %v6567_v42  ;;  %v3329_v33 = vmul.f32 0.5, %v8839_v19  ;;  %v3578_v46 = vmul.f32 %v8798_v23, %v3514_v10  ;;  %v6177_v10 = vpack.c.bf16 %v3718_v61, %v3717_v40 }
 0x5e7   : > { %v3577_v5 = vmul.f32 %v3513_v28, %v8801_v45  ;;  %v3639_v34 = vadd.f32 %v3638_v27, %v3576_v24  ;;  %v3451_v26 = vmul.f32 0.5, %v6569_v8  ;;  %6578 = vtanh.f32 %v3330_v32 }
 0x5e8   : > { %v3516_v14 = vadd.f32 0.5, %v3452_v38  ;;  %6580 = vtanh.f32 %v3329_v33  ;;  %v8845_v18 = vpop.f32.mrb[86].mxu0  ;;  %6172 = vmatpush3.bf16.msra.mxu1 %v6171_v12  ;;  %v3719_v38 = vld [vmem:[%s7326_s13 + $0x170] sm:$0xff]  ;;  %v3720_v33 = vld [vmem:[%s7326_s13 + $0x178] sm:$0xff] }
 0x5e9   : > { %v6571_v6 = vpop.eup %6570  ;;  %v3640_v31 = vadd.f32 %v3639_v34, %v3577_v5  ;;  %v3515_v55 = vadd.f32 0.5, %v3451_v26  ;;  %v3332_v45 = vmul.f32 0.5, %v8845_v18  ;;  %v8850_v37 = vpop.f32.mrb[87].mxu0  ;;  %6173 = vmatprep.subr.bf16.mxu1 %v9673_v49 }
 0x5ea   : > { %v6573_v54 = vpop.eup %6572  ;;  %v3454_v36 = vmul.f32 0.5, %v6571_v6  ;;  %v3331_v52 = vmul.f32 0.5, %v8850_v37  ;;  %v3580_v23 = vmul.f32 %v8804_v51, %v3516_v14  ;;  %v6174_v51 = vpack.c.bf16 %v3716_v20, %v3715_v16 }
 0x5eb   : > { %v3579_v15 = vmul.f32 %v3515_v55, %v8807_v21  ;;  %v3641_v44 = vadd.f32 %v3640_v31, %v3578_v46  ;;  %v3453_v57 = vmul.f32 0.5, %v6573_v54  ;;  %6582 = vtanh.f32 %v3332_v45 }
 0x5ec   : > { %6584 = vtanh.f32 %v3331_v52  ;;  %v8857_v56 = vpop.f32.mrb[88].mxu0  ;;  %v3518_v11 = vadd.f32 0.5, %v3454_v36  ;;  %6175 = vmatpush3.bf16.msra.mxu1 %v6174_v51  ;;  %v6180_v31 = vpack.c.bf16 %v3720_v33, %v3719_v38 }
 0x5ed   : > { %v6575_v43 = vpop.eup %6574  ;;  %v3642_v60 = vadd.f32 %v3641_v44, %v3579_v15  ;;  %v3517_v2 = vadd.f32 0.5, %v3453_v57  ;;  %v3334_v21 = vmul.f32 0.5, %v8857_v56  ;;  %v8861_v62 = vpop.f32.mrb[89].mxu0  ;;  %6176 = vmatprep.subr.bf16.mxu1 %v9673_v49 }
 0x5ee   : > { %v6577_v13 = vpop.eup %6576  ;;  %v3456_v39 = vmul.f32 0.5, %v6575_v43  ;;  %v3333_v35 = vmul.f32 0.5, %v8861_v62  ;;  %v3582_v3 = vmul.f32 %v8810_v1, %v3518_v11 }
 0x5ef   : > { %v3581_v29 = vmul.f32 %v3517_v2, %v8816_v22  ;;  %v3643_v59 = vadd.f32 %v3642_v60, %v3580_v23  ;;  %v3455_v7 = vmul.f32 0.5, %v6577_v13  ;;  %6586 = vtanh.f32 %v3334_v21 }
 0x5f0   : > { %v3520_v47 = vadd.f32 0.5, %v3456_v39  ;;  %6588 = vtanh.f32 %v3333_v35  ;;  %v8867_v48 = vpop.f32.mrb[90].mxu0  ;;  %6178 = vmatpush3.bf16.msra.mxu1 %v6177_v10 }
 0x5f1   : > { %v6579_v30 = vpop.eup %6578  ;;  %v3644_v17 = vadd.f32 %v3643_v59, %v3581_v29  ;;  %v3519_v25 = vadd.f32 0.5, %v3455_v7  ;;  %v3336_v22 = vmul.f32 0.5, %v8867_v48  ;;  %v8872_v41 = vpop.f32.mrb[91].mxu0  ;;  %6179 = vmatprep.subr.bf16.mxu1 %v9673_v49 }
 0x5f2   : > { %v6581_v24 = vpop.eup %6580  ;;  %v3458_v42 = vmul.f32 0.5, %v6579_v30  ;;  %v3335_v27 = vmul.f32 0.5, %v8872_v41  ;;  %v3584_v1 = vmul.f32 %v8823_v0, %v3520_v47 }
 0x5f3   : > { %v3583_v28 = vmul.f32 %v3519_v25, %v8828_v63  ;;  %v3645_v32 = vadd.f32 %v3644_v17, %v3582_v3  ;;  %v3457_v8 = vmul.f32 0.5, %v6581_v24  ;;  %6590 = vtanh.f32 %v3336_v22 }
 0x5f4   : > { %6592 = vtanh.f32 %v3335_v27  ;;  %v8879_v4 = vpop.f32.mrb[92].mxu0  ;;  %v3522_v26 = vadd.f32 0.5, %v3458_v42  ;;  %6181 = vmatpush3.bf16.msra.mxu1 %v6180_v31 }
 0x5f5   : > { %v6583_v5 = vpop.eup %6582  ;;  %v3646_v34 = vadd.f32 %v3645_v32, %v3583_v28  ;;  %v3521_v58 = vadd.f32 0.5, %v3457_v8  ;;  %v3338_v9 = vmul.f32 0.5, %v8879_v4  ;;  %v8883_v63 = vpop.f32.mrb[93].mxu0 }
 0x5f6   : > { %v6585_v14 = vpop.eup %6584  ;;  %v3460_v6 = vmul.f32 0.5, %v6583_v5  ;;  %v3337_v46 = vmul.f32 0.5, %v8883_v63  ;;  %v3586_v12 = vmul.f32 %v8835_v53, %v3522_v26 }
 0x5f7   : > { %v3585_v0 = vmul.f32 %v3521_v58, %v8839_v19  ;;  %v3647_v55 = vadd.f32 %v3646_v34, %v3584_v1  ;;  %v3459_v45 = vmul.f32 0.5, %v6585_v14  ;;  %6594 = vtanh.f32 %v3338_v9  ;;  %v8895_v19 = vld [vmem:[%s7319_s27 + $0x18] sm:$0xff] }
 0x5f8   : > { %v3524_v54 = vadd.f32 0.5, %v3460_v6  ;;  %6596 = vtanh.f32 %v3337_v46  ;;  %v8887_v36 = vpop.f32.mrb[94].mxu0  ;;  %5889 = vmatprep.subr.mxu1 %v8895_v19 }
 0x5f9   : > { %v6587_v52 = vpop.eup %6586  ;;  %v3648_v15 = vadd.f32 %v3647_v55, %v3585_v0  ;;  %v3523_v44 = vadd.f32 0.5, %v3459_v45  ;;  %v3340_v57 = vmul.f32 0.5, %v8887_v36  ;;  %v8892_v16 = vpop.f32.mrb[95].mxu0 }
 0x5fa   : > { %v6589_v20 = vpop.eup %6588  ;;  %v3462_v23 = vmul.f32 0.5, %v6587_v52  ;;  %v3339_v43 = vmul.f32 0.5, %v8892_v16  ;;  %v3588_v53 = vmul.f32 %v8845_v18, %v3524_v54 }
 0x5fb   : > { %v3587_v60 = vmul.f32 %v3523_v44, %v8850_v37  ;;  %v3649_v11 = vadd.f32 %v3648_v15, %v3586_v12  ;;  %v3461_v2 = vmul.f32 0.5, %v6589_v20  ;;  %6598 = vtanh.f32 %v3340_v57 }
 0x5fc   : > { %6600 = vtanh.f32 %v3339_v43  ;;  %v8900_v21 = vpop.f32.mrb[96].mxu0  ;;  %v3526_v35 = vadd.f32 0.5, %v3462_v23 }
 0x5fd   : > { %v6591_v13 = vpop.eup %6590  ;;  %v3650_v39 = vadd.f32 %v3649_v11, %v3587_v60  ;;  %v3525_v51 = vadd.f32 0.5, %v3461_v2  ;;  %v3342_v29 = vmul.f32 0.5, %v8900_v21  ;;  %v8904_v59 = vpop.f32.mrb[97].mxu0 }
 0x5fe   : > { %v6593_v37 = vpop.eup %6592  ;;  %v3464_v7 = vmul.f32 0.5, %v6591_v13  ;;  %v3341_v40 = vmul.f32 0.5, %v8904_v59  ;;  %v3590_v25 = vmul.f32 %v8857_v56, %v3526_v35 }
 0x5ff   : > { %v3589_v61 = vmul.f32 %v3525_v51, %v8861_v62  ;;  %v3651_v18 = vadd.f32 %v3650_v39, %v3588_v53  ;;  %v3463_v47 = vmul.f32 0.5, %v6593_v37  ;;  %6602 = vtanh.f32 %v3342_v29 }
 0x600   : > { %v3528_v30 = vadd.f32 0.5, %v3464_v7  ;;  %6604 = vtanh.f32 %v3341_v40  ;;  %v8908_v3 = vpop.f32.mrb[98].mxu0 }
 0x601   : > { %v6595_v17 = vpop.eup %6594  ;;  %v3652_v22 = vadd.f32 %v3651_v18, %v3589_v61  ;;  %v3527_v24 = vadd.f32 0.5, %v3463_v47  ;;  %v3344_v42 = vmul.f32 0.5, %v8908_v3  ;;  %v8912_v27 = vpop.f32.mrb[99].mxu0 }
 0x602   : > { %v6597_v10 = vpop.eup %6596  ;;  %v3466_v28 = vmul.f32 0.5, %v6595_v17  ;;  %v3343_v62 = vmul.f32 0.5, %v8912_v27  ;;  %v3592_v33 = vmul.f32 %v8867_v48, %v3528_v30 }
 0x603   : > { %v3591_v32 = vmul.f32 %v3527_v24, %v8872_v41  ;;  %v3653_v8 = vadd.f32 %v3652_v22, %v3590_v25  ;;  %v3465_v38 = vmul.f32 0.5, %v6597_v10  ;;  %6606 = vtanh.f32 %v3344_v42 }
 0x604   : > { %6608 = vtanh.f32 %v3343_v62  ;;  %v8917_v1 = vpop.f32.mrb[100].mxu0  ;;  %v3530_v34 = vadd.f32 0.5, %v3466_v28 }
 0x605   : > { %v6599_v56 = vpop.eup %6598  ;;  %v3654_v5 = vadd.f32 %v3653_v8, %v3591_v32  ;;  %v3529_v26 = vadd.f32 0.5, %v3465_v38  ;;  %v3346_v58 = vmul.f32 0.5, %v8917_v1  ;;  %v8920_v9 = vpop.f32.mrb[101].mxu0 }
 0x606   : > { %v6601_v14 = vpop.eup %6600  ;;  %v3468_v6 = vmul.f32 0.5, %v6599_v56  ;;  %v3345_v41 = vmul.f32 0.5, %v8920_v9  ;;  %v3594_v54 = vmul.f32 %v8879_v4, %v3530_v34 }
 0x607   : > { %v3593_v46 = vmul.f32 %v3529_v26, %v8883_v63  ;;  %v3655_v31 = vadd.f32 %v3654_v5, %v3592_v33  ;;  %v3467_v0 = vmul.f32 0.5, %v6601_v14  ;;  %6610 = vtanh.f32 %v3346_v58 }
 0x608   : > { %v3532_v48 = vadd.f32 0.5, %v3468_v6  ;;  %6612 = vtanh.f32 %v3345_v41  ;;  %v8924_v55 = vpop.f32.mrb[102].mxu0 }
 0x609   : > { %v6603_v45 = vpop.eup %6602  ;;  %v3656_v52 = vadd.f32 %v3655_v31, %v3593_v46  ;;  %v3531_v12 = vadd.f32 0.5, %v3467_v0  ;;  %v3348_v15 = vmul.f32 0.5, %v8924_v55  ;;  %v8928_v44 = vpop.f32.mrb[103].mxu0 }
 0x60a   : > { %v6605_v57 = vpop.eup %6604  ;;  %v3470_v20 = vmul.f32 0.5, %v6603_v45  ;;  %v3347_v63 = vmul.f32 0.5, %v8928_v44  ;;  %v3596_v11 = vmul.f32 %v8887_v36, %v3532_v48 }
 0x60b   : > { %v3595_v23 = vmul.f32 %v3531_v12, %v8892_v16  ;;  %v3657_v43 = vadd.f32 %v3656_v52, %v3594_v54  ;;  %v3469_v60 = vmul.f32 0.5, %v6605_v57  ;;  %6614 = vtanh.f32 %v3348_v15 }
 0x60c   : > { %6616 = vtanh.f32 %v3347_v63  ;;  %v8933_v2 = vpop.f32.mrb[104].mxu0  ;;  %v3534_v13 = vadd.f32 0.5, %v3470_v20 }
 0x60d   : > { %v6607_v4 = vpop.eup %6606  ;;  %v3658_v53 = vadd.f32 %v3657_v43, %v3595_v23  ;;  %v3533_v39 = vadd.f32 0.5, %v3469_v60  ;;  %v3350_v35 = vmul.f32 0.5, %v8933_v2  ;;  %v8936_v51 = vpop.f32.mrb[105].mxu0 }
 0x60e   : > { %v6609_v29 = vpop.eup %6608  ;;  %v3472_v37 = vmul.f32 0.5, %v6607_v4  ;;  %v3349_v16 = vmul.f32 0.5, %v8936_v51  ;;  %v3598_v30 = vmul.f32 %v8900_v21, %v3534_v13 }
 0x60f   : > { %v3597_v7 = vmul.f32 %v3533_v39, %v8904_v59  ;;  %v3659_v40 = vadd.f32 %v3658_v53, %v3596_v11  ;;  %v3471_v61 = vmul.f32 0.5, %v6609_v29  ;;  %6618 = vtanh.f32 %v3350_v35 }
 0x610   : > { %v3536_v36 = vadd.f32 0.5, %v3472_v37  ;;  %6620 = vtanh.f32 %v3349_v16  ;;  %v8940_v18 = vpop.f32.mrb[106].mxu0 }
 0x611   : > { %v6611_v47 = vpop.eup %6610  ;;  %v3660_v17 = vadd.f32 %v3659_v40, %v3597_v7  ;;  %v3535_v25 = vadd.f32 0.5, %v3471_v61  ;;  %v3352_v22 = vmul.f32 0.5, %v8940_v18  ;;  %v8944_v24 = vpop.f32.mrb[107].mxu0 }
 0x612   : > { %v6613_v42 = vpop.eup %6612  ;;  %v3600_v10 = vmul.f32 %v8908_v3, %v3536_v36  ;;  %v3474_v59 = vmul.f32 0.5, %v6611_v47  ;;  %v3351_v28 = vmul.f32 0.5, %v8944_v24 }
 0x613   : > { %v8948_v62 = vadd.f32 %v3660_v17, %v3598_v30  ;;  %v3599_v32 = vmul.f32 %v3535_v25, %v8912_v27  ;;  %v3473_v8 = vmul.f32 0.5, %v6613_v42  ;;  %6622 = vtanh.f32 %v3352_v22 }
 0x614   : > { %6624 = vtanh.f32 %v3351_v28  ;;  %v8951_v21 = vpop.f32.mrb[108].mxu0  ;;  %v3538_v56 = vadd.f32 0.5, %v3474_v59 }
 0x615   : > { %v6615_v38 = vpop.eup %6614  ;;  %v3668_v33 = vadd.f32 %v3600_v10, %v3599_v32  ;;  %v3537_v5 = vadd.f32 0.5, %v3473_v8  ;;  %v3354_v34 = vmul.f32 0.5, %v8951_v21  ;;  %v8954_v26 = vpop.f32.mrb[109].mxu0 }
 0x616   : > { %v6617_v3 = vpop.eup %6616  ;;  %v3476_v58 = vmul.f32 0.5, %v6615_v38  ;;  %v3353_v14 = vmul.f32 0.5, %v8954_v26  ;;  %v3602_v0 = vmul.f32 %v8917_v1, %v3538_v56 }
 0x617   : > { %v3601_v6 = vmul.f32 %v3537_v5, %v8920_v9  ;;  %v3475_v27 = vmul.f32 0.5, %v6617_v3  ;;  %6626 = vtanh.f32 %v3354_v34 }
 0x618   : > { %v3540_v41 = vadd.f32 0.5, %v3476_v58  ;;  %6628 = vtanh.f32 %v3353_v14  ;;  %v8958_v46 = vpop.f32.mrb[110].mxu0 }
 0x619   : > { %v6619_v31 = vpop.eup %6618  ;;  %v3669_v48 = vadd.f32 %v3668_v33, %v3601_v6  ;;  %v3539_v45 = vadd.f32 0.5, %v3475_v27  ;;  %v3356_v54 = vmul.f32 0.5, %v8958_v46  ;;  %v8962_v52 = vpop.f32.mrb[111].mxu0 }
 0x61a   : > { %v6621_v12 = vpop.eup %6620  ;;  %v3478_v15 = vmul.f32 0.5, %v6619_v31  ;;  %v3355_v57 = vmul.f32 0.5, %v8962_v52  ;;  %v3604_v23 = vmul.f32 %v8924_v55, %v3540_v41 }
 0x61b   : > { %v3603_v9 = vmul.f32 %v3539_v45, %v8928_v44  ;;  %v3670_v20 = vadd.f32 %v3669_v48, %v3602_v0  ;;  %v3477_v63 = vmul.f32 0.5, %v6621_v12  ;;  %6630 = vtanh.f32 %v3356_v54 }
 0x61c   : > { %v3542_v43 = vadd.f32 0.5, %v3478_v15  ;;  %v8967_v60 = vpop.f32.mrb[112].mxu0  ;;  %6632 = vtanh.f32 %v3355_v57 }
 0x61d   : > { %v6623_v1 = vpop.eup %6622  ;;  %v3671_v11 = vadd.f32 %v3670_v20, %v3603_v9  ;;  %v3541_v4 = vadd.f32 0.5, %v3477_v63  ;;  %v3358_v53 = vmul.f32 0.5, %v8967_v60  ;;  %v8970_v13 = vpop.f32.mrb[113].mxu0 }
 0x61e   : > { %v6625_v39 = vpop.eup %6624  ;;  %v3480_v35 = vmul.f32 0.5, %v6623_v1  ;;  %v3357_v44 = vmul.f32 0.5, %v8970_v13  ;;  %v3606_v61 = vmul.f32 %v8933_v2, %v3542_v43 }
 0x61f   : > { %v3605_v29 = vmul.f32 %v3541_v4, %v8936_v51  ;;  %v3672_v37 = vadd.f32 %v3671_v11, %v3604_v23  ;;  %v3479_v55 = vmul.f32 0.5, %v6625_v39  ;;  %6634 = vtanh.f32 %v3358_v53 }
 0x620   : > { %v3544_v16 = vadd.f32 0.5, %v3480_v35  ;;  %6636 = vtanh.f32 %v3357_v44  ;;  %v8974_v7 = vpop.f32.mrb[114].mxu0 }
 0x621   : > { %v6627_v40 = vpop.eup %6626  ;;  %v3673_v36 = vadd.f32 %v3672_v37, %v3605_v29  ;;  %v3543_v47 = vadd.f32 0.5, %v3479_v55  ;;  %v3360_v30 = vmul.f32 0.5, %v8974_v7  ;;  %v8978_v17 = vpop.f32.mrb[115].mxu0 }
 0x622   : > { %v6629_v25 = vpop.eup %6628  ;;  %v3482_v22 = vmul.f32 0.5, %v6627_v40  ;;  %v3359_v51 = vmul.f32 0.5, %v8978_v17  ;;  %v3608_v28 = vmul.f32 %v8940_v18, %v3544_v16 }
 0x623   : > { %v3607_v42 = vmul.f32 %v3543_v47, %v8944_v24  ;;  %v3674_v10 = vadd.f32 %v3673_v36, %v3606_v61  ;;  %v3481_v59 = vmul.f32 0.5, %v6629_v25  ;;  %6638 = vtanh.f32 %v3360_v30 }
 0x624   : > { %6640 = vtanh.f32 %v3359_v51  ;;  %v8983_v32 = vpop.f32.mrb[116].mxu0  ;;  %v3546_v8 = vadd.f32 0.5, %v3482_v22 }
 0x625   : > { %v3675_v2 = vadd.f32 %v3674_v10, %v3607_v42  ;;  %v3545_v38 = vadd.f32 0.5, %v3481_v59  ;;  %v3362_v33 = vmul.f32 0.5, %v8983_v32  ;;  %v8986_v56 = vpop.f32.mrb[117].mxu0  ;;  %v6631_v5 = vpop.eup %6630 }
 0x626   : > { %v3361_v34 = vmul.f32 0.5, %v8986_v56  ;;  %v6633_v3 = vpop.eup %6632  ;;  %v3484_v14 = vmul.f32 0.5, %v6631_v5  ;;  %v3610_v41 = vmul.f32 %v8951_v21, %v3546_v8 }
 0x627   : > { %v3609_v24 = vmul.f32 %v3545_v38, %v8954_v26  ;;  %v3676_v58 = vadd.f32 %v3675_v2, %v3608_v28  ;;  %6642 = vtanh.f32 %v3362_v33  ;;  %v3483_v18 = vmul.f32 0.5, %v6633_v3 }
 0x628   : > { %6644 = vtanh.f32 %v3361_v34  ;;  %v8990_v6 = vpop.f32.mrb[118].mxu0  ;;  %v3548_v0 = vadd.f32 0.5, %v3484_v14 }
 0x629   : > { %v6635_v27 = vpop.eup %6634  ;;  %v3677_v31 = vadd.f32 %v3676_v58, %v3609_v24  ;;  %v3364_v48 = vmul.f32 0.5, %v8990_v6  ;;  %v8994_v45 = vpop.f32.mrb[119].mxu0  ;;  %v3547_v12 = vadd.f32 0.5, %v3483_v18 }
 0x62a   : > { %v6637_v54 = vpop.eup %6636  ;;  %v3486_v15 = vmul.f32 0.5, %v6635_v27  ;;  %v3363_v26 = vmul.f32 0.5, %v8994_v45  ;;  %v3612_v23 = vmul.f32 %v8958_v46, %v3548_v0 }
 0x62b   : > { %v3678_v57 = vadd.f32 %v3677_v31, %v3610_v41  ;;  %v3485_v9 = vmul.f32 0.5, %v6637_v54  ;;  %6646 = vtanh.f32 %v3364_v48  ;;  %v3611_v20 = vmul.f32 %v3547_v12, %v8962_v52 }
 0x62c   : > { %6648 = vtanh.f32 %v3363_v26  ;;  %v8998_v63 = vpop.f32.mrb[120].mxu0  ;;  %v3550_v39 = vadd.f32 0.5, %v3486_v15 }
 0x62d   : > { %v6639_v21 = vpop.eup %6638  ;;  %v3549_v43 = vadd.f32 0.5, %v3485_v9  ;;  %v3366_v1 = vmul.f32 0.5, %v8998_v63  ;;  %v9002_v11 = vpop.f32.mrb[121].mxu0  ;;  %v3679_v53 = vadd.f32 %v3678_v57, %v3611_v20 }
 0x62e   : > { %v6641_v4 = vpop.eup %6640  ;;  %v3488_v35 = vmul.f32 0.5, %v6639_v21  ;;  %v3365_v44 = vmul.f32 0.5, %v9002_v11  ;;  %v3614_v30 = vmul.f32 %v8967_v60, %v3550_v39 }
 0x62f   : > { %v3613_v29 = vmul.f32 %v3549_v43, %v8970_v13  ;;  %v3487_v52 = vmul.f32 0.5, %v6641_v4  ;;  %6650 = vtanh.f32 %v3366_v1  ;;  %v3680_v37 = vadd.f32 %v3679_v53, %v3612_v23 }
 0x630   : > { %6652 = vtanh.f32 %v3365_v44  ;;  %v9006_v55 = vpop.f32.mrb[122].mxu0  ;;  %v3552_v16 = vadd.f32 0.5, %v3488_v35 }
 0x631   : > { %v6643_v46 = vpop.eup %6642  ;;  %v3551_v40 = vadd.f32 0.5, %v3487_v52  ;;  %v3368_v61 = vmul.f32 0.5, %v9006_v55  ;;  %v9009_v36 = vpop.f32.mrb[123].mxu0  ;;  %v3681_v25 = vadd.f32 %v3680_v37, %v3613_v29 }
 0x632   : > { %v6645_v47 = vpop.eup %6644  ;;  %v3490_v22 = vmul.f32 0.5, %v6643_v46  ;;  %v3367_v13 = vmul.f32 0.5, %v9009_v36  ;;  %v3616_v2 = vmul.f32 %v8974_v7, %v3552_v16 }
 0x633   : > { %v3615_v51 = vmul.f32 %v3551_v40, %v8978_v17  ;;  %v3489_v42 = vmul.f32 0.5, %v6645_v47  ;;  %6654 = vtanh.f32 %v3368_v61  ;;  %v3682_v10 = vadd.f32 %v3681_v25, %v3614_v30 }
 0x634   : > { %6656 = vtanh.f32 %v3367_v13  ;;  %v9014_v59 = vpop.f32.mrb[124].mxu0  ;;  %v3554_v34 = vadd.f32 0.5, %v3490_v22 }
 0x635   : > { %v6647_v28 = vpop.eup %6646  ;;  %v3553_v8 = vadd.f32 0.5, %v3489_v42  ;;  %v3370_v38 = vmul.f32 0.5, %v9014_v59  ;;  %v3282_v33 = vpop.f32.mrb[125].mxu0  ;;  %v3683_v5 = vadd.f32 %v3682_v10, %v3615_v51 }
 0x636   : > { %v6649_v60 = vpop.eup %6648  ;;  %v3492_v3 = vmul.f32 0.5, %v6647_v28  ;;  %v3369_v24 = vmul.f32 0.5, %v3282_v33  ;;  %v3618_v54 = vmul.f32 %v8983_v32, %v3554_v34 }
 0x637   : > { %v3617_v17 = vmul.f32 %v3553_v8, %v8986_v56  ;;  %v3491_v58 = vmul.f32 0.5, %v6649_v60  ;;  %6658 = vtanh.f32 %v3370_v38  ;;  %v3684_v14 = vadd.f32 %v3683_v5, %v3616_v2 }
 0x638   : > { %6660 = vtanh.f32 %v3369_v24  ;;  %v9019_v18 = vpop.f32.mrb[126].mxu0  ;;  %v3556_v41 = vadd.f32 0.5, %v3492_v3 }
 0x639   : > { %v6651_v27 = vpop.eup %6650  ;;  %v3555_v7 = vadd.f32 0.5, %v3491_v58  ;;  %v3372_v31 = vmul.f32 0.5, %v9019_v18  ;;  %v3292_v0 = vpop.f32.mrb[127].mxu0  ;;  %v3685_v12 = vadd.f32 %v3684_v14, %v3617_v17 }
 0x63a   : > { %v6653_v48 = vpop.eup %6652  ;;  %v3494_v15 = vmul.f32 0.5, %v6651_v27  ;;  %v3371_v26 = vmul.f32 0.5, %v3292_v0  ;;  %v3620_v23 = vmul.f32 %v8990_v6, %v3556_v41  ;;  %v3662_v27 = vrot.slane %v8948_v62, 4 }
 0x63b   : > { %v3619_v56 = vmul.f32 %v3555_v7, %v8994_v45  ;;  %v3493_v57 = vmul.f32 0.5, %v6653_v48  ;;  %6662 = vtanh.f32 %v3372_v31  ;;  %v3686_v9 = vadd.f32 %v3685_v12, %v3618_v54 }
 0x63c   : > { %6664 = vtanh.f32 %v3371_v26  ;;  %v5853_v20 = vpop.f32.mrb[128].mxu0  ;;  %v3558_v35 = vadd.f32 0.5, %v3494_v15  ;;  %v3663_v54 = vadd.f32 %v3662_v27, %v8948_v62  ;;  %v6862_v62 = vld [vmem:[%s9575_s0] sm:$0xff]  ;;  %v6901_v27 = vld [vmem:[%s9575_s0 + $0x138] sm:$0xff] }
 0x63d   : > { %v6655_v21 = vpop.eup %6654  ;;  %v3557_v43 = vadd.f32 0.5, %v3493_v57  ;;  %v3374_v1 = vmul.f32 0.5, %v5853_v20  ;;  %v3302_v4 = vpop.f32.mrb[129].mxu0  ;;  %v3687_v39 = vadd.f32 %v3686_v9, %v3619_v56 }
 0x63e   : > { %v6657_v53 = vpop.eup %6656  ;;  %v3496_v32 = vmul.f32 0.5, %v6655_v21  ;;  %v3373_v44 = vmul.f32 0.5, %v3302_v4  ;;  %v3622_v40 = vmul.f32 %v8998_v63, %v3558_v35  ;;  %v6866_v35 = vld [vmem:[%s9575_s0 + $0x20] sm:$0xff] }
 0x63f   : > { %v3621_v29 = vmul.f32 %v3557_v43, %v9002_v11  ;;  %v3495_v52 = vmul.f32 0.5, %v6657_v53  ;;  %6666 = vtanh.f32 %v3374_v1  ;;  %v3688_v45 = vadd.f32 %v3687_v39, %v3620_v23 }
 0x640   : > { %6668 = vtanh.f32 %v3373_v44  ;;  %v3560_v61 = vadd.f32 0.5, %v3496_v32  ;;  %v6867_v32 = vld [vmem:[%s9575_s0 + $0x28] sm:$0xff]  ;;  %v6868_v44 = vld [vmem:[%s9575_s0 + $0x30] sm:$0xff] }
 0x641   : > { %v6659_v37 = vpop.eup %6658  ;;  %v3559_v46 = vadd.f32 0.5, %v3495_v52  ;;  %v3689_v6 = vadd.f32 %v3688_v45, %v3621_v29  ;;  %v6869_v29 = vld [vmem:[%s9575_s0 + $0x38] sm:$0xff]  ;;  %v6870_v52 = vld [vmem:[%s9575_s0 + $0x40] sm:$0xff]  ;;  %v6871_v45 = vld [vmem:[%s9575_s0 + $0x48] sm:$0xff] }
 0x642   : > { %v6661_v16 = vpop.eup %6660  ;;  %v3498_v47 = vmul.f32 0.5, %v6659_v37  ;;  %v3624_v11 = vmul.f32 %v9006_v55, %v3560_v61  ;;  %v6872_v37 = vld [vmem:[%s9575_s0 + $0x50] sm:$0xff]  ;;  %v6877_v61 = vld [vmem:[%s9575_s0 + $0x78] sm:$0xff] }
 0x643   : > { %v3623_v30 = vmul.f32 %v3559_v46, %v9009_v36  ;;  %v3497_v25 = vmul.f32 0.5, %v6661_v16  ;;  %v3690_v22 = vadd.f32 %v3689_v6, %v3622_v40  ;;  %v6873_v46 = vld [vmem:[%s9575_s0 + $0x58] sm:$0xff]  ;;  %v6874_v16 = vld [vmem:[%s9575_s0 + $0x60] sm:$0xff]  ;;  %v6875_v40 = vld [vmem:[%s9575_s0 + $0x68] sm:$0xff] }
 0x644   : > { %v3562_v28 = vadd.f32 0.5, %v3498_v47  ;;  %v6876_v6 = vld [vmem:[%s9575_s0 + $0x70] sm:$0xff]  ;;  %v6878_v47 = vld [vmem:[%s9575_s0 + $0x80] sm:$0xff] }
 0x645   : > { %v6663_v13 = vpop.eup %6662  ;;  %v3561_v51 = vadd.f32 0.5, %v3497_v25  ;;  %v3691_v10 = vadd.f32 %v3690_v22, %v3623_v30  ;;  %v6879_v30 = vld [vmem:[%s9575_s0 + $0x88] sm:$0xff]  ;;  %v6880_v25 = vld [vmem:[%s9575_s0 + $0x90] sm:$0xff]  ;;  %v6881_v22 = vld [vmem:[%s9575_s0 + $0x98] sm:$0xff] }
 0x646   : > { %v6665_v42 = vpop.eup %6664  ;;  %v3500_v2 = vmul.f32 0.5, %v6663_v13  ;;  %v3626_v3 = vmul.f32 %v9014_v59, %v3562_v28  ;;  %v3664_v59 = vrot.slane %v3663_v54, 2  ;;  %v6882_v13 = vld [vmem:[%s9575_s0 + $0xa0] sm:$0xff]  ;;  %v6887_v28 = vld [vmem:[%s9575_s0 + $0xc8] sm:$0xff] }
 0x647   : > { %v3625_v8 = vmul.f32 %v3561_v51, %v3282_v33  ;;  %v3499_v38 = vmul.f32 0.5, %v6665_v42  ;;  %v3692_v60 = vadd.f32 %v3691_v10, %v3624_v11  ;;  %v6883_v51 = vld [vmem:[%s9575_s0 + $0xa8] sm:$0xff]  ;;  %v6884_v42 = vld [vmem:[%s9575_s0 + $0xb0] sm:$0xff]  ;;  %v6885_v11 = vld [vmem:[%s9575_s0 + $0xb8] sm:$0xff] }
 0x648   : > { %v3564_v36 = vadd.f32 0.5, %v3500_v2  ;;  %v3665_v9 = vadd.f32 %v3664_v59, %v3663_v54  ;;  %v6886_v10 = vld [vmem:[%s9575_s0 + $0xc0] sm:$0xff]  ;;  %v6888_v2 = vld [vmem:[%s9575_s0 + $0xd0] sm:$0xff] }
 0x649   : > { %v6667_v5 = vpop.eup %6666  ;;  %v3563_v63 = vadd.f32 0.5, %v3499_v38  ;;  %v3693_v24 = vadd.f32 %v3692_v60, %v3625_v8  ;;  %v6889_v8 = vld [vmem:[%s9575_s0 + $0xd8] sm:$0xff]  ;;  %v6890_v38 = vld [vmem:[%s9575_s0 + $0xe0] sm:$0xff]  ;;  %v6891_v60 = vld [vmem:[%s9575_s0 + $0xe8] sm:$0xff] }
 0x64a   : > { %v6669_v34 = vpop.eup %6668  ;;  %v3502_v17 = vmul.f32 0.5, %v6667_v5  ;;  %v3628_v7 = vmul.f32 %v9019_v18, %v3564_v36  ;;  %v3666_v43 = vrot.slane %v3665_v9, 1  ;;  %v6892_v5 = vld [vmem:[%s9575_s0 + $0xf0] sm:$0xff]  ;;  %v6897_v36 = vld [vmem:[%s9575_s0 + $0x118] sm:$0xff] }
 0x64b   : > { %v3627_v58 = vmul.f32 %v3563_v63, %v3292_v0  ;;  %v3501_v14 = vmul.f32 0.5, %v6669_v34  ;;  %v3694_v41 = vadd.f32 %v3693_v24, %v3626_v3  ;;  %v6893_v63 = vld [vmem:[%s9575_s0 + $0xf8] sm:$0xff]  ;;  %v6894_v34 = vld [vmem:[%s9575_s0 + $0x100] sm:$0xff]  ;;  %v6895_v3 = vld [vmem:[%s9575_s0 + $0x108] sm:$0xff] }
 0x64c   : > { %v3566_v33 = vadd.f32 0.5, %v3502_v17  ;;  %v3667_v53 = vadd.f32 %v3666_v43, %v3665_v9  ;;  %v6896_v24 = vld [vmem:[%s9575_s0 + $0x110] sm:$0xff]  ;;  %v6898_v17 = vld [vmem:[%s9575_s0 + $0x120] sm:$0xff]  ;;  %v6915_v9 = vld [vmem:[%s9575_s0 + $0x1a8] sm:$0xff] }
 0x64d   : > { %v3565_v55 = vadd.f32 0.5, %v3501_v14  ;;  %v3695_v31 = vadd.f32 %v3694_v41, %v3627_v58  ;;  %v6899_v58 = vld [vmem:[%s9575_s0 + $0x128] sm:$0xff]  ;;  %v6900_v14 = vld [vmem:[%s9575_s0 + $0x130] sm:$0xff]  ;;  %v6902_v41 = vld [vmem:[%s9575_s0 + $0x140] sm:$0xff] }
 0x64e   : > { %v3630_v15 = vmul.f32 %v5853_v20, %v3566_v33  ;;  %v6863_v20 = vld [vmem:[%s9575_s0 + $0x8] sm:$0xff]  ;;  %v6906_v33 = vld [vmem:[%s9575_s0 + $0x160] sm:$0xff]  ;;  %v6908_v54 = vld [vmem:[%s9575_s0 + $0x170] sm:$0xff] }
 0x64f   : > { %v3629_v48 = vmul.f32 %v3565_v55, %v3302_v4  ;;  %v3696_v12 = vadd.f32 %v3695_v31, %v3628_v7  ;;  %v6864_v4 = vld [vmem:[%s9575_s0 + $0x10] sm:$0xff]  ;;  %v6903_v55 = vld [vmem:[%s9575_s0 + $0x148] sm:$0xff]  ;;  %v6905_v31 = vld [vmem:[%s9575_s0 + $0x158] sm:$0xff] }
 0x650   : > { %v6904_v7 = vld [vmem:[%s9575_s0 + $0x150] sm:$0xff]  ;;  %v6919_v43 = vld [vmem:[%s9575_s0 + $0x1c8] sm:$0xff] }
 0x651   : > { %v3697_v26 = vadd.f32 %v3696_v12, %v3629_v48  ;;  %v6907_v48 = vld [vmem:[%s9575_s0 + $0x168] sm:$0xff]  ;;  %v6909_v12 = vld [vmem:[%s9575_s0 + $0x178] sm:$0xff]  ;;  %v6912_v59 = vld [vmem:[%s9575_s0 + $0x190] sm:$0xff] }
 0x653   : > { %v3698_v56 = vadd.f32 %v3697_v26, %v3630_v15  ;;  %v6910_v15 = vld [vmem:[%s9575_s0 + $0x180] sm:$0xff]  ;;  %v6911_v26 = vld [vmem:[%s9575_s0 + $0x188] sm:$0xff] }
 0x655   : > { %v3699_v57 = vrot.slane %v3698_v56, 4 }
 0x657   : > { %v3700_v0 = vadd.f32 %v3699_v57, %v3698_v56  ;;  %v6913_v56 = vld [vmem:[%s9575_s0 + $0x198] sm:$0xff]  ;;  %v6914_v57 = vld [vmem:[%s9575_s0 + $0x1a0] sm:$0xff] }
 0x659   : > { %v3701_v21 = vrot.slane %v3700_v0, 2 }
 0x65b   : > { %v3702_v23 = vadd.f32 %v3701_v21, %v3700_v0  ;;  %v6916_v0 = vld [vmem:[%s9575_s0 + $0x1b0] sm:$0xff]  ;;  %v6917_v21 = vld [vmem:[%s9575_s0 + $0x1b8] sm:$0xff] }
 0x65d   : > { %v3703_v1 = vrot.slane %v3702_v23, 1 }
 0x65f   : > { %v3704_v39 = vadd.f32 %v3703_v1, %v3702_v23  ;;  %v6918_v23 = vld [vmem:[%s9575_s0 + $0x1c0] sm:$0xff]  ;;  %v6920_v1 = vld [vmem:[%s9575_s0 + $0x1d0] sm:$0xff] }
 0x661   : > { %v3723_v18 = vsel %vm2778_vm4, %v3704_v39, %v3667_v53  ;;  %v6921_v53 = vld [vmem:[%s9575_s0 + $0x1d8] sm:$0xff]  ;;  %v6922_v39 = vld [vmem:[%s9575_s0 + $0x1e0] sm:$0xff] }
 0x662   : > { %5887 = vmatmul.mubr.f32.vlgmr.msra.gmra.mrb[66].mxu1 %v3723_v18  ;;  %v6923_v18 = vld [vmem:[%s9575_s0 + $0x1e8] sm:$0xff] }
 0x663   : > { %5890 = vmatpush3.msra.mxu1 %v8895_v19  ;;  %5891 = vmatprep.mubr.msk.f32.mxu1 %vm992_vm2, %v6862_v62  ;;  %v6865_v19 = vld [vmem:[%s9575_s0 + $0x18] sm:$0xff]  ;;  %v6924_v62 = vld [vmem:[%s9575_s0 + $0x1f0] sm:$0xff] }
 0x666   : > { %5892 = vmatmul.mubr.msk.f32.vlgmr.msra.gmra.mrb[68].mxu1 %vm992_vm2, %v6863_v20  ;;  %v6925_v20 = vld [vmem:[%s9575_s0 + $0x1f8] sm:$0xff] }
 0x667   : > { %5894 = vmatprep.mubr.msk.f32.mxu1 %vm992_vm2, %v6864_v4  ;;  %v4576_v4 = vld [vmem:[%s7326_s13 + $0x180] sm:$0xff] }
 0x66a   : > { %5895 = vmatmul.mubr.msk.f32.gmra.mrb[70].mxu1 %vm992_vm2, %v6865_v19  ;;  %v4577_v19 = vld [vmem:[%s7326_s13 + $0x188] sm:$0xff] }
 0x66b   : > { %5897 = vmatprep.mubr.msk.f32.mxu1 %vm992_vm2, %v6866_v35  ;;  %v6183_v35 = vpack.c.bf16 %v4577_v19, %v4576_v4 }
 0x66d   : > { %6184 = vmatpush3.bf16.msra.mxu0 %v6183_v35 }
 0x66e   : > { %5898 = vmatmul.mubr.msk.f32.gmra.mrb[72].mxu1 %vm992_vm2, %v6867_v32  ;;  %6185 = vmatprep.subr.bf16.mxu0 %v9673_v49  ;;  %v4578_v32 = vld [vmem:[%s7326_s13 + $0x190] sm:$0xff] }
 0x66f   : > { %5900 = vmatprep.mubr.msk.f32.mxu1 %vm992_vm2, %v6868_v44  ;;  %v4579_v44 = vld [vmem:[%s7326_s13 + $0x198] sm:$0xff] }
 0x672   : > { %5901 = vmatmul.mubr.msk.f32.gmra.mrb[74].mxu1 %vm992_vm2, %v6869_v29  ;;  %v6186_v29 = vpack.c.bf16 %v4579_v44, %v4578_v32 }
 0x673   : > { %5903 = vmatprep.mubr.msk.f32.mxu1 %vm992_vm2, %v6870_v52  ;;  %v4580_v52 = vld [vmem:[%s7326_s13 + $0x1a0] sm:$0xff] }
 0x674   : > { %6187 = vmatpush3.bf16.msra.mxu0 %v6186_v29 }
 0x675   : > { %6188 = vmatprep.subr.bf16.mxu0 %v9673_v49 }
 0x676   : > { %5904 = vmatmul.mubr.msk.f32.gmra.mrb[76].mxu1 %vm992_vm2, %v6871_v45  ;;  %v4581_v45 = vld [vmem:[%s7326_s13 + $0x1a8] sm:$0xff] }
 0x677   : > { %5906 = vmatprep.mubr.msk.f32.mxu1 %vm992_vm2, %v6872_v37  ;;  %v6189_v37 = vpack.c.bf16 %v4581_v45, %v4580_v52 }
 0x679   : > { %6190 = vmatpush3.bf16.msra.mxu0 %v6189_v37 }
 0x67a   : > { %5907 = vmatmul.mubr.msk.f32.gmra.mrb[78].mxu1 %vm992_vm2, %v6873_v46  ;;  %6191 = vmatprep.subr.bf16.mxu0 %v9673_v49  ;;  %v4582_v46 = vld [vmem:[%s7326_s13 + $0x1b0] sm:$0xff] }
 0x67b   : > { %5909 = vmatprep.mubr.msk.f32.mxu1 %vm992_vm2, %v6874_v16  ;;  %v4583_v16 = vld [vmem:[%s7326_s13 + $0x1b8] sm:$0xff] }
 0x67e   : > { %5910 = vmatmul.mubr.msk.f32.gmra.mrb[80].mxu1 %vm992_vm2, %v6875_v40  ;;  %v6192_v40 = vpack.c.bf16 %v4583_v16, %v4582_v46 }
 0x67f   : > { %5912 = vmatprep.mubr.msk.f32.mxu1 %vm992_vm2, %v6876_v6  ;;  %v4584_v6 = vld [vmem:[%s7326_s13 + $0x1c0] sm:$0xff] }
 0x680   : > { %6193 = vmatpush3.bf16.msra.mxu0 %v6192_v40 }
 0x681   : > { %6194 = vmatprep.subr.bf16.mxu0 %v9673_v49 }
 0x682   : > { %5913 = vmatmul.mubr.msk.f32.gmra.mrb[82].mxu1 %vm992_vm2, %v6877_v61  ;;  %v4585_v61 = vld [vmem:[%s7326_s13 + $0x1c8] sm:$0xff] }
 0x683   : > { %5915 = vmatprep.mubr.msk.f32.mxu1 %vm992_vm2, %v6878_v47  ;;  %v6195_v47 = vpack.c.bf16 %v4585_v61, %v4584_v6 }
 0x685   : > { %6196 = vmatpush3.bf16.msra.mxu0 %v6195_v47 }
 0x686   : > { %5916 = vmatmul.mubr.msk.f32.gmra.mrb[84].mxu1 %vm992_vm2, %v6879_v30  ;;  %6197 = vmatprep.subr.bf16.mxu0 %v9673_v49 }
 0x687   : > { %5918 = vmatprep.mubr.msk.f32.mxu1 %vm992_vm2, %v6880_v25 }
 0x68a   : > { %5919 = vmatmul.mubr.msk.f32.gmra.mrb[86].mxu1 %vm992_vm2, %v6881_v22 }
 0x68b   : > { %5921 = vmatprep.mubr.msk.f32.mxu1 %vm992_vm2, %v6882_v13 }
 0x68e   : > { %5922 = vmatmul.mubr.msk.f32.gmra.mrb[88].mxu1 %vm992_vm2, %v6883_v51 }
 0x68f   : > { %5924 = vmatprep.mubr.msk.f32.mxu1 %vm992_vm2, %v6884_v42 }
 0x692   : > { %5925 = vmatmul.mubr.msk.f32.gmra.mrb[90].mxu1 %vm992_vm2, %v6885_v11 }
 0x693   : > { %5927 = vmatprep.mubr.msk.f32.mxu1 %vm992_vm2, %v6886_v10 }
 0x696   : > { %5928 = vmatmul.mubr.msk.f32.gmra.mrb[92].mxu1 %vm992_vm2, %v6887_v28 }
 0x697   : > { %5930 = vmatprep.mubr.msk.f32.mxu1 %vm992_vm2, %v6888_v2 }
 0x69a   : > { %5931 = vmatmul.mubr.msk.f32.gmra.mrb[94].mxu1 %vm992_vm2, %v6889_v8 }
 0x69b   : > { %5933 = vmatprep.mubr.msk.f32.mxu1 %vm992_vm2, %v6890_v38  ;;  %v4586_v38 = vld [vmem:[%s7326_s13 + $0x1d0] sm:$0xff] }
 0x69e   : > { %5934 = vmatmul.mubr.msk.f32.gmra.mrb[96].mxu1 %vm992_vm2, %v6891_v60  ;;  %v4587_v60 = vld [vmem:[%s7326_s13 + $0x1d8] sm:$0xff] }
 0x69f   : > { %5936 = vmatprep.mubr.msk.f32.mxu1 %vm992_vm2, %v6892_v5  ;;  %v6198_v5 = vpack.c.bf16 %v4587_v60, %v4586_v38 }
 0x6a1   : > { %6199 = vmatpush3.bf16.msra.mxu0 %v6198_v5  ;;  %v4588_v5 = vld [vmem:[%s7326_s13 + $0x1e0] sm:$0xff] }
 0x6a2   : > { %5937 = vmatmul.mubr.msk.f32.gmra.mrb[98].mxu1 %vm992_vm2, %v6893_v63  ;;  %6200 = vmatprep.subr.bf16.mxu0 %v9673_v49 }
 0x6a3   : > { %5939 = vmatprep.mubr.msk.f32.mxu1 %vm992_vm2, %v6894_v34 }
 0x6a6   : > { %5940 = vmatmul.mubr.msk.f32.gmra.mrb[100].mxu1 %vm992_vm2, %v6895_v3 }
 0x6a7   : > { %5942 = vmatprep.mubr.msk.f32.mxu1 %vm992_vm2, %v6896_v24 }
 0x6aa   : > { %5943 = vmatmul.mubr.msk.f32.gmra.mrb[102].mxu1 %vm992_vm2, %v6897_v36 }
 0x6ab   : > { %5945 = vmatprep.mubr.msk.f32.mxu1 %vm992_vm2, %v6898_v17 }
 0x6ae   : > { %5946 = vmatmul.mubr.msk.f32.gmra.mrb[104].mxu1 %vm992_vm2, %v6899_v58 }
 0x6af   : > { %5948 = vmatprep.mubr.msk.f32.mxu1 %vm992_vm2, %v6900_v14 }
 0x6b2   : > { %5949 = vmatmul.mubr.msk.f32.gmra.mrb[106].mxu1 %vm992_vm2, %v6901_v27 }
 0x6b3   : > { %5951 = vmatprep.mubr.msk.f32.mxu1 %vm992_vm2, %v6902_v41 }
 0x6b6   : > { %5952 = vmatmul.mubr.msk.f32.gmra.mrb[108].mxu1 %vm992_vm2, %v6903_v55 }
 0x6b7   : > { %5954 = vmatprep.mubr.msk.f32.mxu1 %vm992_vm2, %v6904_v7 }
 0x6ba   : > { %5955 = vmatmul.mubr.msk.f32.gmra.mrb[110].mxu1 %vm992_vm2, %v6905_v31 }
 0x6bb   : > { %5957 = vmatprep.mubr.msk.f32.mxu1 %vm992_vm2, %v6906_v33 }
 0x6be   : > { %5958 = vmatmul.mubr.msk.f32.gmra.mrb[112].mxu1 %vm992_vm2, %v6907_v48 }
 0x6bf   : > { %5960 = vmatprep.mubr.msk.f32.mxu1 %vm992_vm2, %v6908_v54 }
 0x6c2   : > { %5961 = vmatmul.mubr.msk.f32.gmra.mrb[114].mxu1 %vm992_vm2, %v6909_v12 }
 0x6c3   : > { %5963 = vmatprep.mubr.msk.f32.mxu1 %vm992_vm2, %v6910_v15 }
 0x6c6   : > { %5964 = vmatmul.mubr.msk.f32.gmra.mrb[116].mxu1 %vm992_vm2, %v6911_v26 }
 0x6c7   : > { %5966 = vmatprep.mubr.msk.f32.mxu1 %vm992_vm2, %v6912_v59 }
 0x6ca   : > { %5967 = vmatmul.mubr.msk.f32.gmra.mrb[118].mxu1 %vm992_vm2, %v6913_v56 }
 0x6cb   : > { %5969 = vmatprep.mubr.msk.f32.mxu1 %vm992_vm2, %v6914_v57 }
 0x6ce   : > { %5970 = vmatmul.mubr.msk.f32.gmra.mrb[120].mxu1 %vm992_vm2, %v6915_v9 }
 0x6cf   : > { %5972 = vmatprep.mubr.msk.f32.mxu1 %vm992_vm2, %v6916_v0 }
 0x6d2   : > { %5973 = vmatmul.mubr.msk.f32.gmra.mrb[122].mxu1 %vm992_vm2, %v6917_v21 }
 0x6d3   : > { %5975 = vmatprep.mubr.msk.f32.mxu1 %vm992_vm2, %v6918_v23 }
 0x6d6   : > { %5976 = vmatmul.mubr.msk.f32.gmra.mrb[124].mxu1 %vm992_vm2, %v6919_v43 }
 0x6d7   : > { %5978 = vmatprep.mubr.msk.f32.mxu1 %vm992_vm2, %v6920_v1 }
 0x6da   : > { %5979 = vmatmul.mubr.msk.f32.gmra.mrb[126].mxu1 %vm992_vm2, %v6921_v53 }
 0x6db   : > { %5981 = vmatprep.mubr.msk.f32.mxu1 %vm992_vm2, %v6922_v39 }
 0x6de   : > { %5982 = vmatmul.mubr.msk.f32.gmra.mrb[128].mxu1 %vm992_vm2, %v6923_v18 }
 0x6df   : > { %5984 = vmatprep.mubr.msk.f32.mxu1 %vm992_vm2, %v6924_v62 }
 0x6e2   : > { %5985 = vmatmul.mubr.msk.f32.gmra.mrb[130].mxu1 %vm992_vm2, %v6925_v20 }
 0x735   : > { %v3791_v30 = vpop.f32.mrb[66].mxu1 }
 0x736   : > { %v9307_v25 = vadd.f32 %v3791_v30, %v8784_v50  ;;  %v5888_v22 = vpop.f32.mrb[67].mxu1 }
 0x739   : > { %v5893_v13 = vpop.f32.mrb[68].mxu1 }
 0x73a   : > { %v4183_v51 = vmul.f32 0.5, %v5893_v13  ;;  %v3863_v42 = vpop.f32.mrb[69].mxu1 }
 0x73b   : > { %v4182_v11 = vmul.f32 0.5, %v3863_v42 }
 0x73c   : > { %6670 = vtanh.f32 %v4183_v51 }
 0x73d   : > { %6672 = vtanh.f32 %v4182_v11  ;;  %v5896_v10 = vpop.f32.mrb[70].mxu1 }
 0x73e   : > { %v4185_v28 = vmul.f32 0.5, %v5896_v10  ;;  %v3873_v2 = vpop.f32.mrb[71].mxu1 }
 0x73f   : > { %v4184_v8 = vmul.f32 0.5, %v3873_v2 }
 0x740   : > { %6674 = vtanh.f32 %v4185_v28 }
 0x741   : > { %6676 = vtanh.f32 %v4184_v8  ;;  %v5899_v63 = vpop.f32.mrb[72].mxu1 }
 0x742   : > { %v4187_v34 = vmul.f32 0.5, %v5899_v63  ;;  %v3883_v50 = vpop.f32.mrb[73].mxu1 }
 0x743   : > { %v4186_v3 = vmul.f32 0.5, %v3883_v50 }
 0x744   : > { %6678 = vtanh.f32 %v4187_v34  ;;  %v4589_v34 = vld [vmem:[%s7326_s13 + $0x1e8] sm:$0xff] }
 0x745   : > { %6680 = vtanh.f32 %v4186_v3  ;;  %v9312_v24 = vpop.f32.mrb[74].mxu1 }
 0x746   : > { %v6671_v36 = vpop.eup %6670  ;;  %v4189_v17 = vmul.f32 0.5, %v9312_v24  ;;  %v9315_v58 = vpop.f32.mrb[75].mxu1 }
 0x747   : > { %v6673_v14 = vpop.eup %6672  ;;  %v4311_v27 = vmul.f32 0.5, %v6671_v36  ;;  %v4188_v41 = vmul.f32 0.5, %v9315_v58  ;;  %v4590_v36 = vld [vmem:[%s7326_s13 + $0x1f0] sm:$0xff] }
 0x748   : > { %v4310_v55 = vmul.f32 0.5, %v6673_v14  ;;  %6682 = vtanh.f32 %v4189_v17  ;;  %v4591_v17 = vld [vmem:[%s7326_s13 + $0x1f8] sm:$0xff]  ;;  %s7099_s13 = smov [#allocation8]  }
 0x749   : > { %v4375_v7 = vadd.f32 0.5, %v4311_v27  ;;  %6684 = vtanh.f32 %v4188_v41  ;;  %v9318_v31 = vpop.f32.mrb[76].mxu1  ;;  %v6201_v41 = vpack.c.bf16 %v4589_v34, %v4588_v5  ;;  %s4677_s29 = sshll.u32 %s7099_s13, 4  ;;  %s4678_s29 = int_to_ptr.vmem [resolvable:$true] %s4677_s29 }
 0x74a   : > { %v6675_v33 = vpop.eup %6674  ;;  %v4374_v48 = vadd.f32 0.5, %v4310_v55  ;;  %v4191_v54 = vmul.f32 0.5, %v9318_v31  ;;  %v9321_v12 = vpop.f32.mrb[77].mxu1  ;;  %s7014_s20 = scalar_lea.vmem %s4678_s29, 32  ;;  %p7021_p2 = scmp.lt.s32.totalorder %s4678_s29, %s4678_s29 }
 0x74b   : > { %v6677_v15 = vpop.eup %6676  ;;  %v4439_v26 = vmul.f32 %v5893_v13, %v4375_v7  ;;  %v4313_v59 = vmul.f32 0.5, %v6675_v33  ;;  %v4190_v56 = vmul.f32 0.5, %v9321_v12  ;;  %6202 = vmatpush3.bf16.msra.mxu0 %v6201_v41  ;;  %p7015_p10 = scmp.ne.s32.totalorder %s4678_s29, %s7014_s20  ;;  %p7022_p13 = scmp.lt.s32.totalorder %s7014_s20, %s7014_s20 }
 0x74c   : > { %v4438_v57 = vmul.f32 %v4374_v48, %v3863_v42  ;;  %v4312_v9 = vmul.f32 0.5, %v6677_v15  ;;  %6686 = vtanh.f32 %v4191_v54  ;;  %6203 = vmatprep.subr.bf16.mxu0 %v9673_v49 }
 0x74d   : > { %6688 = vtanh.f32 %v4190_v56  ;;  %v9324_v0 = vpop.f32.mrb[78].mxu1  ;;  %v4377_v43 = vadd.f32 0.5, %v4313_v59  ;;  %v6204_v56 = vpack.c.bf16 %v4591_v17, %v4590_v36  ;;  %p7016_p12 = pnand %p7015_p10, %p6232_p9  ;;  %p7023_p3 = por %p7022_p13, %p7021_p2 }
 0x74e   : > { %v6679_v21 = vpop.eup %6678  ;;  %v4502_v23 = vadd.f32 %v4439_v26, %v4438_v57  ;;  %v4376_v1 = vadd.f32 0.5, %v4312_v9  ;;  %v4193_v53 = vmul.f32 0.5, %v9324_v0  ;;  %v9327_v39 = vpop.f32.mrb[79].mxu1 }
 0x74f   : > { %v6681_v18 = vpop.eup %6680  ;;  %v4315_v62 = vmul.f32 0.5, %v6679_v21  ;;  %v4192_v20 = vmul.f32 0.5, %v9327_v39  ;;  %v4441_v29 = vmul.f32 %v5896_v10, %v4377_v43  ;;  %6205 = vmatpush3.bf16.msra.mxu0 %v6204_v56  ;;  %p7017_p0 = pneg %p7016_p12 }
 0x750   : > { %v4440_v4 = vmul.f32 %v4376_v1, %v3873_v2  ;;  %v4314_v19 = vmul.f32 0.5, %v6681_v18  ;;  %6690 = vtanh.f32 %v4193_v53 }
 0x751   : > { %v4379_v35 = vadd.f32 0.5, %v4315_v62  ;;  %6692 = vtanh.f32 %v4192_v20  ;;  %v9330_v32 = vpop.f32.mrb[80].mxu1  ;;  %p7024_p1 = pnand %p7023_p3, %p7017_p0 }
 0x752   : > { %v6683_v44 = vpop.eup %6682  ;;  %v4503_v52 = vadd.f32 %v4502_v23, %v4440_v4  ;;  %v4378_v45 = vadd.f32 0.5, %v4314_v19  ;;  %v4195_v37 = vmul.f32 0.5, %v9330_v32  ;;  %v9333_v46 = vpop.f32.mrb[81].mxu1 }
 0x753   : > { %v6685_v16 = vpop.eup %6684  ;;  %v4317_v40 = vmul.f32 0.5, %v6683_v44  ;;  %v4194_v6 = vmul.f32 0.5, %v9333_v46  ;;  %v4443_v22 = vmul.f32 %v5899_v63, %v4379_v35 }
 0x754   : > { %v4442_v61 = vmul.f32 %v4378_v45, %v3883_v50  ;;  %v4504_v47 = vadd.f32 %v4503_v52, %v4441_v29  ;;  %v4316_v30 = vmul.f32 0.5, %v6685_v16  ;;  %6694 = vtanh.f32 %v4195_v37 }
 0x755   : > { %6696 = vtanh.f32 %v4194_v6  ;;  %v9336_v13 = vpop.f32.mrb[82].mxu1  ;;  %v4381_v11 = vadd.f32 0.5, %v4317_v40 }
 0x756   : > { %v6687_v51 = vpop.eup %6686  ;;  %v4505_v42 = vadd.f32 %v4504_v47, %v4442_v61  ;;  %v4380_v10 = vadd.f32 0.5, %v4316_v30  ;;  %v4197_v28 = vmul.f32 0.5, %v9336_v13  ;;  %v9339_v2 = vpop.f32.mrb[83].mxu1 }
 0x757   : > { %v6689_v8 = vpop.eup %6688  ;;  %v4319_v38 = vmul.f32 0.5, %v6687_v51  ;;  %v4196_v60 = vmul.f32 0.5, %v9339_v2  ;;  %v4445_v7 = vmul.f32 %v9312_v24, %v4381_v11 }
 0x758   : > { %v4444_v63 = vmul.f32 %v4380_v10, %v9315_v58  ;;  %v4506_v50 = vadd.f32 %v4505_v42, %v4443_v22  ;;  %v4318_v3 = vmul.f32 0.5, %v6689_v8  ;;  %6698 = vtanh.f32 %v4197_v28 }
 0x759   : > { %v4383_v14 = vadd.f32 0.5, %v4319_v38  ;;  %6700 = vtanh.f32 %v4196_v60  ;;  %v9347_v27 = vpop.f32.mrb[84].mxu1 }
 0x75a   : > { %v6691_v55 = vpop.eup %6690  ;;  %v4507_v33 = vadd.f32 %v4506_v50, %v4444_v63  ;;  %v4382_v48 = vadd.f32 0.5, %v4318_v3  ;;  %v4199_v54 = vmul.f32 0.5, %v9347_v27  ;;  %v9351_v15 = vpop.f32.mrb[85].mxu1 }
 0x75b   : > { %v6693_v58 = vpop.eup %6692  ;;  %v4321_v26 = vmul.f32 0.5, %v6691_v55  ;;  %v4198_v59 = vmul.f32 0.5, %v9351_v15  ;;  %v4447_v24 = vmul.f32 %v9318_v31, %v4383_v14 }
 0x75c   : > { %v4446_v57 = vmul.f32 %v4382_v48, %v9321_v12  ;;  %v4508_v9 = vadd.f32 %v4507_v33, %v4445_v7  ;;  %v4320_v21 = vmul.f32 0.5, %v6693_v58  ;;  %6702 = vtanh.f32 %v4199_v54 }
 0x75d   : > { %6704 = vtanh.f32 %v4198_v59  ;;  %v9357_v23 = vpop.f32.mrb[86].mxu1  ;;  %v4385_v53 = vadd.f32 0.5, %v4321_v26 }
 0x75e   : > { %v6695_v43 = vpop.eup %6694  ;;  %v4509_v1 = vadd.f32 %v4508_v9, %v4446_v57  ;;  %v4384_v18 = vadd.f32 0.5, %v4320_v21  ;;  %v4201_v62 = vmul.f32 0.5, %v9357_v23  ;;  %v9360_v20 = vpop.f32.mrb[87].mxu1 }
 0x75f   : > { %v6697_v4 = vpop.eup %6696  ;;  %v4323_v12 = vmul.f32 0.5, %v6695_v43  ;;  %v4200_v19 = vmul.f32 0.5, %v9360_v20  ;;  %v4449_v45 = vmul.f32 %v9324_v0, %v4385_v53 }
 0x760   : > { %v4448_v49 = vmul.f32 %v4384_v18, %v9327_v39  ;;  %v4510_v35 = vadd.f32 %v4509_v1, %v4447_v24  ;;  %v4322_v31 = vmul.f32 0.5, %v6697_v4  ;;  %6706 = vtanh.f32 %v4201_v62 }
 0x761   : > { %v4387_v44 = vadd.f32 0.5, %v4323_v12  ;;  %6708 = vtanh.f32 %v4200_v19  ;;  %v9364_v29 = vpop.f32.mrb[88].mxu1 }
 0x762   : > { %v6699_v52 = vpop.eup %6698  ;;  %v4511_v37 = vadd.f32 %v4510_v35, %v4448_v49  ;;  %v4386_v16 = vadd.f32 0.5, %v4322_v31  ;;  %v4203_v40 = vmul.f32 0.5, %v9364_v29  ;;  %v9368_v6 = vpop.f32.mrb[89].mxu1 }
 0x763   : > { %v6701_v61 = vpop.eup %6700  ;;  %v4325_v47 = vmul.f32 0.5, %v6699_v52  ;;  %v4202_v39 = vmul.f32 0.5, %v9368_v6  ;;  %v4451_v42 = vmul.f32 %v9330_v32, %v4387_v44 }
 0x764   : > { %v4450_v30 = vmul.f32 %v4386_v16, %v9333_v46  ;;  %v4512_v22 = vadd.f32 %v4511_v37, %v4449_v45  ;;  %v4324_v51 = vmul.f32 0.5, %v6701_v61  ;;  %6710 = vtanh.f32 %v4203_v40 }
 0x765   : > { %6712 = vtanh.f32 %v4202_v39  ;;  %v9373_v11 = vpop.f32.mrb[90].mxu1  ;;  %v4389_v28 = vadd.f32 0.5, %v4325_v47 }
 0x766   : > { %v6703_v0 = vpop.eup %6702  ;;  %v4513_v10 = vadd.f32 %v4512_v22, %v4450_v30  ;;  %v4388_v8 = vadd.f32 0.5, %v4324_v51  ;;  %v4205_v38 = vmul.f32 0.5, %v9373_v11  ;;  %v9376_v60 = vpop.f32.mrb[91].mxu1 }
 0x767   : > { %v6705_v5 = vpop.eup %6704  ;;  %v4327_v34 = vmul.f32 0.5, %v6703_v0  ;;  %v4204_v46 = vmul.f32 0.5, %v9376_v60  ;;  %v4453_v14 = vmul.f32 %v9336_v13, %v4389_v28 }
 0x768   : > { %v4452_v63 = vmul.f32 %v4388_v8, %v9339_v2  ;;  %v4514_v50 = vadd.f32 %v4513_v10, %v4451_v42  ;;  %v4326_v3 = vmul.f32 0.5, %v6705_v5  ;;  %6714 = vtanh.f32 %v4205_v38 }
 0x769   : > { %v4391_v32 = vadd.f32 0.5, %v4327_v34  ;;  %6716 = vtanh.f32 %v4204_v46  ;;  %v9380_v36 = vpop.f32.mrb[92].mxu1 }
 0x76a   : > { %v6707_v17 = vpop.eup %6706  ;;  %v4515_v41 = vadd.f32 %v4514_v50, %v4452_v63  ;;  %v4390_v55 = vadd.f32 0.5, %v4326_v3  ;;  %v4207_v7 = vmul.f32 0.5, %v9380_v36  ;;  %v9384_v33 = vpop.f32.mrb[93].mxu1 }
 0x76b   : > { %v6709_v48 = vpop.eup %6708  ;;  %v4329_v54 = vmul.f32 0.5, %v6707_v17  ;;  %v4206_v2 = vmul.f32 0.5, %v9384_v33  ;;  %v4455_v56 = vmul.f32 %v9347_v27, %v4391_v32 }
 0x76c   : > { %v4454_v58 = vmul.f32 %v4390_v55, %v9351_v15  ;;  %v4516_v26 = vadd.f32 %v4515_v41, %v4453_v14  ;;  %v4328_v59 = vmul.f32 0.5, %v6709_v48  ;;  %6718 = vtanh.f32 %v4207_v7 }
 0x76d   : > { %6720 = vtanh.f32 %v4206_v2  ;;  %v9389_v57 = vpop.f32.mrb[94].mxu1  ;;  %v4393_v21 = vadd.f32 0.5, %v4329_v54 }
 0x76e   : > { %v6711_v13 = vpop.eup %6710  ;;  %v4517_v9 = vadd.f32 %v4516_v26, %v4454_v58  ;;  %v4392_v24 = vadd.f32 0.5, %v4328_v59  ;;  %v4209_v43 = vmul.f32 0.5, %v9389_v57  ;;  %v9392_v1 = vpop.f32.mrb[95].mxu1 }
 0x76f   : > { %v6713_v53 = vpop.eup %6712  ;;  %v4331_v18 = vmul.f32 0.5, %v6711_v13  ;;  %v4208_v15 = vmul.f32 0.5, %v9392_v1  ;;  %v4457_v35 = vmul.f32 %v9357_v23, %v4393_v21 }
 0x770   : > { %v4456_v62 = vmul.f32 %v4392_v24, %v9360_v20  ;;  %v4518_v4 = vadd.f32 %v4517_v9, %v4455_v56  ;;  %v4330_v12 = vmul.f32 0.5, %v6713_v53  ;;  %6722 = vtanh.f32 %v4209_v43 }
 0x771   : > { %v4395_v27 = vadd.f32 0.5, %v4331_v18  ;;  %6724 = vtanh.f32 %v4208_v15  ;;  %v9396_v19 = vpop.f32.mrb[96].mxu1 }
 0x772   : > { %v6715_v49 = vpop.eup %6714  ;;  %v4519_v31 = vadd.f32 %v4518_v4, %v4456_v62  ;;  %v4394_v44 = vadd.f32 0.5, %v4330_v12  ;;  %v4211_v52 = vmul.f32 0.5, %v9396_v19  ;;  %v9400_v45 = vpop.f32.mrb[97].mxu1 }
 0x773   : > { %v6717_v37 = vpop.eup %6716  ;;  %v4333_v16 = vmul.f32 0.5, %v6715_v49  ;;  %v4210_v20 = vmul.f32 0.5, %v9400_v45  ;;  %v4459_v39 = vmul.f32 %v9364_v29, %v4395_v27 }
 0x774   : > { %v4458_v40 = vmul.f32 %v4394_v44, %v9368_v6  ;;  %v4520_v61 = vadd.f32 %v4519_v31, %v4457_v35  ;;  %v4332_v47 = vmul.f32 0.5, %v6717_v37  ;;  %6726 = vtanh.f32 %v4211_v52 }
 0x775   : > { %6728 = vtanh.f32 %v4210_v20  ;;  %v9405_v30 = vpop.f32.mrb[98].mxu1  ;;  %v4397_v51 = vadd.f32 0.5, %v4333_v16 }
 0x776   : > { %v6719_v23 = vpop.eup %6718  ;;  %v4521_v22 = vadd.f32 %v4520_v61, %v4458_v40  ;;  %v4396_v42 = vadd.f32 0.5, %v4332_v47  ;;  %v4213_v0 = vmul.f32 0.5, %v9405_v30  ;;  %v9408_v10 = vpop.f32.mrb[99].mxu1 }
 0x777   : > { %v6721_v28 = vpop.eup %6720  ;;  %v4335_v8 = vmul.f32 0.5, %v6719_v23  ;;  %v4212_v6 = vmul.f32 0.5, %v9408_v10  ;;  %v4461_v50 = vmul.f32 %v9373_v11, %v4397_v51 }
 0x778   : > { %v4460_v38 = vmul.f32 %v4396_v42, %v9376_v60  ;;  %v4522_v5 = vadd.f32 %v4521_v22, %v4459_v39  ;;  %v4334_v34 = vmul.f32 0.5, %v6721_v28  ;;  %6730 = vtanh.f32 %v4213_v0 }
 0x779   : > { %v4399_v29 = vadd.f32 0.5, %v4335_v8  ;;  %6732 = vtanh.f32 %v4212_v6  ;;  %v9412_v46 = vpop.f32.mrb[100].mxu1 }
 0x77a   : > { %v6723_v63 = vpop.eup %6722  ;;  %v4523_v3 = vadd.f32 %v4522_v5, %v4460_v38  ;;  %v4398_v32 = vadd.f32 0.5, %v4334_v34  ;;  %v4215_v17 = vmul.f32 0.5, %v9412_v46  ;;  %v9416_v14 = vpop.f32.mrb[101].mxu1 }
 0x77b   : > { %v6725_v41 = vpop.eup %6724  ;;  %v4337_v55 = vmul.f32 0.5, %v6723_v63  ;;  %v4214_v60 = vmul.f32 0.5, %v9416_v14  ;;  %v4463_v2 = vmul.f32 %v9380_v36, %v4399_v29 }
 0x77c   : > { %v4462_v7 = vmul.f32 %v4398_v32, %v9384_v33  ;;  %v4524_v48 = vadd.f32 %v4523_v3, %v4461_v50  ;;  %v4336_v54 = vmul.f32 0.5, %v6725_v41  ;;  %6734 = vtanh.f32 %v4215_v17 }
 0x77d   : > { %6736 = vtanh.f32 %v4214_v60  ;;  %v9421_v58 = vpop.f32.mrb[102].mxu1  ;;  %v4401_v59 = vadd.f32 0.5, %v4337_v55 }
 0x77e   : > { %v6727_v11 = vpop.eup %6726  ;;  %v4525_v26 = vadd.f32 %v4524_v48, %v4462_v7  ;;  %v4400_v56 = vadd.f32 0.5, %v4336_v54  ;;  %v4217_v13 = vmul.f32 0.5, %v9421_v58  ;;  %v9424_v9 = vpop.f32.mrb[103].mxu1 }
 0x77f   : > { %v6729_v21 = vpop.eup %6728  ;;  %v4339_v24 = vmul.f32 0.5, %v6727_v11  ;;  %v4216_v33 = vmul.f32 0.5, %v9424_v9  ;;  %v4465_v4 = vmul.f32 %v9389_v57, %v4401_v59 }
 0x780   : > { %v4464_v43 = vmul.f32 %v4400_v56, %v9392_v1  ;;  %v4526_v53 = vadd.f32 %v4525_v26, %v4463_v2  ;;  %v4338_v18 = vmul.f32 0.5, %v6729_v21  ;;  %6738 = vtanh.f32 %v4217_v13 }
 0x781   : > { %v4403_v36 = vadd.f32 0.5, %v4339_v24  ;;  %6740 = vtanh.f32 %v4216_v33  ;;  %v9428_v15 = vpop.f32.mrb[104].mxu1 }
 0x782   : > { %v6731_v62 = vpop.eup %6730  ;;  %v4527_v12 = vadd.f32 %v4526_v53, %v4464_v43  ;;  %v4402_v27 = vadd.f32 0.5, %v4338_v18  ;;  %v4219_v49 = vmul.f32 0.5, %v9428_v15  ;;  %v9432_v35 = vpop.f32.mrb[105].mxu1 }
 0x783   : > { %v6733_v31 = vpop.eup %6732  ;;  %v4341_v44 = vmul.f32 0.5, %v6731_v62  ;;  %v4218_v1 = vmul.f32 0.5, %v9432_v35  ;;  %v4467_v20 = vmul.f32 %v9396_v19, %v4403_v36 }
 0x784   : > { %v4466_v52 = vmul.f32 %v4402_v27, %v9400_v45  ;;  %v4528_v37 = vadd.f32 %v4527_v12, %v4465_v4  ;;  %v4340_v16 = vmul.f32 0.5, %v6733_v31  ;;  %6742 = vtanh.f32 %v4219_v49 }
 0x785   : > { %6744 = vtanh.f32 %v4218_v1  ;;  %v9437_v40 = vpop.f32.mrb[106].mxu1  ;;  %v4405_v47 = vadd.f32 0.5, %v4341_v44 }
 0x786   : > { %v6735_v57 = vpop.eup %6734  ;;  %v4529_v61 = vadd.f32 %v4528_v37, %v4466_v52  ;;  %v4404_v39 = vadd.f32 0.5, %v4340_v16  ;;  %v4221_v23 = vmul.f32 0.5, %v9437_v40  ;;  %v9440_v22 = vpop.f32.mrb[107].mxu1 }
 0x787   : > { %v6737_v51 = vpop.eup %6736  ;;  %v4343_v42 = vmul.f32 0.5, %v6735_v57  ;;  %v4220_v45 = vmul.f32 0.5, %v9440_v22  ;;  %v4469_v5 = vmul.f32 %v9405_v30, %v4405_v47 }
 0x788   : > { %v4468_v0 = vmul.f32 %v4404_v39, %v9408_v10  ;;  %v4530_v28 = vadd.f32 %v4529_v61, %v4467_v20  ;;  %v4342_v8 = vmul.f32 0.5, %v6737_v51  ;;  %6746 = vtanh.f32 %v4221_v23 }
 0x789   : > { %v4407_v19 = vadd.f32 0.5, %v4343_v42  ;;  %6748 = vtanh.f32 %v4220_v45  ;;  %v9444_v6 = vpop.f32.mrb[108].mxu1 }
 0x78a   : > { %v6739_v38 = vpop.eup %6738  ;;  %v4531_v34 = vadd.f32 %v4530_v28, %v4468_v0  ;;  %v4406_v29 = vadd.f32 0.5, %v4342_v8  ;;  %v4223_v63 = vmul.f32 0.5, %v9444_v6  ;;  %v9448_v50 = vpop.f32.mrb[109].mxu1 }
 0x78b   : > { %v6741_v3 = vpop.eup %6740  ;;  %v4471_v32 = vmul.f32 %v9412_v46, %v4407_v19  ;;  %v4345_v10 = vmul.f32 0.5, %v6739_v38  ;;  %v4222_v17 = vmul.f32 0.5, %v9448_v50 }
 0x78c   : > { %v9452_v41 = vadd.f32 %v4531_v34, %v4469_v5  ;;  %v4470_v55 = vmul.f32 %v4406_v29, %v9416_v14  ;;  %v4344_v60 = vmul.f32 0.5, %v6741_v3  ;;  %6750 = vtanh.f32 %v4223_v63 }
 0x78d   : > { %v4409_v7 = vadd.f32 0.5, %v4345_v10  ;;  %6752 = vtanh.f32 %v4222_v17  ;;  %v9455_v30 = vpop.f32.mrb[110].mxu1 }
 0x78e   : > { %v6743_v48 = vpop.eup %6742  ;;  %v4539_v54 = vadd.f32 %v4471_v32, %v4470_v55  ;;  %v4408_v2 = vadd.f32 0.5, %v4344_v60  ;;  %v4225_v11 = vmul.f32 0.5, %v9455_v30  ;;  %v9458_v26 = vpop.f32.mrb[111].mxu1 }
 0x78f   : > { %v6745_v46 = vpop.eup %6744  ;;  %v4347_v59 = vmul.f32 0.5, %v6743_v48  ;;  %v4224_v56 = vmul.f32 0.5, %v9458_v26  ;;  %v4473_v21 = vmul.f32 %v9421_v58, %v4409_v7 }
 0x790   : > { %v4472_v13 = vmul.f32 %v4408_v2, %v9424_v9  ;;  %v4346_v14 = vmul.f32 0.5, %v6745_v46  ;;  %6754 = vtanh.f32 %v4225_v11 }
 0x791   : > { %6756 = vtanh.f32 %v4224_v56  ;;  %v9463_v24 = vpop.f32.mrb[112].mxu1  ;;  %v4411_v53 = vadd.f32 0.5, %v4347_v59 }
 0x792   : > { %v6747_v33 = vpop.eup %6746  ;;  %v4540_v43 = vadd.f32 %v4539_v54, %v4472_v13  ;;  %v4410_v18 = vadd.f32 0.5, %v4346_v14  ;;  %v4227_v36 = vmul.f32 0.5, %v9463_v24  ;;  %v9466_v62 = vpop.f32.mrb[113].mxu1 }
 0x793   : > { %v6749_v4 = vpop.eup %6748  ;;  %v4349_v12 = vmul.f32 0.5, %v6747_v33  ;;  %v4226_v27 = vmul.f32 0.5, %v9466_v62  ;;  %v4475_v52 = vmul.f32 %v9428_v15, %v4411_v53 }
 0x794   : > { %v4474_v9 = vmul.f32 %v4410_v18, %v9432_v35  ;;  %v4541_v49 = vadd.f32 %v4540_v43, %v4473_v21  ;;  %v4348_v31 = vmul.f32 0.5, %v6749_v4  ;;  %6758 = vtanh.f32 %v4227_v36 }
 0x795   : > { %v4413_v58 = vadd.f32 0.5, %v4349_v12  ;;  %v9470_v44 = vpop.f32.mrb[114].mxu1  ;;  %6760 = vtanh.f32 %v4226_v27 }
 0x796   : > { %v6751_v1 = vpop.eup %6750  ;;  %v4542_v37 = vadd.f32 %v4541_v49, %v4474_v9  ;;  %v4412_v16 = vadd.f32 0.5, %v4348_v31  ;;  %v9473_v20 = vpop.f32.mrb[115].mxu1  ;;  %v4229_v47 = vmul.f32 0.5, %v9470_v44 }
 0x797   : > { %v6753_v57 = vpop.eup %6752  ;;  %v4351_v61 = vmul.f32 0.5, %v6751_v1  ;;  %v4228_v35 = vmul.f32 0.5, %v9473_v20  ;;  %v4477_v42 = vmul.f32 %v9437_v40, %v4413_v58 }
 0x798   : > { %v4476_v39 = vmul.f32 %v4412_v16, %v9440_v22  ;;  %v4543_v23 = vadd.f32 %v4542_v37, %v4475_v52  ;;  %v4350_v51 = vmul.f32 0.5, %v6753_v57  ;;  %6762 = vtanh.f32 %v4229_v47 }
 0x799   : > { %v4415_v45 = vadd.f32 0.5, %v4351_v61  ;;  %v9479_v15 = vpop.f32.mrb[116].mxu1  ;;  %6764 = vtanh.f32 %v4228_v35 }
 0x79a   : > { %v6755_v0 = vpop.eup %6754  ;;  %v4544_v28 = vadd.f32 %v4543_v23, %v4476_v39  ;;  %v4414_v8 = vadd.f32 0.5, %v4350_v51  ;;  %v4231_v19 = vmul.f32 0.5, %v9479_v15  ;;  %v9482_v38 = vpop.f32.mrb[117].mxu1 }
 0x79b   : > { %v6757_v5 = vpop.eup %6756  ;;  %v4353_v34 = vmul.f32 0.5, %v6755_v0  ;;  %v4230_v22 = vmul.f32 0.5, %v9482_v38  ;;  %v4479_v3 = vmul.f32 %v9444_v6, %v4415_v45 }
 0x79c   : > { %v4478_v29 = vmul.f32 %v4414_v8, %v9448_v50  ;;  %v4545_v63 = vadd.f32 %v4544_v28, %v4477_v42  ;;  %v4352_v40 = vmul.f32 0.5, %v6757_v5  ;;  %6766 = vtanh.f32 %v4231_v19 }
 0x79d   : > { %6768 = vtanh.f32 %v4230_v22  ;;  %v9487_v32 = vpop.f32.mrb[118].mxu1  ;;  %v4417_v17 = vadd.f32 0.5, %v4353_v34 }
 0x79e   : > { %v4546_v10 = vadd.f32 %v4545_v63, %v4478_v29  ;;  %v4416_v55 = vadd.f32 0.5, %v4352_v40  ;;  %v4233_v60 = vmul.f32 0.5, %v9487_v32  ;;  %v9490_v7 = vpop.f32.mrb[119].mxu1  ;;  %v6759_v48 = vpop.eup %6758 }
 0x79f   : > { %v4232_v54 = vmul.f32 0.5, %v9490_v7  ;;  %v6761_v2 = vpop.eup %6760  ;;  %v4355_v46 = vmul.f32 0.5, %v6759_v48  ;;  %v4481_v56 = vmul.f32 %v9455_v30, %v4417_v17 }
 0x7a0   : > { %v4480_v50 = vmul.f32 %v4416_v55, %v9458_v26  ;;  %v4547_v11 = vadd.f32 %v4546_v10, %v4479_v3  ;;  %6770 = vtanh.f32 %v4233_v60  ;;  %v4354_v6 = vmul.f32 0.5, %v6761_v2 }
 0x7a1   : > { %6772 = vtanh.f32 %v4232_v54  ;;  %v9494_v59 = vpop.f32.mrb[120].mxu1  ;;  %v4419_v14 = vadd.f32 0.5, %v4355_v46 }
 0x7a2   : > { %v4548_v13 = vadd.f32 %v4547_v11, %v4480_v50  ;;  %v4235_v21 = vmul.f32 0.5, %v9494_v59  ;;  %v9498_v33 = vpop.f32.mrb[121].mxu1  ;;  %v6763_v43 = vpop.eup %6762  ;;  %v4418_v53 = vadd.f32 0.5, %v4354_v6 }
 0x7a3   : > { %v4234_v18 = vmul.f32 0.5, %v9498_v33  ;;  %v6765_v26 = vpop.eup %6764  ;;  %v4357_v4 = vmul.f32 0.5, %v6763_v43  ;;  %v4483_v49 = vmul.f32 %v9463_v24, %v4419_v14 }
 0x7a4   : > { %v4549_v36 = vadd.f32 %v4548_v13, %v4481_v56  ;;  %6774 = vtanh.f32 %v4235_v21  ;;  %v4482_v12 = vmul.f32 %v4418_v53, %v9466_v62  ;;  %v4356_v27 = vmul.f32 0.5, %v6765_v26 }
 0x7a5   : > { %6776 = vtanh.f32 %v4234_v18  ;;  %v9502_v9 = vpop.f32.mrb[122].mxu1  ;;  %v4421_v31 = vadd.f32 0.5, %v4357_v4 }
 0x7a6   : > { %v6767_v30 = vpop.eup %6766  ;;  %v4237_v58 = vmul.f32 0.5, %v9502_v9  ;;  %v9506_v1 = vpop.f32.mrb[123].mxu1  ;;  %v4550_v37 = vadd.f32 %v4549_v36, %v4482_v12  ;;  %v4420_v16 = vadd.f32 0.5, %v4356_v27 }
 0x7a7   : > { %v6769_v52 = vpop.eup %6768  ;;  %v4359_v57 = vmul.f32 0.5, %v6767_v30  ;;  %v4236_v61 = vmul.f32 0.5, %v9506_v1  ;;  %v4485_v28 = vmul.f32 %v9470_v44, %v4421_v31 }
 0x7a8   : > { %v4358_v47 = vmul.f32 0.5, %v6769_v52  ;;  %6778 = vtanh.f32 %v4237_v58  ;;  %v4484_v62 = vmul.f32 %v4420_v16, %v9473_v20  ;;  %v4551_v35 = vadd.f32 %v4550_v37, %v4483_v49 }
 0x7a9   : > { %6780 = vtanh.f32 %v4236_v61  ;;  %v9510_v39 = vpop.f32.mrb[124].mxu1  ;;  %v4423_v23 = vadd.f32 0.5, %v4359_v57 }
 0x7aa   : > { %v6771_v24 = vpop.eup %6770  ;;  %v4422_v51 = vadd.f32 0.5, %v4358_v47  ;;  %v4239_v42 = vmul.f32 0.5, %v9510_v39  ;;  %v9513_v45 = vpop.f32.mrb[125].mxu1  ;;  %v4552_v8 = vadd.f32 %v4551_v35, %v4484_v62 }
 0x7ab   : > { %v6773_v0 = vpop.eup %6772  ;;  %v4361_v19 = vmul.f32 0.5, %v6771_v24  ;;  %v4238_v5 = vmul.f32 0.5, %v9513_v45  ;;  %v4487_v40 = vmul.f32 %v9479_v15, %v4423_v23 }
 0x7ac   : > { %v4486_v20 = vmul.f32 %v4422_v51, %v9482_v38  ;;  %v4360_v34 = vmul.f32 0.5, %v6773_v0  ;;  %6782 = vtanh.f32 %v4239_v42  ;;  %v4553_v22 = vadd.f32 %v4552_v8, %v4485_v28 }
 0x7ad   : > { %6784 = vtanh.f32 %v4238_v5  ;;  %v9518_v29 = vpop.f32.mrb[126].mxu1  ;;  %v4425_v60 = vadd.f32 0.5, %v4361_v19 }
 0x7ae   : > { %v6775_v63 = vpop.eup %6774  ;;  %v4424_v3 = vadd.f32 0.5, %v4360_v34  ;;  %v4241_v10 = vmul.f32 0.5, %v9518_v29  ;;  %v4153_v17 = vpop.f32.mrb[127].mxu1  ;;  %v4554_v55 = vadd.f32 %v4553_v22, %v4486_v20 }
 0x7af   : > { %v6777_v44 = vpop.eup %6776  ;;  %v4363_v48 = vmul.f32 0.5, %v6775_v63  ;;  %v4240_v54 = vmul.f32 0.5, %v4153_v17  ;;  %v4489_v21 = vmul.f32 %v9487_v32, %v4425_v60 }
 0x7b0   : > { %v4488_v38 = vmul.f32 %v4424_v3, %v9490_v7  ;;  %v4362_v2 = vmul.f32 0.5, %v6777_v44  ;;  %6786 = vtanh.f32 %v4241_v10  ;;  %v4555_v50 = vadd.f32 %v4554_v55, %v4487_v40 }
 0x7b1   : > { %6788 = vtanh.f32 %v4240_v54  ;;  %v9523_v11 = vpop.f32.mrb[128].mxu1  ;;  %v4427_v6 = vadd.f32 0.5, %v4363_v48 }
 0x7b2   : > { %v6779_v46 = vpop.eup %6778  ;;  %v4426_v15 = vadd.f32 0.5, %v4362_v2  ;;  %v4243_v56 = vmul.f32 0.5, %v9523_v11  ;;  %v4163_v13 = vpop.f32.mrb[129].mxu1  ;;  %v4556_v43 = vadd.f32 %v4555_v50, %v4488_v38  ;;  %v4533_v2 = vrot.slane %v9452_v41, 4 }
 0x7b3   : > { %v6781_v14 = vpop.eup %6780  ;;  %v4365_v53 = vmul.f32 0.5, %v6779_v46  ;;  %v4242_v18 = vmul.f32 0.5, %v4163_v13  ;;  %v4491_v27 = vmul.f32 %v9494_v59, %v4427_v6 }
 0x7b4   : > { %v4490_v7 = vmul.f32 %v4426_v15, %v9498_v33  ;;  %v4364_v26 = vmul.f32 0.5, %v6781_v14  ;;  %6790 = vtanh.f32 %v4243_v56  ;;  %v4557_v36 = vadd.f32 %v4556_v43, %v4489_v21 }
 0x7b5   : > { %6792 = vtanh.f32 %v4242_v18  ;;  %v5986_v4 = vpop.f32.mrb[130].mxu1  ;;  %v4429_v37 = vadd.f32 0.5, %v4365_v53  ;;  %v4534_v56 = vadd.f32 %v4533_v2, %v9452_v41 }
 0x7b6   : > { %v6783_v12 = vpop.eup %6782  ;;  %v4428_v30 = vadd.f32 0.5, %v4364_v26  ;;  %v4245_v49 = vmul.f32 0.5, %v5986_v4  ;;  %v4173_v31 = vpop.f32.mrb[131].mxu1  ;;  %v4558_v52 = vadd.f32 %v4557_v36, %v4490_v7 }
 0x7b7   : > { %v6785_v58 = vpop.eup %6784  ;;  %v4367_v32 = vmul.f32 0.5, %v6783_v12  ;;  %v4244_v16 = vmul.f32 0.5, %v4173_v31  ;;  %v4493_v24 = vmul.f32 %v9502_v9, %v4429_v37 }
 0x7b8   : > { %v4492_v57 = vmul.f32 %v4428_v30, %v9506_v1  ;;  %v4366_v61 = vmul.f32 0.5, %v6785_v58  ;;  %6794 = vtanh.f32 %v4245_v49  ;;  %v4559_v33 = vadd.f32 %v4558_v52, %v4491_v27 }
 0x7b9   : > { %6796 = vtanh.f32 %v4244_v16  ;;  %v4431_v23 = vadd.f32 0.5, %v4367_v32 }
 0x7ba   : > { %v6787_v47 = vpop.eup %6786  ;;  %v4430_v62 = vadd.f32 0.5, %v4366_v61  ;;  %v4560_v59 = vadd.f32 %v4559_v33, %v4492_v57 }
 0x7bb   : > { %v6789_v35 = vpop.eup %6788  ;;  %v4369_v51 = vmul.f32 0.5, %v6787_v47  ;;  %v4495_v1 = vmul.f32 %v9510_v39, %v4431_v23 }
 0x7bc   : > { %v4494_v42 = vmul.f32 %v4430_v62, %v9513_v45  ;;  %v4368_v0 = vmul.f32 0.5, %v6789_v35  ;;  %v4561_v28 = vadd.f32 %v4560_v59, %v4493_v24 }
 0x7bd   : > { %v4433_v34 = vadd.f32 0.5, %v4369_v51 }
 0x7be   : > { %v6791_v8 = vpop.eup %6790  ;;  %v4432_v19 = vadd.f32 0.5, %v4368_v0  ;;  %v4562_v20 = vadd.f32 %v4561_v28, %v4494_v42 }
 0x7bf   : > { %v6793_v5 = vpop.eup %6792  ;;  %v4371_v22 = vmul.f32 0.5, %v6791_v8  ;;  %v4497_v55 = vmul.f32 %v9518_v29, %v4433_v34  ;;  %v4535_v29 = vrot.slane %v4534_v56, 2 }
 0x7c0   : > { %v4496_v63 = vmul.f32 %v4432_v19, %v4153_v17  ;;  %v4370_v40 = vmul.f32 0.5, %v6793_v5  ;;  %v4563_v3 = vadd.f32 %v4562_v20, %v4495_v1 }
 0x7c1   : > { %v4435_v45 = vadd.f32 0.5, %v4371_v22  ;;  %v4536_v7 = vadd.f32 %v4535_v29, %v4534_v56 }
 0x7c2   : > { %v6795_v10 = vpop.eup %6794  ;;  %v4434_v9 = vadd.f32 0.5, %v4370_v40  ;;  %v4564_v60 = vadd.f32 %v4563_v3, %v4496_v63 }
 0x7c3   : > { %v6797_v44 = vpop.eup %6796  ;;  %v4373_v48 = vmul.f32 0.5, %v6795_v10  ;;  %v4499_v46 = vmul.f32 %v9523_v11, %v4435_v45  ;;  %v4537_v36 = vrot.slane %v4536_v7, 1 }
 0x7c4   : > { %v4498_v54 = vmul.f32 %v4434_v9, %v4163_v13  ;;  %v4372_v38 = vmul.f32 0.5, %v6797_v44  ;;  %v4565_v50 = vadd.f32 %v4564_v60, %v4497_v55 }
 0x7c5   : > { %v4437_v17 = vadd.f32 0.5, %v4373_v48  ;;  %v4538_v30 = vadd.f32 %v4537_v36, %v4536_v7 }
 0x7c6   : > { %v4436_v39 = vadd.f32 0.5, %v4372_v38  ;;  %v4566_v6 = vadd.f32 %v4565_v50, %v4498_v54 }
 0x7c7   : > { %v4501_v21 = vmul.f32 %v5986_v4, %v4437_v17 }
 0x7c8   : > { %v4500_v15 = vmul.f32 %v4436_v39, %v4173_v31  ;;  %v4567_v14 = vadd.f32 %v4566_v6, %v4499_v46  ;;  %v4667_v31 = vld [vmem:[#allocation8] sm:$0x3] }
 0x7ca   : > { %v4568_v43 = vadd.f32 %v4567_v14, %v4500_v15 }
 0x7cc   : > { %v4569_v53 = vadd.f32 %v4568_v43, %v4501_v21 }
 0x7ce   : > { %v4570_v18 = vrot.slane %v4569_v53, 4 }
 0x7d0   : > { %v4571_v13 = vadd.f32 %v4570_v18, %v4569_v53 }
 0x7d2   : > { %v4572_v26 = vrot.slane %v4571_v13, 2 }
 0x7d4   : > { %v4573_v12 = vadd.f32 %v4572_v26, %v4571_v13 }
 0x7d6   : > { %v4574_v27 = vrot.slane %v4573_v12, 1 }
 0x7d8   : > { %v4575_v11 = vadd.f32 %v4574_v27, %v4573_v12 }
 0x7da   : > { %v4594_v49 = vsel %vm2778_vm4, %v4575_v11, %v4538_v30 }
 0x7db   : > { %6020 = vmatmul.mubr.f32.vlgmr.msra.gmra.mrb[130].mxu0 %v4594_v49 }
 0x8ae   : > { %v4662_v41 = vpop.f32.mrb[130].mxu0 }
 0x8af   : > { %v4666_v4 = vadd.f32 %v4662_v41, %v9307_v25  ;;  %v6021_v58 = vpop.f32.mrb[131].mxu0 }
 0x8b1   : > { %v4668_v52 = vadd.f32 %v4667_v31, %v4666_v4 }
 0x8b3   : > { %4669 = vst [vmem:[#allocation8] sm:$0x3] %v4668_v52 }
 0x8b4   : > { %7027 = shalt.err (!%p7024_p1)
}
 0x8b5   : > { %s7028_s30 = scalar_lea.hbm %s9585_s10, 32 }
 0x8b6   : > { %p7029_p4 = scmp.ne.s32.totalorder %s9585_s10, %s7028_s30  ;;  %p7034_p8 = scmp.lt.u32.totalorder %s7028_s30, %s9585_s10 }
 0x8b8   : > { %p7030_p11 = pnand %p7029_p4, %p6232_p9 }
 0x8ba   : > { %p7031_p7 = pneg %p7030_p11 }
 0x8bc   : > { %p7036_p5 = pnand %p7034_p8, %p7031_p7 }
 0x8be   : > { %7039 = shalt.err (!%p7036_p5)
}
 0x8bf   : > { %6215 = dma.vmem_to_hbm [thread:$0]  (%p6232_p9), %s4678_s29, 32, %s9585_s10, [#allocation4]  }
 0x8c0   : > { %7069 = dma.done.wait (%p6232_p9), [#allocation4], 32  }
 0x8c1   : > { %7071 = vsyncadd (%p6232_p9), [#allocation4], 4294967264 }
 0x8c2 PF: > { %s9728_s28 = sld [smem:[#allocation13_spill]]  ;;  %p24_p6 = scmp.ge.s32.totalorder %s7200_s23, 5  }
 0x8c3   : > { %s9729_s13 = smov %s7078_s14  ;;  %s9730_s14 = smov %s7082_s15 }
 0x8c4   : > { %s9732_s16 = smov %s7200_s23  ;;  %26 = sbr.rel (!%p24_p6) target bundleno = 9 (0x9), region = 118 }
 0x8c8   : > { %s9731_s15 = smov %s9728_s28 }
 0x8cb   :  { %4690 = vsyncpa [#allocation3], 1 }
 0x8cc   :  { %4692 = vsyncpa [#allocation3 + $0x1], 1 }
 0x8cd   :  { %4693 = vsyncpa [#allocation6], 1 }
 0x8ce   :  { %4695 = vsyncpa [#allocation6 + $0x1], 1 }
 0x8cf   :  { %4696 = vsyncpa [#allocation4], 1 }
 0x8d0   :  { %4698 = vsyncpa [#allocation4 + $0x1], 1 }

</bundles_post_ra>
